<compile_context>
chip_gen: v5e
topology: v5e:2x2
jax: 0.10.0
libtpu: 0.0.40
codegen_flags: <defaults>
</compile_context>

<pallas_src>
import math

import jax
import jax.numpy as jnp
from jax import lax
from jax.experimental import pallas as pl
from jax.experimental.pallas import tpu as pltpu

TAU = 0.07      # SupConLoss default temperature
EPS = 1e-12     # F.normalize eps
LANES = 128     # lane-dense packed output row


# ----------------------------------------------------------------------------
# In-kernel helpers (pure jnp on VMEM-resident values)
# ----------------------------------------------------------------------------
def _mlp3(x, w1, b1, w2, b2, w3, b3):
    h = jnp.dot(x, w1, preferred_element_type=jnp.float32) + b1
    h = jnp.maximum(h, 0.0)
    h = jnp.dot(h, w2, preferred_element_type=jnp.float32) + b2
    h = jnp.maximum(h, 0.0)
    return jnp.dot(h, w3, preferred_element_type=jnp.float32) + b3


def _mlp3_split_first(x, e, w1x, w1e, b1, w2, b2, w3, b3):
    # == _mlp3(concat([x, e], axis=1), concat([w1x; w1e], axis=0), ...)
    h = (jnp.dot(x, w1x, preferred_element_type=jnp.float32)
         + jnp.dot(e, w1e, preferred_element_type=jnp.float32) + b1)
    h = jnp.maximum(h, 0.0)
    h = jnp.dot(h, w2, preferred_element_type=jnp.float32) + b2
    h = jnp.maximum(h, 0.0)
    return jnp.dot(h, w3, preferred_element_type=jnp.float32) + b3


def _inv_joint_norm(parts):
    """1 / ||concat(parts, axis=-1)||, clamped at EPS; shape (B, 1)."""
    n2 = jnp.sum(parts[0] * parts[0], axis=-1, keepdims=True)
    for p in parts[1:]:
        n2 = n2 + jnp.sum(p * p, axis=-1, keepdims=True)
    return 1.0 / jnp.maximum(jnp.sqrt(n2), EPS)


def _clip(parts_a, parts_b):
    """Symmetric InfoNCE on the *implicitly concatenated* feature parts.

    Returns (joint, loss_x, loss_y) as (1, 1) float32 arrays.
    """
    inv_na = _inv_joint_norm(parts_a)                  # (B, 1)
    inv_nb = _inv_joint_norm(parts_b)                  # (B, 1)
    B = parts_a[0].shape[0]

    sim = None
    diag = None
    for pa, pb in zip(parts_a, parts_b):
        pan = pa * inv_na
        pbn = pb * inv_nb
        # contract last dims directly: no explicit transpose / relayout
        s_part = lax.dot_general(pan, pbn, (((1,), (1,)), ((), ())),
                                 preferred_element_type=jnp.float32)   # (B, B)
        d_part = jnp.sum(pan * pbn, axis=-1, keepdims=True)            # (B, 1)
        sim = s_part if sim is None else sim + s_part
        diag = d_part if diag is None else diag + d_part

    sim = sim * (1.0 / TAU)
    diag = diag * (1.0 / TAU)

    m_r = jnp.max(sim, axis=-1, keepdims=True)                         # (B, 1)
    lse_r = jnp.log(jnp.sum(jnp.exp(sim - m_r), axis=-1, keepdims=True)) + m_r
    m_c = jnp.max(sim, axis=0, keepdims=True)                          # (1, B)
    lse_c = jnp.log(jnp.sum(jnp.exp(sim - m_c), axis=0, keepdims=True)) + m_c

    sum_diag = jnp.sum(diag, keepdims=True)                            # (1, 1)
    loss_x = (jnp.sum(lse_r, keepdims=True) - sum_diag) / B
    loss_y = (jnp.sum(lse_c, keepdims=True) - sum_diag) / B
    joint = 0.5 * (loss_x + loss_y)
    return joint, loss_x, loss_y


def _ortho(z, e):
    """ortho_loss(z, e, norm=True) = mean(cos(z, e)^2), as (1, 1)."""
    zn = z * _inv_joint_norm([z])
    en = e * _inv_joint_norm([e])
    d = jnp.sum(zn * en, axis=-1, keepdims=True)                       # (B, 1)
    return jnp.sum(d * d, keepdims=True) / z.shape[0]                  # (1, 1)


# ----------------------------------------------------------------------------
# Fused Pallas kernel — the entire JointDisenModel.forward
# ----------------------------------------------------------------------------
def _joint_disen_kernel(
        xv1_ref, xv2_ref, eps1_ref, eps2_ref,
        # shared encoder_x1s
        s1w1, s1b1, s1w2, s1b2, s1w3, s1b3,
        # shared encoder_x2s
        s2w1, s2b1, s2w2, s2b2, s2w3, s2b3,
        # conditional encoder_x1 (W1 split into x-part / e-part)
        c1w1x, c1w1e, c1b1, c1w2, c1b2, c1w3, c1b3,
        # conditional encoder_x2
        c2w1x, c2w1e, c2b1, c2w2, c2b2, c2w3, c2b3,
        scal_ref,      # SMEM (2,): [lmd, a]
        out_ref):      # VMEM (1, 128): packed scalar logs
    B = xv1_ref.shape[0] // 2
    xv1 = xv1_ref[...]          # rows 0..B-1 = x1, rows B..2B-1 = v1
    xv2 = xv2_ref[...]

    # shared encoders — x and v views batched along sublanes (2B rows)
    e1_all = _mlp3(xv1, s1w1[...], s1b1[...], s1w2[...], s1b2[...],
                   s1w3[...], s1b3[...])
    e2_all = _mlp3(xv2, s2w1[...], s2b1[...], s2w2[...], s2b2[...],
                   s2w3[...], s2b3[...])

    # ProbabilisticEncoder('normal', Identity): rsample = mu + eps
    zs1_all = e1_all + eps1_ref[...]
    zs2_all = e2_all + eps2_ref[...]

    # conditional encoders (condzs=True): x@W1x + e@W1e == concat([x, e]) @ W1
    z1_all = _mlp3_split_first(xv1, e1_all, c1w1x[...], c1w1e[...], c1b1[...],
                               c1w2[...], c1b2[...], c1w3[...], c1b3[...])
    z2_all = _mlp3_split_first(xv2, e2_all, c2w1x[...], c2w1e[...], c2b1[...],
                               c2w2[...], c2b2[...], c2w3[...], c2b3[...])

    e1, e1v = e1_all[:B], e1_all[B:]
    e2, e2v = e2_all[:B], e2_all[B:]
    zs1, zsv1 = zs1_all[:B], zs1_all[B:]
    zs2, zsv2 = zs2_all[:B], zs2_all[B:]
    z1x1, z1xv1 = z1_all[:B], z1_all[B:]
    z2x2, z2xv2 = z2_all[:B], z2_all[B:]

    # shared (CLIP) losses
    joint, lx, ly = _clip([zs1], [zs2])
    joint_v, lx_v, ly_v = _clip([zsv1], [zsv2])
    joint_loss = 0.5 * (joint + joint_v)
    loss_x = 0.5 * (lx + lx_v)
    loss_y = 0.5 * (ly + ly_v)
    loss_shared = joint_loss

    # specific losses: apdzs=True, usezsx=True, proj=False → critic on [z, e]
    # (concatenation + normalization handled implicitly inside _clip)
    spec1, _, _ = _clip([z1x1, e1], [z1xv1, e1v])
    spec2, _, _ = _clip([z2x2, e2], [z2xv2, e2v])
    loss_specific = spec1 + spec2

    loss_ortho = (0.5 * (_ortho(z1x1, e1) + _ortho(z2x2, e2))
                  + 0.5 * (_ortho(z1xv1, e1v) + _ortho(z2xv2, e2v)))

    lmd = scal_ref[0]
    a = scal_ref[1]
    loss = (2.0 * loss_shared / (1.0 + a)
            + a * loss_specific / (1.0 + a)
            + lmd * loss_ortho)

    # pack every scalar log into a single lane-dense (1, 128) row
    lanes = lax.broadcasted_iota(jnp.int32, (1, LANES), 1)
    packed = jnp.zeros((1, LANES), jnp.float32)
    vals = (loss, loss_shared, joint_loss, loss_x, loss_y,
            loss_specific, loss_ortho)
    for i, v in enumerate(vals):
        packed = jnp.where(lanes == i, v, packed)
    packed = jnp.where(lanes == len(vals), lmd, packed)
    out_ref[...] = packed


# ----------------------------------------------------------------------------
# Jitted wrapper — one pallas_call, no host syncs
# ----------------------------------------------------------------------------
def _flatten_mlp(p):
    (w1, b1), (w2, b2), (w3, b3) = p
    return (w1, b1, w2, b2, w3, b3)


@jax.jit
def _fused_forward(params, x1, x2, v1, v2, noise, lmd, a):
    eps1, eps2, epsv1, epsv2 = noise

    # stack x / v views along batch so each encoder runs once over 2B rows
    xv1 = jnp.concatenate([x1, v1], axis=0)
    xv2 = jnp.concatenate([x2, v2], axis=0)
    eps1_all = jnp.concatenate([eps1, epsv1], axis=0)
    eps2_all = jnp.concatenate([eps2, epsv2], axis=0)

    x1_dim = x1.shape[1]
    x2_dim = x2.shape[1]
    (c1w1, c1b1), (c1w2, c1b2), (c1w3, c1b3) = params["enc_x1"]
    (c2w1, c2b1), (c2w2, c2b2), (c2w3, c2b3) = params["enc_x2"]
    # split the conditional encoders' first weight so the kernel never needs a
    # concatenated [x, e] activation
    c1w1x, c1w1e = c1w1[:x1_dim], c1w1[x1_dim:]
    c2w1x, c2w1e = c2w1[:x2_dim], c2w1[x2_dim:]

    scal = jnp.stack([lmd, a]).astype(jnp.float32)     # (2,) → SMEM

    args = (xv1, xv2, eps1_all, eps2_all,
            *_flatten_mlp(params["enc_x1s"]),
            *_flatten_mlp(params["enc_x2s"]),
            c1w1x, c1w1e, c1b1, c1w2, c1b2, c1w3, c1b3,
            c2w1x, c2w1e, c2b1, c2w2, c2b2, c2w3, c2b3,
            scal)

    vmem = pl.BlockSpec(memory_space=pltpu.MemorySpace.VMEM)
    smem = pl.BlockSpec(memory_space=pltpu.MemorySpace.SMEM)
    return pl.pallas_call(
        _joint_disen_kernel,
        out_shape=jax.ShapeDtypeStruct((1, LANES), jnp.float32),
        in_specs=[vmem] * (len(args) - 1) + [smem],
        out_specs=vmem,
    )(*args)


def exponential_scheduler(iteration, start_value, end_value,
                          n_iterations, start_iteration, base=10.0):
    s = math.log(start_value, base)
    e = math.log(end_value, base)
    t = (iteration - start_iteration) / float(n_iterations)
    t = min(max(t, 0.0), 1.0)
    return base ** (s + (e - s) * t)


def joint_disen_forward(params, x1, x2, v1, v2, noise, iterations=1,
                        a=1.0, lmd_start=0.001, lmd_end=1.0,
                        lmd_n_iterations=100000, lmd_start_iteration=50000):
    lmd = exponential_scheduler(iterations, lmd_start, lmd_end,
                                lmd_n_iterations, lmd_start_iteration)
    out = _fused_forward(params, x1, x2, v1, v2, noise,
                         jnp.asarray(lmd, jnp.float32),
                         jnp.asarray(a, jnp.float32))
    loss = out[0, 0]
    logs = {                        # device scalars — no host sync here
        "loss": out[0, 0], "shared": out[0, 1], "clip": out[0, 2],
        "loss_x": out[0, 3], "loss_y": out[0, 4], "specific": out[0, 5],
        "ortho": out[0, 6], "lmd": out[0, 7],
    }
    return loss, logs


# ----------------------------------------------------------------------------
# Deterministic parameter init
# ----------------------------------------------------------------------------
def init_mlp(key, in_dim, hidden_dim, out_dim):
    dims = [(in_dim, hidden_dim), (hidden_dim, hidden_dim), (hidden_dim, out_dim)]
    params = []
    for fi, fo in dims:
        key, k = jax.random.split(key)
        limit = math.sqrt(6.0 / (fi + fo))          # xavier uniform
        w = jax.random.uniform(k, (fi, fo), jnp.float32, -limit, limit)
        b = jnp.zeros((1, fo), jnp.float32)
        params.append((w, b))
    return params


def init_joint_disen_params(key, x1_dim, x2_dim, hidden_dim, embed_dim):
    k1, k2, k3, k4 = jax.random.split(key, 4)
    return {
        "enc_x1s": init_mlp(k1, x1_dim, hidden_dim, embed_dim),
        "enc_x2s": init_mlp(k2, x2_dim, hidden_dim, embed_dim),
        # condzs=True -> conditional encoders take [x, e] concatenated
        "enc_x1": init_mlp(k3, x1_dim + embed_dim, hidden_dim, embed_dim),
        "enc_x2": init_mlp(k4, x2_dim + embed_dim, hidden_dim, embed_dim),
    }


# ----------------------------------------------------------------------------
# Pure-JAX reference (for a loose correctness check)
# ----------------------------------------------------------------------------
def _reference_forward(params, x1, x2, v1, v2, noise, lmd, a):
    def mlp(x, p):
        (w1, b1), (w2, b2), (w3, b3) = p
        h = jnp.maximum(x @ w1 + b1, 0.0)
        h = jnp.maximum(h @ w2 + b2, 0.0)
        return h @ w3 + b3

    def norml(x):
        return x / jnp.maximum(jnp.linalg.norm(x, axis=-1, keepdims=True), EPS)

    def clip(za, zb):
        za, zb = norml(za), norml(zb)
        sim = za @ zb.T / TAU
        diag = jnp.diag(sim)
        lx = jnp.mean(jax.scipy.special.logsumexp(sim, axis=1) - diag)
        ly = jnp.mean(jax.scipy.special.logsumexp(sim, axis=0) - diag)
        return 0.5 * (lx + ly), lx, ly

    def ortho(z, e):
        return jnp.mean(jnp.sum(norml(z) * norml(e), -1) ** 2)

    eps1, eps2, epsv1, epsv2 = noise
    e1, e2 = mlp(x1, params["enc_x1s"]), mlp(x2, params["enc_x2s"])
    e1v, e2v = mlp(v1, params["enc_x1s"]), mlp(v2, params["enc_x2s"])
    zs1, zs2, zsv1, zsv2 = e1 + eps1, e2 + eps2, e1v + epsv1, e2v + epsv2
    j, _, _ = clip(zs1, zs2)
    jv, _, _ = clip(zsv1, zsv2)
    shared = 0.5 * (j + jv)
    z1x1 = mlp(jnp.concatenate([x1, e1], 1), params["enc_x1"])
    z1xv1 = mlp(jnp.concatenate([v1, e1v], 1), params["enc_x1"])
    z2x2 = mlp(jnp.concatenate([x2, e2], 1), params["enc_x2"])
    z2xv2 = mlp(jnp.concatenate([v2, e2v], 1), params["enc_x2"])
    s1, _, _ = clip(norml(jnp.concatenate([z1x1, e1], 1)),
                    norml(jnp.concatenate([z1xv1, e1v], 1)))
    s2, _, _ = clip(norml(jnp.concatenate([z2x2, e2], 1)),
                    norml(jnp.concatenate([z2xv2, e2v], 1)))
    specific = s1 + s2
    lo = (0.5 * (ortho(z1x1, e1) + ortho(z2x2, e2))
          + 0.5 * (ortho(z1xv1, e1v) + ortho(z2xv2, e2v)))
    return 2.0 * shared / (1.0 + a) + a * specific / (1.0 + a) + lmd * lo


# ----------------------------------------------------------------------------
if __name__ == "__main__":
    B = 8          # batch
    X1_DIM = 16    # x1_dim
    X2_DIM = 16    # x2_dim
    HIDDEN = 32    # hidden_dim
    EMBED = 8      # embed_dim

    key = jax.random.PRNGKey(0)
    kp, kx1, kx2, kv1, kv2, ke1, ke2, ke3, ke4 = jax.random.split(key, 9)

    params = init_joint_disen_params(kp, X1_DIM, X2_DIM, HIDDEN, EMBED)

    x1 = jax.random.normal(kx1, (B, X1_DIM), jnp.float32)
    x2 = jax.random.normal(kx2, (B, X2_DIM), jnp.float32)
    v1 = jax.random.normal(kv1, (B, X1_DIM), jnp.float32)
    v2 = jax.random.normal(kv2, (B, X2_DIM), jnp.float32)

    # reparameterization noise for the four rsample() calls (deterministic)
    noise = (
        jax.random.normal(ke1, (B, EMBED), jnp.float32),
        jax.random.normal(ke2, (B, EMBED), jnp.float32),
        jax.random.normal(ke3, (B, EMBED), jnp.float32),
        jax.random.normal(ke4, (B, EMBED), jnp.float32),
    )

    loss, logs = joint_disen_forward(params, x1, x2, v1, v2, noise, iterations=1)
    jax.block_until_ready(loss)
    assert jnp.isfinite(loss), "loss is not finite"

    # loose correctness check vs. pure-JAX reference of the same math
    lmd = exponential_scheduler(1, 0.001, 1.0, 100000, 50000)
    ref = _reference_forward(params, x1, x2, v1, v2, noise, lmd, 1.0)
    assert jnp.allclose(loss, ref, rtol=1e-3, atol=1e-3), (loss, ref)

    print("KERNEL_OK")
</pallas_src>

<mosaic_0001>
module attributes {stable_mosaic.version = 11 : i64} {
  func.func @_joint_disen_kernel(%arg0: memref<16x16xf32, #tpu.memory_space<vmem>>, %arg1: memref<16x16xf32, #tpu.memory_space<vmem>>, %arg2: memref<16x8xf32, #tpu.memory_space<vmem>>, %arg3: memref<16x8xf32, #tpu.memory_space<vmem>>, %arg4: memref<16x32xf32, #tpu.memory_space<vmem>>, %arg5: memref<1x32xf32, #tpu.memory_space<vmem>>, %arg6: memref<32x32xf32, #tpu.memory_space<vmem>>, %arg7: memref<1x32xf32, #tpu.memory_space<vmem>>, %arg8: memref<32x8xf32, #tpu.memory_space<vmem>>, %arg9: memref<1x8xf32, #tpu.memory_space<vmem>>, %arg10: memref<16x32xf32, #tpu.memory_space<vmem>>, %arg11: memref<1x32xf32, #tpu.memory_space<vmem>>, %arg12: memref<32x32xf32, #tpu.memory_space<vmem>>, %arg13: memref<1x32xf32, #tpu.memory_space<vmem>>, %arg14: memref<32x8xf32, #tpu.memory_space<vmem>>, %arg15: memref<1x8xf32, #tpu.memory_space<vmem>>, %arg16: memref<16x32xf32, #tpu.memory_space<vmem>>, %arg17: memref<8x32xf32, #tpu.memory_space<vmem>>, %arg18: memref<1x32xf32, #tpu.memory_space<vmem>>, %arg19: memref<32x32xf32, #tpu.memory_space<vmem>>, %arg20: memref<1x32xf32, #tpu.memory_space<vmem>>, %arg21: memref<32x8xf32, #tpu.memory_space<vmem>>, %arg22: memref<1x8xf32, #tpu.memory_space<vmem>>, %arg23: memref<16x32xf32, #tpu.memory_space<vmem>>, %arg24: memref<8x32xf32, #tpu.memory_space<vmem>>, %arg25: memref<1x32xf32, #tpu.memory_space<vmem>>, %arg26: memref<32x32xf32, #tpu.memory_space<vmem>>, %arg27: memref<1x32xf32, #tpu.memory_space<vmem>>, %arg28: memref<32x8xf32, #tpu.memory_space<vmem>>, %arg29: memref<1x8xf32, #tpu.memory_space<vmem>>, %arg30: memref<2xf32, #tpu.memory_space<smem>>, %arg31: memref<1x128xf32, #tpu.memory_space<vmem>>) attributes {dimension_semantics = [], scalar_prefetch = 0 : i64, scratch_operands = 0 : i64, tpu.core_type = #tpu.core_type<tc>} {
    %c0 = arith.constant 0 : index
    %c0_0 = arith.constant 0 : index
    %0 = vector.load %arg0[%c0, %c0_0] : memref<16x16xf32, #tpu.memory_space<vmem>>, vector<16x16xf32>
    %c0_1 = arith.constant 0 : index
    %c0_2 = arith.constant 0 : index
    %1 = vector.load %arg1[%c0_1, %c0_2] : memref<16x16xf32, #tpu.memory_space<vmem>>, vector<16x16xf32>
    %c0_3 = arith.constant 0 : index
    %c0_4 = arith.constant 0 : index
    %2 = vector.load %arg4[%c0_3, %c0_4] : memref<16x32xf32, #tpu.memory_space<vmem>>, vector<16x32xf32>
    %c0_5 = arith.constant 0 : index
    %c0_6 = arith.constant 0 : index
    %3 = vector.load %arg5[%c0_5, %c0_6] : memref<1x32xf32, #tpu.memory_space<vmem>>, vector<1x32xf32>
    %c0_7 = arith.constant 0 : index
    %c0_8 = arith.constant 0 : index
    %4 = vector.load %arg6[%c0_7, %c0_8] : memref<32x32xf32, #tpu.memory_space<vmem>>, vector<32x32xf32>
    %c0_9 = arith.constant 0 : index
    %c0_10 = arith.constant 0 : index
    %5 = vector.load %arg7[%c0_9, %c0_10] : memref<1x32xf32, #tpu.memory_space<vmem>>, vector<1x32xf32>
    %c0_11 = arith.constant 0 : index
    %c0_12 = arith.constant 0 : index
    %6 = vector.load %arg8[%c0_11, %c0_12] : memref<32x8xf32, #tpu.memory_space<vmem>>, vector<32x8xf32>
    %c0_13 = arith.constant 0 : index
    %c0_14 = arith.constant 0 : index
    %7 = vector.load %arg9[%c0_13, %c0_14] : memref<1x8xf32, #tpu.memory_space<vmem>>, vector<1x8xf32>
    %cst = arith.constant dense<0.000000e+00> : vector<16x32xf32>
    %8 = tpu.matmul %0, %2, %cst {dimension_numbers = #tpu.dot_dimension_numbers<[1], [0], [0], [1], [0, 0, 1, 1], [], []>} : vector<16x16xf32>, vector<16x32xf32>, vector<16x32xf32> -> vector<16x32xf32>
    %9 = vector.broadcast %3 : vector<1x32xf32> to vector<16x32xf32>
    %10 = arith.addf %8, %9 : vector<16x32xf32>
    %cst_15 = arith.constant 0.000000e+00 : f32
    %11 = vector.broadcast %cst_15 : f32 to vector<16x32xf32>
    %12 = arith.maximumf %10, %11 : vector<16x32xf32>
    %cst_16 = arith.constant dense<0.000000e+00> : vector<16x32xf32>
    %13 = tpu.matmul %12, %4, %cst_16 {dimension_numbers = #tpu.dot_dimension_numbers<[1], [0], [0], [1], [0, 0, 1, 1], [], []>} : vector<16x32xf32>, vector<32x32xf32>, vector<16x32xf32> -> vector<16x32xf32>
    %14 = vector.broadcast %5 : vector<1x32xf32> to vector<16x32xf32>
    %15 = arith.addf %13, %14 : vector<16x32xf32>
    %cst_17 = arith.constant 0.000000e+00 : f32
    %16 = vector.broadcast %cst_17 : f32 to vector<16x32xf32>
    %17 = arith.maximumf %15, %16 : vector<16x32xf32>
    %cst_18 = arith.constant dense<0.000000e+00> : vector<16x8xf32>
    %18 = tpu.matmul %17, %6, %cst_18 {dimension_numbers = #tpu.dot_dimension_numbers<[1], [0], [0], [1], [0, 0, 1, 1], [], []>} : vector<16x32xf32>, vector<32x8xf32>, vector<16x8xf32> -> vector<16x8xf32>
    %19 = vector.broadcast %7 : vector<1x8xf32> to vector<16x8xf32>
    %20 = arith.addf %18, %19 : vector<16x8xf32>
    %c0_19 = arith.constant 0 : index
    %c0_20 = arith.constant 0 : index
    %21 = vector.load %arg10[%c0_19, %c0_20] : memref<16x32xf32, #tpu.memory_space<vmem>>, vector<16x32xf32>
    %c0_21 = arith.constant 0 : index
    %c0_22 = arith.constant 0 : index
    %22 = vector.load %arg11[%c0_21, %c0_22] : memref<1x32xf32, #tpu.memory_space<vmem>>, vector<1x32xf32>
    %c0_23 = arith.constant 0 : index
    %c0_24 = arith.constant 0 : index
    %23 = vector.load %arg12[%c0_23, %c0_24] : memref<32x32xf32, #tpu.memory_space<vmem>>, vector<32x32xf32>
    %c0_25 = arith.constant 0 : index
    %c0_26 = arith.constant 0 : index
    %24 = vector.load %arg13[%c0_25, %c0_26] : memref<1x32xf32, #tpu.memory_space<vmem>>, vector<1x32xf32>
    %c0_27 = arith.constant 0 : index
    %c0_28 = arith.constant 0 : index
    %25 = vector.load %arg14[%c0_27, %c0_28] : memref<32x8xf32, #tpu.memory_space<vmem>>, vector<32x8xf32>
    %c0_29 = arith.constant 0 : index
    %c0_30 = arith.constant 0 : index
    %26 = vector.load %arg15[%c0_29, %c0_30] : memref<1x8xf32, #tpu.memory_space<vmem>>, vector<1x8xf32>
    %cst_31 = arith.constant dense<0.000000e+00> : vector<16x32xf32>
    %27 = tpu.matmul %1, %21, %cst_31 {dimension_numbers = #tpu.dot_dimension_numbers<[1], [0], [0], [1], [0, 0, 1, 1], [], []>} : vector<16x16xf32>, vector<16x32xf32>, vector<16x32xf32> -> vector<16x32xf32>
    %28 = vector.broadcast %22 : vector<1x32xf32> to vector<16x32xf32>
    %29 = arith.addf %27, %28 : vector<16x32xf32>
    %cst_32 = arith.constant 0.000000e+00 : f32
    %30 = vector.broadcast %cst_32 : f32 to vector<16x32xf32>
    %31 = arith.maximumf %29, %30 : vector<16x32xf32>
    %cst_33 = arith.constant dense<0.000000e+00> : vector<16x32xf32>
    %32 = tpu.matmul %31, %23, %cst_33 {dimension_numbers = #tpu.dot_dimension_numbers<[1], [0], [0], [1], [0, 0, 1, 1], [], []>} : vector<16x32xf32>, vector<32x32xf32>, vector<16x32xf32> -> vector<16x32xf32>
    %33 = vector.broadcast %24 : vector<1x32xf32> to vector<16x32xf32>
    %34 = arith.addf %32, %33 : vector<16x32xf32>
    %cst_34 = arith.constant 0.000000e+00 : f32
    %35 = vector.broadcast %cst_34 : f32 to vector<16x32xf32>
    %36 = arith.maximumf %34, %35 : vector<16x32xf32>
    %cst_35 = arith.constant dense<0.000000e+00> : vector<16x8xf32>
    %37 = tpu.matmul %36, %25, %cst_35 {dimension_numbers = #tpu.dot_dimension_numbers<[1], [0], [0], [1], [0, 0, 1, 1], [], []>} : vector<16x32xf32>, vector<32x8xf32>, vector<16x8xf32> -> vector<16x8xf32>
    %38 = vector.broadcast %26 : vector<1x8xf32> to vector<16x8xf32>
    %39 = arith.addf %37, %38 : vector<16x8xf32>
    %c0_36 = arith.constant 0 : index
    %c0_37 = arith.constant 0 : index
    %40 = vector.load %arg2[%c0_36, %c0_37] : memref<16x8xf32, #tpu.memory_space<vmem>>, vector<16x8xf32>
    %41 = arith.addf %20, %40 : vector<16x8xf32>
    %c0_38 = arith.constant 0 : index
    %c0_39 = arith.constant 0 : index
    %42 = vector.load %arg3[%c0_38, %c0_39] : memref<16x8xf32, #tpu.memory_space<vmem>>, vector<16x8xf32>
    %43 = arith.addf %39, %42 : vector<16x8xf32>
    %c0_40 = arith.constant 0 : index
    %c0_41 = arith.constant 0 : index
    %44 = vector.load %arg16[%c0_40, %c0_41] : memref<16x32xf32, #tpu.memory_space<vmem>>, vector<16x32xf32>
    %c0_42 = arith.constant 0 : index
    %c0_43 = arith.constant 0 : index
    %45 = vector.load %arg17[%c0_42, %c0_43] : memref<8x32xf32, #tpu.memory_space<vmem>>, vector<8x32xf32>
    %c0_44 = arith.constant 0 : index
    %c0_45 = arith.constant 0 : index
    %46 = vector.load %arg18[%c0_44, %c0_45] : memref<1x32xf32, #tpu.memory_space<vmem>>, vector<1x32xf32>
    %c0_46 = arith.constant 0 : index
    %c0_47 = arith.constant 0 : index
    %47 = vector.load %arg19[%c0_46, %c0_47] : memref<32x32xf32, #tpu.memory_space<vmem>>, vector<32x32xf32>
    %c0_48 = arith.constant 0 : index
    %c0_49 = arith.constant 0 : index
    %48 = vector.load %arg20[%c0_48, %c0_49] : memref<1x32xf32, #tpu.memory_space<vmem>>, vector<1x32xf32>
    %c0_50 = arith.constant 0 : index
    %c0_51 = arith.constant 0 : index
    %49 = vector.load %arg21[%c0_50, %c0_51] : memref<32x8xf32, #tpu.memory_space<vmem>>, vector<32x8xf32>
    %c0_52 = arith.constant 0 : index
    %c0_53 = arith.constant 0 : index
    %50 = vector.load %arg22[%c0_52, %c0_53] : memref<1x8xf32, #tpu.memory_space<vmem>>, vector<1x8xf32>
    %cst_54 = arith.constant dense<0.000000e+00> : vector<16x32xf32>
    %51 = tpu.matmul %0, %44, %cst_54 {dimension_numbers = #tpu.dot_dimension_numbers<[1], [0], [0], [1], [0, 0, 1, 1], [], []>} : vector<16x16xf32>, vector<16x32xf32>, vector<16x32xf32> -> vector<16x32xf32>
    %cst_55 = arith.constant dense<0.000000e+00> : vector<16x32xf32>
    %52 = tpu.matmul %20, %45, %cst_55 {dimension_numbers = #tpu.dot_dimension_numbers<[1], [0], [0], [1], [0, 0, 1, 1], [], []>} : vector<16x8xf32>, vector<8x32xf32>, vector<16x32xf32> -> vector<16x32xf32>
    %53 = arith.addf %51, %52 : vector<16x32xf32>
    %54 = vector.broadcast %46 : vector<1x32xf32> to vector<16x32xf32>
    %55 = arith.addf %53, %54 : vector<16x32xf32>
    %cst_56 = arith.constant 0.000000e+00 : f32
    %56 = vector.broadcast %cst_56 : f32 to vector<16x32xf32>
    %57 = arith.maximumf %55, %56 : vector<16x32xf32>
    %cst_57 = arith.constant dense<0.000000e+00> : vector<16x32xf32>
    %58 = tpu.matmul %57, %47, %cst_57 {dimension_numbers = #tpu.dot_dimension_numbers<[1], [0], [0], [1], [0, 0, 1, 1], [], []>} : vector<16x32xf32>, vector<32x32xf32>, vector<16x32xf32> -> vector<16x32xf32>
    %59 = vector.broadcast %48 : vector<1x32xf32> to vector<16x32xf32>
    %60 = arith.addf %58, %59 : vector<16x32xf32>
    %cst_58 = arith.constant 0.000000e+00 : f32
    %61 = vector.broadcast %cst_58 : f32 to vector<16x32xf32>
    %62 = arith.maximumf %60, %61 : vector<16x32xf32>
    %cst_59 = arith.constant dense<0.000000e+00> : vector<16x8xf32>
    %63 = tpu.matmul %62, %49, %cst_59 {dimension_numbers = #tpu.dot_dimension_numbers<[1], [0], [0], [1], [0, 0, 1, 1], [], []>} : vector<16x32xf32>, vector<32x8xf32>, vector<16x8xf32> -> vector<16x8xf32>
    %64 = vector.broadcast %50 : vector<1x8xf32> to vector<16x8xf32>
    %65 = arith.addf %63, %64 : vector<16x8xf32>
    %c0_60 = arith.constant 0 : index
    %c0_61 = arith.constant 0 : index
    %66 = vector.load %arg23[%c0_60, %c0_61] : memref<16x32xf32, #tpu.memory_space<vmem>>, vector<16x32xf32>
    %c0_62 = arith.constant 0 : index
    %c0_63 = arith.constant 0 : index
    %67 = vector.load %arg24[%c0_62, %c0_63] : memref<8x32xf32, #tpu.memory_space<vmem>>, vector<8x32xf32>
    %c0_64 = arith.constant 0 : index
    %c0_65 = arith.constant 0 : index
    %68 = vector.load %arg25[%c0_64, %c0_65] : memref<1x32xf32, #tpu.memory_space<vmem>>, vector<1x32xf32>
    %c0_66 = arith.constant 0 : index
    %c0_67 = arith.constant 0 : index
    %69 = vector.load %arg26[%c0_66, %c0_67] : memref<32x32xf32, #tpu.memory_space<vmem>>, vector<32x32xf32>
    %c0_68 = arith.constant 0 : index
    %c0_69 = arith.constant 0 : index
    %70 = vector.load %arg27[%c0_68, %c0_69] : memref<1x32xf32, #tpu.memory_space<vmem>>, vector<1x32xf32>
    %c0_70 = arith.constant 0 : index
    %c0_71 = arith.constant 0 : index
    %71 = vector.load %arg28[%c0_70, %c0_71] : memref<32x8xf32, #tpu.memory_space<vmem>>, vector<32x8xf32>
    %c0_72 = arith.constant 0 : index
    %c0_73 = arith.constant 0 : index
    %72 = vector.load %arg29[%c0_72, %c0_73] : memref<1x8xf32, #tpu.memory_space<vmem>>, vector<1x8xf32>
    %cst_74 = arith.constant dense<0.000000e+00> : vector<16x32xf32>
    %73 = tpu.matmul %1, %66, %cst_74 {dimension_numbers = #tpu.dot_dimension_numbers<[1], [0], [0], [1], [0, 0, 1, 1], [], []>} : vector<16x16xf32>, vector<16x32xf32>, vector<16x32xf32> -> vector<16x32xf32>
    %cst_75 = arith.constant dense<0.000000e+00> : vector<16x32xf32>
    %74 = tpu.matmul %39, %67, %cst_75 {dimension_numbers = #tpu.dot_dimension_numbers<[1], [0], [0], [1], [0, 0, 1, 1], [], []>} : vector<16x8xf32>, vector<8x32xf32>, vector<16x32xf32> -> vector<16x32xf32>
    %75 = arith.addf %73, %74 : vector<16x32xf32>
    %76 = vector.broadcast %68 : vector<1x32xf32> to vector<16x32xf32>
    %77 = arith.addf %75, %76 : vector<16x32xf32>
    %cst_76 = arith.constant 0.000000e+00 : f32
    %78 = vector.broadcast %cst_76 : f32 to vector<16x32xf32>
    %79 = arith.maximumf %77, %78 : vector<16x32xf32>
    %cst_77 = arith.constant dense<0.000000e+00> : vector<16x32xf32>
    %80 = tpu.matmul %79, %69, %cst_77 {dimension_numbers = #tpu.dot_dimension_numbers<[1], [0], [0], [1], [0, 0, 1, 1], [], []>} : vector<16x32xf32>, vector<32x32xf32>, vector<16x32xf32> -> vector<16x32xf32>
    %81 = vector.broadcast %70 : vector<1x32xf32> to vector<16x32xf32>
    %82 = arith.addf %80, %81 : vector<16x32xf32>
    %cst_78 = arith.constant 0.000000e+00 : f32
    %83 = vector.broadcast %cst_78 : f32 to vector<16x32xf32>
    %84 = arith.maximumf %82, %83 : vector<16x32xf32>
    %cst_79 = arith.constant dense<0.000000e+00> : vector<16x8xf32>
    %85 = tpu.matmul %84, %71, %cst_79 {dimension_numbers = #tpu.dot_dimension_numbers<[1], [0], [0], [1], [0, 0, 1, 1], [], []>} : vector<16x32xf32>, vector<32x8xf32>, vector<16x8xf32> -> vector<16x8xf32>
    %86 = vector.broadcast %72 : vector<1x8xf32> to vector<16x8xf32>
    %87 = arith.addf %85, %86 : vector<16x8xf32>
    %88 = vector.extract_strided_slice %20 {offsets = [0, 0], sizes = [8, 8], strides = [1, 1]} : vector<16x8xf32> to vector<8x8xf32>
    %89 = vector.extract_strided_slice %20 {offsets = [8, 0], sizes = [8, 8], strides = [1, 1]} : vector<16x8xf32> to vector<8x8xf32>
    %90 = vector.extract_strided_slice %39 {offsets = [0, 0], sizes = [8, 8], strides = [1, 1]} : vector<16x8xf32> to vector<8x8xf32>
    %91 = vector.extract_strided_slice %39 {offsets = [8, 0], sizes = [8, 8], strides = [1, 1]} : vector<16x8xf32> to vector<8x8xf32>
    %92 = vector.extract_strided_slice %41 {offsets = [0, 0], sizes = [8, 8], strides = [1, 1]} : vector<16x8xf32> to vector<8x8xf32>
    %93 = vector.extract_strided_slice %41 {offsets = [8, 0], sizes = [8, 8], strides = [1, 1]} : vector<16x8xf32> to vector<8x8xf32>
    %94 = vector.extract_strided_slice %43 {offsets = [0, 0], sizes = [8, 8], strides = [1, 1]} : vector<16x8xf32> to vector<8x8xf32>
    %95 = vector.extract_strided_slice %43 {offsets = [8, 0], sizes = [8, 8], strides = [1, 1]} : vector<16x8xf32> to vector<8x8xf32>
    %96 = vector.extract_strided_slice %65 {offsets = [0, 0], sizes = [8, 8], strides = [1, 1]} : vector<16x8xf32> to vector<8x8xf32>
    %97 = vector.extract_strided_slice %65 {offsets = [8, 0], sizes = [8, 8], strides = [1, 1]} : vector<16x8xf32> to vector<8x8xf32>
    %98 = vector.extract_strided_slice %87 {offsets = [0, 0], sizes = [8, 8], strides = [1, 1]} : vector<16x8xf32> to vector<8x8xf32>
    %99 = vector.extract_strided_slice %87 {offsets = [8, 0], sizes = [8, 8], strides = [1, 1]} : vector<16x8xf32> to vector<8x8xf32>
    %100 = arith.mulf %92, %92 : vector<8x8xf32>
    %cst_80 = arith.constant dense<0.000000e+00> : vector<8xf32>
    %101 = vector.multi_reduction <add>, %100, %cst_80 [1] : vector<8x8xf32> to vector<8xf32>
    %102 = vector.shape_cast %101 : vector<8xf32> to vector<8x1xf32>
    %103 = math.sqrt %102 : vector<8x1xf32>
    %cst_81 = arith.constant 9.99999996E-13 : f32
    %104 = vector.broadcast %cst_81 : f32 to vector<8x1xf32>
    %105 = arith.maximumf %103, %104 : vector<8x1xf32>
    %cst_82 = arith.constant 1.000000e+00 : f32
    %106 = vector.broadcast %cst_82 : f32 to vector<8x1xf32>
    %107 = arith.divf %106, %105 : vector<8x1xf32>
    %108 = arith.mulf %94, %94 : vector<8x8xf32>
    %cst_83 = arith.constant dense<0.000000e+00> : vector<8xf32>
    %109 = vector.multi_reduction <add>, %108, %cst_83 [1] : vector<8x8xf32> to vector<8xf32>
    %110 = vector.shape_cast %109 : vector<8xf32> to vector<8x1xf32>
    %111 = math.sqrt %110 : vector<8x1xf32>
    %cst_84 = arith.constant 9.99999996E-13 : f32
    %112 = vector.broadcast %cst_84 : f32 to vector<8x1xf32>
    %113 = arith.maximumf %111, %112 : vector<8x1xf32>
    %cst_85 = arith.constant 1.000000e+00 : f32
    %114 = vector.broadcast %cst_85 : f32 to vector<8x1xf32>
    %115 = arith.divf %114, %113 : vector<8x1xf32>
    %116 = vector.broadcast %107 : vector<8x1xf32> to vector<8x8xf32>
    %117 = arith.mulf %92, %116 : vector<8x8xf32>
    %118 = vector.broadcast %115 : vector<8x1xf32> to vector<8x8xf32>
    %119 = arith.mulf %94, %118 : vector<8x8xf32>
    %cst_86 = arith.constant dense<0.000000e+00> : vector<8x8xf32>
    %120 = tpu.matmul %117, %119, %cst_86 {dimension_numbers = #tpu.dot_dimension_numbers<[1], [1], [0], [0], [0, 0, 1, 0], [], []>} : vector<8x8xf32>, vector<8x8xf32>, vector<8x8xf32> -> vector<8x8xf32>
    %121 = arith.mulf %117, %119 : vector<8x8xf32>
    %cst_87 = arith.constant dense<0.000000e+00> : vector<8xf32>
    %122 = vector.multi_reduction <add>, %121, %cst_87 [1] : vector<8x8xf32> to vector<8xf32>
    %123 = vector.shape_cast %122 : vector<8xf32> to vector<8x1xf32>
    %cst_88 = arith.constant 14.2857141 : f32
    %124 = vector.broadcast %cst_88 : f32 to vector<8x8xf32>
    %125 = arith.mulf %120, %124 : vector<8x8xf32>
    %cst_89 = arith.constant 14.2857141 : f32
    %126 = vector.broadcast %cst_89 : f32 to vector<8x1xf32>
    %127 = arith.mulf %123, %126 : vector<8x1xf32>
    %cst_90 = arith.constant dense<0xFF800000> : vector<8xf32>
    %128 = vector.multi_reduction <maximumf>, %125, %cst_90 [1] : vector<8x8xf32> to vector<8xf32>
    %129 = vector.shape_cast %128 : vector<8xf32> to vector<8x1xf32>
    %130 = vector.broadcast %129 : vector<8x1xf32> to vector<8x8xf32>
    %131 = arith.subf %125, %130 : vector<8x8xf32>
    %132 = math.exp %131 : vector<8x8xf32>
    %cst_91 = arith.constant dense<0.000000e+00> : vector<8xf32>
    %133 = vector.multi_reduction <add>, %132, %cst_91 [1] : vector<8x8xf32> to vector<8xf32>
    %134 = vector.shape_cast %133 : vector<8xf32> to vector<8x1xf32>
    %135 = math.log %134 : vector<8x1xf32>
    %136 = arith.addf %135, %129 : vector<8x1xf32>
    %cst_92 = arith.constant dense<0xFF800000> : vector<8xf32>
    %137 = vector.multi_reduction <maximumf>, %125, %cst_92 [0] : vector<8x8xf32> to vector<8xf32>
    %138 = vector.shape_cast %137 : vector<8xf32> to vector<1x8xf32>
    %139 = vector.broadcast %138 : vector<1x8xf32> to vector<8x8xf32>
    %140 = arith.subf %125, %139 : vector<8x8xf32>
    %141 = math.exp %140 : vector<8x8xf32>
    %cst_93 = arith.constant dense<0.000000e+00> : vector<8xf32>
    %142 = vector.multi_reduction <add>, %141, %cst_93 [0] : vector<8x8xf32> to vector<8xf32>
    %143 = vector.shape_cast %142 : vector<8xf32> to vector<1x8xf32>
    %144 = math.log %143 : vector<1x8xf32>
    %145 = arith.addf %144, %138 : vector<1x8xf32>
    %146 = vector.shape_cast %127 : vector<8x1xf32> to vector<1x8x1xf32>
    %cst_94 = arith.constant dense<0.000000e+00> : vector<1xf32>
    %147 = vector.multi_reduction <add>, %146, %cst_94 [1, 2] : vector<1x8x1xf32> to vector<1xf32>
    %148 = vector.shape_cast %147 : vector<1xf32> to vector<1x1x1xf32>
    %149 = vector.extract %148[0, 0, 0] : f32 from vector<1x1x1xf32>
    %150 = vector.broadcast %149 : f32 to vector<1x1xf32>
    %151 = vector.shape_cast %136 : vector<8x1xf32> to vector<1x8x1xf32>
    %cst_95 = arith.constant dense<0.000000e+00> : vector<1xf32>
    %152 = vector.multi_reduction <add>, %151, %cst_95 [1, 2] : vector<1x8x1xf32> to vector<1xf32>
    %153 = vector.shape_cast %152 : vector<1xf32> to vector<1x1x1xf32>
    %154 = vector.extract %153[0, 0, 0] : f32 from vector<1x1x1xf32>
    %155 = vector.broadcast %154 : f32 to vector<1x1xf32>
    %156 = arith.subf %155, %150 : vector<1x1xf32>
    %cst_96 = arith.constant 8.000000e+00 : f32
    %157 = vector.broadcast %cst_96 : f32 to vector<1x1xf32>
    %158 = arith.divf %156, %157 : vector<1x1xf32>
    %159 = vector.shape_cast %145 : vector<1x8xf32> to vector<1x1x8xf32>
    %cst_97 = arith.constant dense<0.000000e+00> : vector<1xf32>
    %160 = vector.multi_reduction <add>, %159, %cst_97 [1, 2] : vector<1x1x8xf32> to vector<1xf32>
    %161 = vector.shape_cast %160 : vector<1xf32> to vector<1x1x1xf32>
    %162 = vector.extract %161[0, 0, 0] : f32 from vector<1x1x1xf32>
    %163 = vector.broadcast %162 : f32 to vector<1x1xf32>
    %164 = arith.subf %163, %150 : vector<1x1xf32>
    %cst_98 = arith.constant 8.000000e+00 : f32
    %165 = vector.broadcast %cst_98 : f32 to vector<1x1xf32>
    %166 = arith.divf %164, %165 : vector<1x1xf32>
    %167 = arith.addf %158, %166 : vector<1x1xf32>
    %cst_99 = arith.constant 5.000000e-01 : f32
    %168 = vector.broadcast %cst_99 : f32 to vector<1x1xf32>
    %169 = arith.mulf %168, %167 : vector<1x1xf32>
    %170 = arith.mulf %93, %93 : vector<8x8xf32>
    %cst_100 = arith.constant dense<0.000000e+00> : vector<8xf32>
    %171 = vector.multi_reduction <add>, %170, %cst_100 [1] : vector<8x8xf32> to vector<8xf32>
    %172 = vector.shape_cast %171 : vector<8xf32> to vector<8x1xf32>
    %173 = math.sqrt %172 : vector<8x1xf32>
    %cst_101 = arith.constant 9.99999996E-13 : f32
    %174 = vector.broadcast %cst_101 : f32 to vector<8x1xf32>
    %175 = arith.maximumf %173, %174 : vector<8x1xf32>
    %cst_102 = arith.constant 1.000000e+00 : f32
    %176 = vector.broadcast %cst_102 : f32 to vector<8x1xf32>
    %177 = arith.divf %176, %175 : vector<8x1xf32>
    %178 = arith.mulf %95, %95 : vector<8x8xf32>
    %cst_103 = arith.constant dense<0.000000e+00> : vector<8xf32>
    %179 = vector.multi_reduction <add>, %178, %cst_103 [1] : vector<8x8xf32> to vector<8xf32>
    %180 = vector.shape_cast %179 : vector<8xf32> to vector<8x1xf32>
    %181 = math.sqrt %180 : vector<8x1xf32>
    %cst_104 = arith.constant 9.99999996E-13 : f32
    %182 = vector.broadcast %cst_104 : f32 to vector<8x1xf32>
    %183 = arith.maximumf %181, %182 : vector<8x1xf32>
    %cst_105 = arith.constant 1.000000e+00 : f32
    %184 = vector.broadcast %cst_105 : f32 to vector<8x1xf32>
    %185 = arith.divf %184, %183 : vector<8x1xf32>
    %186 = vector.broadcast %177 : vector<8x1xf32> to vector<8x8xf32>
    %187 = arith.mulf %93, %186 : vector<8x8xf32>
    %188 = vector.broadcast %185 : vector<8x1xf32> to vector<8x8xf32>
    %189 = arith.mulf %95, %188 : vector<8x8xf32>
    %cst_106 = arith.constant dense<0.000000e+00> : vector<8x8xf32>
    %190 = tpu.matmul %187, %189, %cst_106 {dimension_numbers = #tpu.dot_dimension_numbers<[1], [1], [0], [0], [0, 0, 1, 0], [], []>} : vector<8x8xf32>, vector<8x8xf32>, vector<8x8xf32> -> vector<8x8xf32>
    %191 = arith.mulf %187, %189 : vector<8x8xf32>
    %cst_107 = arith.constant dense<0.000000e+00> : vector<8xf32>
    %192 = vector.multi_reduction <add>, %191, %cst_107 [1] : vector<8x8xf32> to vector<8xf32>
    %193 = vector.shape_cast %192 : vector<8xf32> to vector<8x1xf32>
    %cst_108 = arith.constant 14.2857141 : f32
    %194 = vector.broadcast %cst_108 : f32 to vector<8x8xf32>
    %195 = arith.mulf %190, %194 : vector<8x8xf32>
    %cst_109 = arith.constant 14.2857141 : f32
    %196 = vector.broadcast %cst_109 : f32 to vector<8x1xf32>
    %197 = arith.mulf %193, %196 : vector<8x1xf32>
    %cst_110 = arith.constant dense<0xFF800000> : vector<8xf32>
    %198 = vector.multi_reduction <maximumf>, %195, %cst_110 [1] : vector<8x8xf32> to vector<8xf32>
    %199 = vector.shape_cast %198 : vector<8xf32> to vector<8x1xf32>
    %200 = vector.broadcast %199 : vector<8x1xf32> to vector<8x8xf32>
    %201 = arith.subf %195, %200 : vector<8x8xf32>
    %202 = math.exp %201 : vector<8x8xf32>
    %cst_111 = arith.constant dense<0.000000e+00> : vector<8xf32>
    %203 = vector.multi_reduction <add>, %202, %cst_111 [1] : vector<8x8xf32> to vector<8xf32>
    %204 = vector.shape_cast %203 : vector<8xf32> to vector<8x1xf32>
    %205 = math.log %204 : vector<8x1xf32>
    %206 = arith.addf %205, %199 : vector<8x1xf32>
    %cst_112 = arith.constant dense<0xFF800000> : vector<8xf32>
    %207 = vector.multi_reduction <maximumf>, %195, %cst_112 [0] : vector<8x8xf32> to vector<8xf32>
    %208 = vector.shape_cast %207 : vector<8xf32> to vector<1x8xf32>
    %209 = vector.broadcast %208 : vector<1x8xf32> to vector<8x8xf32>
    %210 = arith.subf %195, %209 : vector<8x8xf32>
    %211 = math.exp %210 : vector<8x8xf32>
    %cst_113 = arith.constant dense<0.000000e+00> : vector<8xf32>
    %212 = vector.multi_reduction <add>, %211, %cst_113 [0] : vector<8x8xf32> to vector<8xf32>
    %213 = vector.shape_cast %212 : vector<8xf32> to vector<1x8xf32>
    %214 = math.log %213 : vector<1x8xf32>
    %215 = arith.addf %214, %208 : vector<1x8xf32>
    %216 = vector.shape_cast %197 : vector<8x1xf32> to vector<1x8x1xf32>
    %cst_114 = arith.constant dense<0.000000e+00> : vector<1xf32>
    %217 = vector.multi_reduction <add>, %216, %cst_114 [1, 2] : vector<1x8x1xf32> to vector<1xf32>
    %218 = vector.shape_cast %217 : vector<1xf32> to vector<1x1x1xf32>
    %219 = vector.extract %218[0, 0, 0] : f32 from vector<1x1x1xf32>
    %220 = vector.broadcast %219 : f32 to vector<1x1xf32>
    %221 = vector.shape_cast %206 : vector<8x1xf32> to vector<1x8x1xf32>
    %cst_115 = arith.constant dense<0.000000e+00> : vector<1xf32>
    %222 = vector.multi_reduction <add>, %221, %cst_115 [1, 2] : vector<1x8x1xf32> to vector<1xf32>
    %223 = vector.shape_cast %222 : vector<1xf32> to vector<1x1x1xf32>
    %224 = vector.extract %223[0, 0, 0] : f32 from vector<1x1x1xf32>
    %225 = vector.broadcast %224 : f32 to vector<1x1xf32>
    %226 = arith.subf %225, %220 : vector<1x1xf32>
    %cst_116 = arith.constant 8.000000e+00 : f32
    %227 = vector.broadcast %cst_116 : f32 to vector<1x1xf32>
    %228 = arith.divf %226, %227 : vector<1x1xf32>
    %229 = vector.shape_cast %215 : vector<1x8xf32> to vector<1x1x8xf32>
    %cst_117 = arith.constant dense<0.000000e+00> : vector<1xf32>
    %230 = vector.multi_reduction <add>, %229, %cst_117 [1, 2] : vector<1x1x8xf32> to vector<1xf32>
    %231 = vector.shape_cast %230 : vector<1xf32> to vector<1x1x1xf32>
    %232 = vector.extract %231[0, 0, 0] : f32 from vector<1x1x1xf32>
    %233 = vector.broadcast %232 : f32 to vector<1x1xf32>
    %234 = arith.subf %233, %220 : vector<1x1xf32>
    %cst_118 = arith.constant 8.000000e+00 : f32
    %235 = vector.broadcast %cst_118 : f32 to vector<1x1xf32>
    %236 = arith.divf %234, %235 : vector<1x1xf32>
    %237 = arith.addf %228, %236 : vector<1x1xf32>
    %cst_119 = arith.constant 5.000000e-01 : f32
    %238 = vector.broadcast %cst_119 : f32 to vector<1x1xf32>
    %239 = arith.mulf %238, %237 : vector<1x1xf32>
    %240 = arith.addf %169, %239 : vector<1x1xf32>
    %cst_120 = arith.constant 5.000000e-01 : f32
    %241 = vector.broadcast %cst_120 : f32 to vector<1x1xf32>
    %242 = arith.mulf %241, %240 : vector<1x1xf32>
    %243 = arith.addf %158, %228 : vector<1x1xf32>
    %cst_121 = arith.constant 5.000000e-01 : f32
    %244 = vector.broadcast %cst_121 : f32 to vector<1x1xf32>
    %245 = arith.mulf %244, %243 : vector<1x1xf32>
    %246 = arith.addf %166, %236 : vector<1x1xf32>
    %cst_122 = arith.constant 5.000000e-01 : f32
    %247 = vector.broadcast %cst_122 : f32 to vector<1x1xf32>
    %248 = arith.mulf %247, %246 : vector<1x1xf32>
    %249 = arith.mulf %96, %96 : vector<8x8xf32>
    %cst_123 = arith.constant dense<0.000000e+00> : vector<8xf32>
    %250 = vector.multi_reduction <add>, %249, %cst_123 [1] : vector<8x8xf32> to vector<8xf32>
    %251 = vector.shape_cast %250 : vector<8xf32> to vector<8x1xf32>
    %252 = arith.mulf %88, %88 : vector<8x8xf32>
    %cst_124 = arith.constant dense<0.000000e+00> : vector<8xf32>
    %253 = vector.multi_reduction <add>, %252, %cst_124 [1] : vector<8x8xf32> to vector<8xf32>
    %254 = vector.shape_cast %253 : vector<8xf32> to vector<8x1xf32>
    %255 = arith.addf %251, %254 : vector<8x1xf32>
    %256 = math.sqrt %255 : vector<8x1xf32>
    %cst_125 = arith.constant 9.99999996E-13 : f32
    %257 = vector.broadcast %cst_125 : f32 to vector<8x1xf32>
    %258 = arith.maximumf %256, %257 : vector<8x1xf32>
    %cst_126 = arith.constant 1.000000e+00 : f32
    %259 = vector.broadcast %cst_126 : f32 to vector<8x1xf32>
    %260 = arith.divf %259, %258 : vector<8x1xf32>
    %261 = arith.mulf %97, %97 : vector<8x8xf32>
    %cst_127 = arith.constant dense<0.000000e+00> : vector<8xf32>
    %262 = vector.multi_reduction <add>, %261, %cst_127 [1] : vector<8x8xf32> to vector<8xf32>
    %263 = vector.shape_cast %262 : vector<8xf32> to vector<8x1xf32>
    %264 = arith.mulf %89, %89 : vector<8x8xf32>
    %cst_128 = arith.constant dense<0.000000e+00> : vector<8xf32>
    %265 = vector.multi_reduction <add>, %264, %cst_128 [1] : vector<8x8xf32> to vector<8xf32>
    %266 = vector.shape_cast %265 : vector<8xf32> to vector<8x1xf32>
    %267 = arith.addf %263, %266 : vector<8x1xf32>
    %268 = math.sqrt %267 : vector<8x1xf32>
    %cst_129 = arith.constant 9.99999996E-13 : f32
    %269 = vector.broadcast %cst_129 : f32 to vector<8x1xf32>
    %270 = arith.maximumf %268, %269 : vector<8x1xf32>
    %cst_130 = arith.constant 1.000000e+00 : f32
    %271 = vector.broadcast %cst_130 : f32 to vector<8x1xf32>
    %272 = arith.divf %271, %270 : vector<8x1xf32>
    %273 = vector.broadcast %260 : vector<8x1xf32> to vector<8x8xf32>
    %274 = arith.mulf %96, %273 : vector<8x8xf32>
    %275 = vector.broadcast %272 : vector<8x1xf32> to vector<8x8xf32>
    %276 = arith.mulf %97, %275 : vector<8x8xf32>
    %cst_131 = arith.constant dense<0.000000e+00> : vector<8x8xf32>
    %277 = tpu.matmul %274, %276, %cst_131 {dimension_numbers = #tpu.dot_dimension_numbers<[1], [1], [0], [0], [0, 0, 1, 0], [], []>} : vector<8x8xf32>, vector<8x8xf32>, vector<8x8xf32> -> vector<8x8xf32>
    %278 = arith.mulf %274, %276 : vector<8x8xf32>
    %cst_132 = arith.constant dense<0.000000e+00> : vector<8xf32>
    %279 = vector.multi_reduction <add>, %278, %cst_132 [1] : vector<8x8xf32> to vector<8xf32>
    %280 = vector.shape_cast %279 : vector<8xf32> to vector<8x1xf32>
    %281 = vector.broadcast %260 : vector<8x1xf32> to vector<8x8xf32>
    %282 = arith.mulf %88, %281 : vector<8x8xf32>
    %283 = vector.broadcast %272 : vector<8x1xf32> to vector<8x8xf32>
    %284 = arith.mulf %89, %283 : vector<8x8xf32>
    %cst_133 = arith.constant dense<0.000000e+00> : vector<8x8xf32>
    %285 = tpu.matmul %282, %284, %cst_133 {dimension_numbers = #tpu.dot_dimension_numbers<[1], [1], [0], [0], [0, 0, 1, 0], [], []>} : vector<8x8xf32>, vector<8x8xf32>, vector<8x8xf32> -> vector<8x8xf32>
    %286 = arith.mulf %282, %284 : vector<8x8xf32>
    %cst_134 = arith.constant dense<0.000000e+00> : vector<8xf32>
    %287 = vector.multi_reduction <add>, %286, %cst_134 [1] : vector<8x8xf32> to vector<8xf32>
    %288 = vector.shape_cast %287 : vector<8xf32> to vector<8x1xf32>
    %289 = arith.addf %277, %285 : vector<8x8xf32>
    %290 = arith.addf %280, %288 : vector<8x1xf32>
    %cst_135 = arith.constant 14.2857141 : f32
    %291 = vector.broadcast %cst_135 : f32 to vector<8x8xf32>
    %292 = arith.mulf %289, %291 : vector<8x8xf32>
    %cst_136 = arith.constant 14.2857141 : f32
    %293 = vector.broadcast %cst_136 : f32 to vector<8x1xf32>
    %294 = arith.mulf %290, %293 : vector<8x1xf32>
    %cst_137 = arith.constant dense<0xFF800000> : vector<8xf32>
    %295 = vector.multi_reduction <maximumf>, %292, %cst_137 [1] : vector<8x8xf32> to vector<8xf32>
    %296 = vector.shape_cast %295 : vector<8xf32> to vector<8x1xf32>
    %297 = vector.broadcast %296 : vector<8x1xf32> to vector<8x8xf32>
    %298 = arith.subf %292, %297 : vector<8x8xf32>
    %299 = math.exp %298 : vector<8x8xf32>
    %cst_138 = arith.constant dense<0.000000e+00> : vector<8xf32>
    %300 = vector.multi_reduction <add>, %299, %cst_138 [1] : vector<8x8xf32> to vector<8xf32>
    %301 = vector.shape_cast %300 : vector<8xf32> to vector<8x1xf32>
    %302 = math.log %301 : vector<8x1xf32>
    %303 = arith.addf %302, %296 : vector<8x1xf32>
    %cst_139 = arith.constant dense<0xFF800000> : vector<8xf32>
    %304 = vector.multi_reduction <maximumf>, %292, %cst_139 [0] : vector<8x8xf32> to vector<8xf32>
    %305 = vector.shape_cast %304 : vector<8xf32> to vector<1x8xf32>
    %306 = vector.broadcast %305 : vector<1x8xf32> to vector<8x8xf32>
    %307 = arith.subf %292, %306 : vector<8x8xf32>
    %308 = math.exp %307 : vector<8x8xf32>
    %cst_140 = arith.constant dense<0.000000e+00> : vector<8xf32>
    %309 = vector.multi_reduction <add>, %308, %cst_140 [0] : vector<8x8xf32> to vector<8xf32>
    %310 = vector.shape_cast %309 : vector<8xf32> to vector<1x8xf32>
    %311 = math.log %310 : vector<1x8xf32>
    %312 = arith.addf %311, %305 : vector<1x8xf32>
    %313 = vector.shape_cast %294 : vector<8x1xf32> to vector<1x8x1xf32>
    %cst_141 = arith.constant dense<0.000000e+00> : vector<1xf32>
    %314 = vector.multi_reduction <add>, %313, %cst_141 [1, 2] : vector<1x8x1xf32> to vector<1xf32>
    %315 = vector.shape_cast %314 : vector<1xf32> to vector<1x1x1xf32>
    %316 = vector.extract %315[0, 0, 0] : f32 from vector<1x1x1xf32>
    %317 = vector.broadcast %316 : f32 to vector<1x1xf32>
    %318 = vector.shape_cast %303 : vector<8x1xf32> to vector<1x8x1xf32>
    %cst_142 = arith.constant dense<0.000000e+00> : vector<1xf32>
    %319 = vector.multi_reduction <add>, %318, %cst_142 [1, 2] : vector<1x8x1xf32> to vector<1xf32>
    %320 = vector.shape_cast %319 : vector<1xf32> to vector<1x1x1xf32>
    %321 = vector.extract %320[0, 0, 0] : f32 from vector<1x1x1xf32>
    %322 = vector.broadcast %321 : f32 to vector<1x1xf32>
    %323 = arith.subf %322, %317 : vector<1x1xf32>
    %cst_143 = arith.constant 8.000000e+00 : f32
    %324 = vector.broadcast %cst_143 : f32 to vector<1x1xf32>
    %325 = arith.divf %323, %324 : vector<1x1xf32>
    %326 = vector.shape_cast %312 : vector<1x8xf32> to vector<1x1x8xf32>
    %cst_144 = arith.constant dense<0.000000e+00> : vector<1xf32>
    %327 = vector.multi_reduction <add>, %326, %cst_144 [1, 2] : vector<1x1x8xf32> to vector<1xf32>
    %328 = vector.shape_cast %327 : vector<1xf32> to vector<1x1x1xf32>
    %329 = vector.extract %328[0, 0, 0] : f32 from vector<1x1x1xf32>
    %330 = vector.broadcast %329 : f32 to vector<1x1xf32>
    %331 = arith.subf %330, %317 : vector<1x1xf32>
    %cst_145 = arith.constant 8.000000e+00 : f32
    %332 = vector.broadcast %cst_145 : f32 to vector<1x1xf32>
    %333 = arith.divf %331, %332 : vector<1x1xf32>
    %334 = arith.addf %325, %333 : vector<1x1xf32>
    %cst_146 = arith.constant 5.000000e-01 : f32
    %335 = vector.broadcast %cst_146 : f32 to vector<1x1xf32>
    %336 = arith.mulf %335, %334 : vector<1x1xf32>
    %337 = arith.mulf %98, %98 : vector<8x8xf32>
    %cst_147 = arith.constant dense<0.000000e+00> : vector<8xf32>
    %338 = vector.multi_reduction <add>, %337, %cst_147 [1] : vector<8x8xf32> to vector<8xf32>
    %339 = vector.shape_cast %338 : vector<8xf32> to vector<8x1xf32>
    %340 = arith.mulf %90, %90 : vector<8x8xf32>
    %cst_148 = arith.constant dense<0.000000e+00> : vector<8xf32>
    %341 = vector.multi_reduction <add>, %340, %cst_148 [1] : vector<8x8xf32> to vector<8xf32>
    %342 = vector.shape_cast %341 : vector<8xf32> to vector<8x1xf32>
    %343 = arith.addf %339, %342 : vector<8x1xf32>
    %344 = math.sqrt %343 : vector<8x1xf32>
    %cst_149 = arith.constant 9.99999996E-13 : f32
    %345 = vector.broadcast %cst_149 : f32 to vector<8x1xf32>
    %346 = arith.maximumf %344, %345 : vector<8x1xf32>
    %cst_150 = arith.constant 1.000000e+00 : f32
    %347 = vector.broadcast %cst_150 : f32 to vector<8x1xf32>
    %348 = arith.divf %347, %346 : vector<8x1xf32>
    %349 = arith.mulf %99, %99 : vector<8x8xf32>
    %cst_151 = arith.constant dense<0.000000e+00> : vector<8xf32>
    %350 = vector.multi_reduction <add>, %349, %cst_151 [1] : vector<8x8xf32> to vector<8xf32>
    %351 = vector.shape_cast %350 : vector<8xf32> to vector<8x1xf32>
    %352 = arith.mulf %91, %91 : vector<8x8xf32>
    %cst_152 = arith.constant dense<0.000000e+00> : vector<8xf32>
    %353 = vector.multi_reduction <add>, %352, %cst_152 [1] : vector<8x8xf32> to vector<8xf32>
    %354 = vector.shape_cast %353 : vector<8xf32> to vector<8x1xf32>
    %355 = arith.addf %351, %354 : vector<8x1xf32>
    %356 = math.sqrt %355 : vector<8x1xf32>
    %cst_153 = arith.constant 9.99999996E-13 : f32
    %357 = vector.broadcast %cst_153 : f32 to vector<8x1xf32>
    %358 = arith.maximumf %356, %357 : vector<8x1xf32>
    %cst_154 = arith.constant 1.000000e+00 : f32
    %359 = vector.broadcast %cst_154 : f32 to vector<8x1xf32>
    %360 = arith.divf %359, %358 : vector<8x1xf32>
    %361 = vector.broadcast %348 : vector<8x1xf32> to vector<8x8xf32>
    %362 = arith.mulf %98, %361 : vector<8x8xf32>
    %363 = vector.broadcast %360 : vector<8x1xf32> to vector<8x8xf32>
    %364 = arith.mulf %99, %363 : vector<8x8xf32>
    %cst_155 = arith.constant dense<0.000000e+00> : vector<8x8xf32>
    %365 = tpu.matmul %362, %364, %cst_155 {dimension_numbers = #tpu.dot_dimension_numbers<[1], [1], [0], [0], [0, 0, 1, 0], [], []>} : vector<8x8xf32>, vector<8x8xf32>, vector<8x8xf32> -> vector<8x8xf32>
    %366 = arith.mulf %362, %364 : vector<8x8xf32>
    %cst_156 = arith.constant dense<0.000000e+00> : vector<8xf32>
    %367 = vector.multi_reduction <add>, %366, %cst_156 [1] : vector<8x8xf32> to vector<8xf32>
    %368 = vector.shape_cast %367 : vector<8xf32> to vector<8x1xf32>
    %369 = vector.broadcast %348 : vector<8x1xf32> to vector<8x8xf32>
    %370 = arith.mulf %90, %369 : vector<8x8xf32>
    %371 = vector.broadcast %360 : vector<8x1xf32> to vector<8x8xf32>
    %372 = arith.mulf %91, %371 : vector<8x8xf32>
    %cst_157 = arith.constant dense<0.000000e+00> : vector<8x8xf32>
    %373 = tpu.matmul %370, %372, %cst_157 {dimension_numbers = #tpu.dot_dimension_numbers<[1], [1], [0], [0], [0, 0, 1, 0], [], []>} : vector<8x8xf32>, vector<8x8xf32>, vector<8x8xf32> -> vector<8x8xf32>
    %374 = arith.mulf %370, %372 : vector<8x8xf32>
    %cst_158 = arith.constant dense<0.000000e+00> : vector<8xf32>
    %375 = vector.multi_reduction <add>, %374, %cst_158 [1] : vector<8x8xf32> to vector<8xf32>
    %376 = vector.shape_cast %375 : vector<8xf32> to vector<8x1xf32>
    %377 = arith.addf %365, %373 : vector<8x8xf32>
    %378 = arith.addf %368, %376 : vector<8x1xf32>
    %cst_159 = arith.constant 14.2857141 : f32
    %379 = vector.broadcast %cst_159 : f32 to vector<8x8xf32>
    %380 = arith.mulf %377, %379 : vector<8x8xf32>
    %cst_160 = arith.constant 14.2857141 : f32
    %381 = vector.broadcast %cst_160 : f32 to vector<8x1xf32>
    %382 = arith.mulf %378, %381 : vector<8x1xf32>
    %cst_161 = arith.constant dense<0xFF800000> : vector<8xf32>
    %383 = vector.multi_reduction <maximumf>, %380, %cst_161 [1] : vector<8x8xf32> to vector<8xf32>
    %384 = vector.shape_cast %383 : vector<8xf32> to vector<8x1xf32>
    %385 = vector.broadcast %384 : vector<8x1xf32> to vector<8x8xf32>
    %386 = arith.subf %380, %385 : vector<8x8xf32>
    %387 = math.exp %386 : vector<8x8xf32>
    %cst_162 = arith.constant dense<0.000000e+00> : vector<8xf32>
    %388 = vector.multi_reduction <add>, %387, %cst_162 [1] : vector<8x8xf32> to vector<8xf32>
    %389 = vector.shape_cast %388 : vector<8xf32> to vector<8x1xf32>
    %390 = math.log %389 : vector<8x1xf32>
    %391 = arith.addf %390, %384 : vector<8x1xf32>
    %cst_163 = arith.constant dense<0xFF800000> : vector<8xf32>
    %392 = vector.multi_reduction <maximumf>, %380, %cst_163 [0] : vector<8x8xf32> to vector<8xf32>
    %393 = vector.shape_cast %392 : vector<8xf32> to vector<1x8xf32>
    %394 = vector.broadcast %393 : vector<1x8xf32> to vector<8x8xf32>
    %395 = arith.subf %380, %394 : vector<8x8xf32>
    %396 = math.exp %395 : vector<8x8xf32>
    %cst_164 = arith.constant dense<0.000000e+00> : vector<8xf32>
    %397 = vector.multi_reduction <add>, %396, %cst_164 [0] : vector<8x8xf32> to vector<8xf32>
    %398 = vector.shape_cast %397 : vector<8xf32> to vector<1x8xf32>
    %399 = math.log %398 : vector<1x8xf32>
    %400 = arith.addf %399, %393 : vector<1x8xf32>
    %401 = vector.shape_cast %382 : vector<8x1xf32> to vector<1x8x1xf32>
    %cst_165 = arith.constant dense<0.000000e+00> : vector<1xf32>
    %402 = vector.multi_reduction <add>, %401, %cst_165 [1, 2] : vector<1x8x1xf32> to vector<1xf32>
    %403 = vector.shape_cast %402 : vector<1xf32> to vector<1x1x1xf32>
    %404 = vector.extract %403[0, 0, 0] : f32 from vector<1x1x1xf32>
    %405 = vector.broadcast %404 : f32 to vector<1x1xf32>
    %406 = vector.shape_cast %391 : vector<8x1xf32> to vector<1x8x1xf32>
    %cst_166 = arith.constant dense<0.000000e+00> : vector<1xf32>
    %407 = vector.multi_reduction <add>, %406, %cst_166 [1, 2] : vector<1x8x1xf32> to vector<1xf32>
    %408 = vector.shape_cast %407 : vector<1xf32> to vector<1x1x1xf32>
    %409 = vector.extract %408[0, 0, 0] : f32 from vector<1x1x1xf32>
    %410 = vector.broadcast %409 : f32 to vector<1x1xf32>
    %411 = arith.subf %410, %405 : vector<1x1xf32>
    %cst_167 = arith.constant 8.000000e+00 : f32
    %412 = vector.broadcast %cst_167 : f32 to vector<1x1xf32>
    %413 = arith.divf %411, %412 : vector<1x1xf32>
    %414 = vector.shape_cast %400 : vector<1x8xf32> to vector<1x1x8xf32>
    %cst_168 = arith.constant dense<0.000000e+00> : vector<1xf32>
    %415 = vector.multi_reduction <add>, %414, %cst_168 [1, 2] : vector<1x1x8xf32> to vector<1xf32>
    %416 = vector.shape_cast %415 : vector<1xf32> to vector<1x1x1xf32>
    %417 = vector.extract %416[0, 0, 0] : f32 from vector<1x1x1xf32>
    %418 = vector.broadcast %417 : f32 to vector<1x1xf32>
    %419 = arith.subf %418, %405 : vector<1x1xf32>
    %cst_169 = arith.constant 8.000000e+00 : f32
    %420 = vector.broadcast %cst_169 : f32 to vector<1x1xf32>
    %421 = arith.divf %419, %420 : vector<1x1xf32>
    %422 = arith.addf %413, %421 : vector<1x1xf32>
    %cst_170 = arith.constant 5.000000e-01 : f32
    %423 = vector.broadcast %cst_170 : f32 to vector<1x1xf32>
    %424 = arith.mulf %423, %422 : vector<1x1xf32>
    %425 = arith.addf %336, %424 : vector<1x1xf32>
    %426 = arith.mulf %96, %96 : vector<8x8xf32>
    %cst_171 = arith.constant dense<0.000000e+00> : vector<8xf32>
    %427 = vector.multi_reduction <add>, %426, %cst_171 [1] : vector<8x8xf32> to vector<8xf32>
    %428 = vector.shape_cast %427 : vector<8xf32> to vector<8x1xf32>
    %429 = math.sqrt %428 : vector<8x1xf32>
    %cst_172 = arith.constant 9.99999996E-13 : f32
    %430 = vector.broadcast %cst_172 : f32 to vector<8x1xf32>
    %431 = arith.maximumf %429, %430 : vector<8x1xf32>
    %cst_173 = arith.constant 1.000000e+00 : f32
    %432 = vector.broadcast %cst_173 : f32 to vector<8x1xf32>
    %433 = arith.divf %432, %431 : vector<8x1xf32>
    %434 = vector.broadcast %433 : vector<8x1xf32> to vector<8x8xf32>
    %435 = arith.mulf %96, %434 : vector<8x8xf32>
    %436 = arith.mulf %88, %88 : vector<8x8xf32>
    %cst_174 = arith.constant dense<0.000000e+00> : vector<8xf32>
    %437 = vector.multi_reduction <add>, %436, %cst_174 [1] : vector<8x8xf32> to vector<8xf32>
    %438 = vector.shape_cast %437 : vector<8xf32> to vector<8x1xf32>
    %439 = math.sqrt %438 : vector<8x1xf32>
    %cst_175 = arith.constant 9.99999996E-13 : f32
    %440 = vector.broadcast %cst_175 : f32 to vector<8x1xf32>
    %441 = arith.maximumf %439, %440 : vector<8x1xf32>
    %cst_176 = arith.constant 1.000000e+00 : f32
    %442 = vector.broadcast %cst_176 : f32 to vector<8x1xf32>
    %443 = arith.divf %442, %441 : vector<8x1xf32>
    %444 = vector.broadcast %443 : vector<8x1xf32> to vector<8x8xf32>
    %445 = arith.mulf %88, %444 : vector<8x8xf32>
    %446 = arith.mulf %435, %445 : vector<8x8xf32>
    %cst_177 = arith.constant dense<0.000000e+00> : vector<8xf32>
    %447 = vector.multi_reduction <add>, %446, %cst_177 [1] : vector<8x8xf32> to vector<8xf32>
    %448 = vector.shape_cast %447 : vector<8xf32> to vector<8x1xf32>
    %449 = arith.mulf %448, %448 : vector<8x1xf32>
    %450 = vector.shape_cast %449 : vector<8x1xf32> to vector<1x8x1xf32>
    %cst_178 = arith.constant dense<0.000000e+00> : vector<1xf32>
    %451 = vector.multi_reduction <add>, %450, %cst_178 [1, 2] : vector<1x8x1xf32> to vector<1xf32>
    %452 = vector.shape_cast %451 : vector<1xf32> to vector<1x1x1xf32>
    %453 = vector.extract %452[0, 0, 0] : f32 from vector<1x1x1xf32>
    %454 = vector.broadcast %453 : f32 to vector<1x1xf32>
    %cst_179 = arith.constant 8.000000e+00 : f32
    %455 = vector.broadcast %cst_179 : f32 to vector<1x1xf32>
    %456 = arith.divf %454, %455 : vector<1x1xf32>
    %457 = arith.mulf %98, %98 : vector<8x8xf32>
    %cst_180 = arith.constant dense<0.000000e+00> : vector<8xf32>
    %458 = vector.multi_reduction <add>, %457, %cst_180 [1] : vector<8x8xf32> to vector<8xf32>
    %459 = vector.shape_cast %458 : vector<8xf32> to vector<8x1xf32>
    %460 = math.sqrt %459 : vector<8x1xf32>
    %cst_181 = arith.constant 9.99999996E-13 : f32
    %461 = vector.broadcast %cst_181 : f32 to vector<8x1xf32>
    %462 = arith.maximumf %460, %461 : vector<8x1xf32>
    %cst_182 = arith.constant 1.000000e+00 : f32
    %463 = vector.broadcast %cst_182 : f32 to vector<8x1xf32>
    %464 = arith.divf %463, %462 : vector<8x1xf32>
    %465 = vector.broadcast %464 : vector<8x1xf32> to vector<8x8xf32>
    %466 = arith.mulf %98, %465 : vector<8x8xf32>
    %467 = arith.mulf %90, %90 : vector<8x8xf32>
    %cst_183 = arith.constant dense<0.000000e+00> : vector<8xf32>
    %468 = vector.multi_reduction <add>, %467, %cst_183 [1] : vector<8x8xf32> to vector<8xf32>
    %469 = vector.shape_cast %468 : vector<8xf32> to vector<8x1xf32>
    %470 = math.sqrt %469 : vector<8x1xf32>
    %cst_184 = arith.constant 9.99999996E-13 : f32
    %471 = vector.broadcast %cst_184 : f32 to vector<8x1xf32>
    %472 = arith.maximumf %470, %471 : vector<8x1xf32>
    %cst_185 = arith.constant 1.000000e+00 : f32
    %473 = vector.broadcast %cst_185 : f32 to vector<8x1xf32>
    %474 = arith.divf %473, %472 : vector<8x1xf32>
    %475 = vector.broadcast %474 : vector<8x1xf32> to vector<8x8xf32>
    %476 = arith.mulf %90, %475 : vector<8x8xf32>
    %477 = arith.mulf %466, %476 : vector<8x8xf32>
    %cst_186 = arith.constant dense<0.000000e+00> : vector<8xf32>
    %478 = vector.multi_reduction <add>, %477, %cst_186 [1] : vector<8x8xf32> to vector<8xf32>
    %479 = vector.shape_cast %478 : vector<8xf32> to vector<8x1xf32>
    %480 = arith.mulf %479, %479 : vector<8x1xf32>
    %481 = vector.shape_cast %480 : vector<8x1xf32> to vector<1x8x1xf32>
    %cst_187 = arith.constant dense<0.000000e+00> : vector<1xf32>
    %482 = vector.multi_reduction <add>, %481, %cst_187 [1, 2] : vector<1x8x1xf32> to vector<1xf32>
    %483 = vector.shape_cast %482 : vector<1xf32> to vector<1x1x1xf32>
    %484 = vector.extract %483[0, 0, 0] : f32 from vector<1x1x1xf32>
    %485 = vector.broadcast %484 : f32 to vector<1x1xf32>
    %cst_188 = arith.constant 8.000000e+00 : f32
    %486 = vector.broadcast %cst_188 : f32 to vector<1x1xf32>
    %487 = arith.divf %485, %486 : vector<1x1xf32>
    %488 = arith.addf %456, %487 : vector<1x1xf32>
    %cst_189 = arith.constant 5.000000e-01 : f32
    %489 = vector.broadcast %cst_189 : f32 to vector<1x1xf32>
    %490 = arith.mulf %489, %488 : vector<1x1xf32>
    %491 = arith.mulf %97, %97 : vector<8x8xf32>
    %cst_190 = arith.constant dense<0.000000e+00> : vector<8xf32>
    %492 = vector.multi_reduction <add>, %491, %cst_190 [1] : vector<8x8xf32> to vector<8xf32>
    %493 = vector.shape_cast %492 : vector<8xf32> to vector<8x1xf32>
    %494 = math.sqrt %493 : vector<8x1xf32>
    %cst_191 = arith.constant 9.99999996E-13 : f32
    %495 = vector.broadcast %cst_191 : f32 to vector<8x1xf32>
    %496 = arith.maximumf %494, %495 : vector<8x1xf32>
    %cst_192 = arith.constant 1.000000e+00 : f32
    %497 = vector.broadcast %cst_192 : f32 to vector<8x1xf32>
    %498 = arith.divf %497, %496 : vector<8x1xf32>
    %499 = vector.broadcast %498 : vector<8x1xf32> to vector<8x8xf32>
    %500 = arith.mulf %97, %499 : vector<8x8xf32>
    %501 = arith.mulf %89, %89 : vector<8x8xf32>
    %cst_193 = arith.constant dense<0.000000e+00> : vector<8xf32>
    %502 = vector.multi_reduction <add>, %501, %cst_193 [1] : vector<8x8xf32> to vector<8xf32>
    %503 = vector.shape_cast %502 : vector<8xf32> to vector<8x1xf32>
    %504 = math.sqrt %503 : vector<8x1xf32>
    %cst_194 = arith.constant 9.99999996E-13 : f32
    %505 = vector.broadcast %cst_194 : f32 to vector<8x1xf32>
    %506 = arith.maximumf %504, %505 : vector<8x1xf32>
    %cst_195 = arith.constant 1.000000e+00 : f32
    %507 = vector.broadcast %cst_195 : f32 to vector<8x1xf32>
    %508 = arith.divf %507, %506 : vector<8x1xf32>
    %509 = vector.broadcast %508 : vector<8x1xf32> to vector<8x8xf32>
    %510 = arith.mulf %89, %509 : vector<8x8xf32>
    %511 = arith.mulf %500, %510 : vector<8x8xf32>
    %cst_196 = arith.constant dense<0.000000e+00> : vector<8xf32>
    %512 = vector.multi_reduction <add>, %511, %cst_196 [1] : vector<8x8xf32> to vector<8xf32>
    %513 = vector.shape_cast %512 : vector<8xf32> to vector<8x1xf32>
    %514 = arith.mulf %513, %513 : vector<8x1xf32>
    %515 = vector.shape_cast %514 : vector<8x1xf32> to vector<1x8x1xf32>
    %cst_197 = arith.constant dense<0.000000e+00> : vector<1xf32>
    %516 = vector.multi_reduction <add>, %515, %cst_197 [1, 2] : vector<1x8x1xf32> to vector<1xf32>
    %517 = vector.shape_cast %516 : vector<1xf32> to vector<1x1x1xf32>
    %518 = vector.extract %517[0, 0, 0] : f32 from vector<1x1x1xf32>
    %519 = vector.broadcast %518 : f32 to vector<1x1xf32>
    %cst_198 = arith.constant 8.000000e+00 : f32
    %520 = vector.broadcast %cst_198 : f32 to vector<1x1xf32>
    %521 = arith.divf %519, %520 : vector<1x1xf32>
    %522 = arith.mulf %99, %99 : vector<8x8xf32>
    %cst_199 = arith.constant dense<0.000000e+00> : vector<8xf32>
    %523 = vector.multi_reduction <add>, %522, %cst_199 [1] : vector<8x8xf32> to vector<8xf32>
    %524 = vector.shape_cast %523 : vector<8xf32> to vector<8x1xf32>
    %525 = math.sqrt %524 : vector<8x1xf32>
    %cst_200 = arith.constant 9.99999996E-13 : f32
    %526 = vector.broadcast %cst_200 : f32 to vector<8x1xf32>
    %527 = arith.maximumf %525, %526 : vector<8x1xf32>
    %cst_201 = arith.constant 1.000000e+00 : f32
    %528 = vector.broadcast %cst_201 : f32 to vector<8x1xf32>
    %529 = arith.divf %528, %527 : vector<8x1xf32>
    %530 = vector.broadcast %529 : vector<8x1xf32> to vector<8x8xf32>
    %531 = arith.mulf %99, %530 : vector<8x8xf32>
    %532 = arith.mulf %91, %91 : vector<8x8xf32>
    %cst_202 = arith.constant dense<0.000000e+00> : vector<8xf32>
    %533 = vector.multi_reduction <add>, %532, %cst_202 [1] : vector<8x8xf32> to vector<8xf32>
    %534 = vector.shape_cast %533 : vector<8xf32> to vector<8x1xf32>
    %535 = math.sqrt %534 : vector<8x1xf32>
    %cst_203 = arith.constant 9.99999996E-13 : f32
    %536 = vector.broadcast %cst_203 : f32 to vector<8x1xf32>
    %537 = arith.maximumf %535, %536 : vector<8x1xf32>
    %cst_204 = arith.constant 1.000000e+00 : f32
    %538 = vector.broadcast %cst_204 : f32 to vector<8x1xf32>
    %539 = arith.divf %538, %537 : vector<8x1xf32>
    %540 = vector.broadcast %539 : vector<8x1xf32> to vector<8x8xf32>
    %541 = arith.mulf %91, %540 : vector<8x8xf32>
    %542 = arith.mulf %531, %541 : vector<8x8xf32>
    %cst_205 = arith.constant dense<0.000000e+00> : vector<8xf32>
    %543 = vector.multi_reduction <add>, %542, %cst_205 [1] : vector<8x8xf32> to vector<8xf32>
    %544 = vector.shape_cast %543 : vector<8xf32> to vector<8x1xf32>
    %545 = arith.mulf %544, %544 : vector<8x1xf32>
    %546 = vector.shape_cast %545 : vector<8x1xf32> to vector<1x8x1xf32>
    %cst_206 = arith.constant dense<0.000000e+00> : vector<1xf32>
    %547 = vector.multi_reduction <add>, %546, %cst_206 [1, 2] : vector<1x8x1xf32> to vector<1xf32>
    %548 = vector.shape_cast %547 : vector<1xf32> to vector<1x1x1xf32>
    %549 = vector.extract %548[0, 0, 0] : f32 from vector<1x1x1xf32>
    %550 = vector.broadcast %549 : f32 to vector<1x1xf32>
    %cst_207 = arith.constant 8.000000e+00 : f32
    %551 = vector.broadcast %cst_207 : f32 to vector<1x1xf32>
    %552 = arith.divf %550, %551 : vector<1x1xf32>
    %553 = arith.addf %521, %552 : vector<1x1xf32>
    %cst_208 = arith.constant 5.000000e-01 : f32
    %554 = vector.broadcast %cst_208 : f32 to vector<1x1xf32>
    %555 = arith.mulf %554, %553 : vector<1x1xf32>
    %556 = arith.addf %490, %555 : vector<1x1xf32>
    %c0_209 = arith.constant 0 : index
    %557 = memref.load %arg30[%c0_209] : memref<2xf32, #tpu.memory_space<smem>>
    %c1 = arith.constant 1 : index
    %558 = memref.load %arg30[%c1] : memref<2xf32, #tpu.memory_space<smem>>
    %cst_210 = arith.constant 2.000000e+00 : f32
    %559 = vector.broadcast %cst_210 : f32 to vector<1x1xf32>
    %560 = arith.mulf %559, %242 : vector<1x1xf32>
    %cst_211 = arith.constant 1.000000e+00 : f32
    %561 = arith.addf %cst_211, %558 : f32
    %562 = vector.broadcast %561 : f32 to vector<1x1xf32>
    %563 = arith.divf %560, %562 : vector<1x1xf32>
    %564 = vector.broadcast %558 : f32 to vector<1x1xf32>
    %565 = arith.mulf %564, %425 : vector<1x1xf32>
    %cst_212 = arith.constant 1.000000e+00 : f32
    %566 = arith.addf %cst_212, %558 : f32
    %567 = vector.broadcast %566 : f32 to vector<1x1xf32>
    %568 = arith.divf %565, %567 : vector<1x1xf32>
    %569 = arith.addf %563, %568 : vector<1x1xf32>
    %570 = vector.broadcast %557 : f32 to vector<1x1xf32>
    %571 = arith.mulf %570, %556 : vector<1x1xf32>
    %572 = arith.addf %569, %571 : vector<1x1xf32>
    %573 = tpu.iota {dimensions = array<i32: 1>} : vector<1x128xi32>
    %cst_213 = arith.constant 0.000000e+00 : f32
    %574 = vector.broadcast %cst_213 : f32 to vector<1x128xf32>
    %c0_i32 = arith.constant 0 : i32
    %575 = vector.broadcast %c0_i32 : i32 to vector<1x128xi32>
    %576 = arith.cmpi eq, %573, %575 : vector<1x128xi32>
    %577 = vector.shape_cast %572 : vector<1x1xf32> to vector<1x1xf32>
    %578 = vector.broadcast %577 : vector<1x1xf32> to vector<1x128xf32>
    %579 = arith.select %576, %578, %574 : vector<1x128xi1>, vector<1x128xf32>
    %c1_i32 = arith.constant 1 : i32
    %580 = vector.broadcast %c1_i32 : i32 to vector<1x128xi32>
    %581 = arith.cmpi eq, %573, %580 : vector<1x128xi32>
    %582 = vector.shape_cast %242 : vector<1x1xf32> to vector<1x1xf32>
    %583 = vector.broadcast %582 : vector<1x1xf32> to vector<1x128xf32>
    %584 = arith.select %581, %583, %579 : vector<1x128xi1>, vector<1x128xf32>
    %c2_i32 = arith.constant 2 : i32
    %585 = vector.broadcast %c2_i32 : i32 to vector<1x128xi32>
    %586 = arith.cmpi eq, %573, %585 : vector<1x128xi32>
    %587 = vector.shape_cast %242 : vector<1x1xf32> to vector<1x1xf32>
    %588 = vector.broadcast %587 : vector<1x1xf32> to vector<1x128xf32>
    %589 = arith.select %586, %588, %584 : vector<1x128xi1>, vector<1x128xf32>
    %c3_i32 = arith.constant 3 : i32
    %590 = vector.broadcast %c3_i32 : i32 to vector<1x128xi32>
    %591 = arith.cmpi eq, %573, %590 : vector<1x128xi32>
    %592 = vector.shape_cast %245 : vector<1x1xf32> to vector<1x1xf32>
    %593 = vector.broadcast %592 : vector<1x1xf32> to vector<1x128xf32>
    %594 = arith.select %591, %593, %589 : vector<1x128xi1>, vector<1x128xf32>
    %c4_i32 = arith.constant 4 : i32
    %595 = vector.broadcast %c4_i32 : i32 to vector<1x128xi32>
    %596 = arith.cmpi eq, %573, %595 : vector<1x128xi32>
    %597 = vector.shape_cast %248 : vector<1x1xf32> to vector<1x1xf32>
    %598 = vector.broadcast %597 : vector<1x1xf32> to vector<1x128xf32>
    %599 = arith.select %596, %598, %594 : vector<1x128xi1>, vector<1x128xf32>
    %c5_i32 = arith.constant 5 : i32
    %600 = vector.broadcast %c5_i32 : i32 to vector<1x128xi32>
    %601 = arith.cmpi eq, %573, %600 : vector<1x128xi32>
    %602 = vector.shape_cast %425 : vector<1x1xf32> to vector<1x1xf32>
    %603 = vector.broadcast %602 : vector<1x1xf32> to vector<1x128xf32>
    %604 = arith.select %601, %603, %599 : vector<1x128xi1>, vector<1x128xf32>
    %c6_i32 = arith.constant 6 : i32
    %605 = vector.broadcast %c6_i32 : i32 to vector<1x128xi32>
    %606 = arith.cmpi eq, %573, %605 : vector<1x128xi32>
    %607 = vector.shape_cast %556 : vector<1x1xf32> to vector<1x1xf32>
    %608 = vector.broadcast %607 : vector<1x1xf32> to vector<1x128xf32>
    %609 = arith.select %606, %608, %604 : vector<1x128xi1>, vector<1x128xf32>
    %c7_i32 = arith.constant 7 : i32
    %610 = vector.broadcast %c7_i32 : i32 to vector<1x128xi32>
    %611 = arith.cmpi eq, %573, %610 : vector<1x128xi32>
    %612 = vector.broadcast %557 : f32 to vector<1x128xf32>
    %613 = arith.select %611, %612, %609 : vector<1x128xi1>, vector<1x128xf32>
    %c0_214 = arith.constant 0 : index
    %c0_215 = arith.constant 0 : index
    %614 = vector.load %arg31[%c0_214, %c0_215] : memref<1x128xf32, #tpu.memory_space<vmem>>, vector<1x128xf32>
    tpu.vector_store %arg31[%c0_214, %c0_215], %613 {strides = array<i32>} : memref<1x128xf32, #tpu.memory_space<vmem>>, vector<1x128xf32>,
    return
  }
}

</mosaic_0001>

<bundles_post_ra>
// kernel: _fused_forward.1
= control target key start
LH: loop header
LB: loop body
LE: loop exit
PB: predicated region body
PF: predicated region fallthrough
CT: control target
= control target key end

     0   :  { %s2095_s6 = smov 1   ;;  %s2096_s10 = smov 2   ;;  %s2878_s0 = inlined_call_operand.smem [shape: u32[32], index: -1, kind: input, shape index: {}] }
   0x1   :  { %s2137_s5 = sld [smem:[%s2878_s0]]   ;;  %s2097_s14 = smov 3  }
   0x2   :  { %s2142_s9 = sld [smem:[%s2878_s0 + %s2095_s6]]   ;;  %s2098_s18 = smov 4  }
   0x3   :  { %s2147_s13 = sld [smem:[%s2878_s0 + %s2096_s10]]   ;;  %s2099_s22 = smov 5  }
   0x4   :  { %s2152_s17 = sld [smem:[%s2878_s0 + %s2097_s14]]   ;;  %s2100_s26 = smov 6  }
   0x5   :  { %s2157_s21 = sld [smem:[%s2878_s0 + %s2098_s18]]   ;;  %s2101_s30 = smov 7  }
   0x6   :  { %s2162_s25 = sld [smem:[%s2878_s0 + %s2099_s22]]   ;;  %s2102_s4 = smov 8  }
   0x7   :  { %s2167_s29 = sld [smem:[%s2878_s0 + %s2100_s26]]   ;;  %s2103_s10 = smov 9  }
   0x8   :  { %s2172_s3 = sld [smem:[%s2878_s0 + %s2101_s30]]   ;;  %s2104_s15 = smov 10  }
   0x9   :  { %2885 = sst [smem:[#allocation8_spill]] %s2147_s13  ;;  %s2105_s20 = smov 11  }
   0xa   :  { %2886 = sst [smem:[#allocation9_spill]] %s2152_s17  ;;  %s2106_s26 = smov 12  }
   0xb   :  { %s2177_s8 = sld [smem:[%s2878_s0 + %s2102_s4]]   ;;  %s2107_s1 = smov 13  }
   0xc   :  { %s2182_s14 = sld [smem:[%s2878_s0 + %s2103_s10]]   ;;  %s2108_s7 = smov 14  }
   0xd   :  { %s2187_s19 = sld [smem:[%s2878_s0 + %s2104_s15]]   ;;  %s2109_s15 = smov 15  }
   0xe   :  { %s2192_s24 = sld [smem:[%s2878_s0 + %s2105_s20]]   ;;  %s2110_s22 = smov 16  }
   0xf   :  { %s2197_s30 = sld [smem:[%s2878_s0 + %s2106_s26]]   ;;  %s2111_s28 = smov 17  }
  0x10   :  { %s2202_s6 = sld [smem:[%s2878_s0 + %s2107_s1]]   ;;  %s2125_s16 = smov 31  }
  0x11   :  { %s2207_s12 = sld [smem:[%s2878_s0 + %s2108_s7]]   ;;  %s2112_s7 = smov 18  }
  0x12   :  { %2887 = sst [smem:[#allocation10_spill]] %s2182_s14 }
  0x13   :  { %s2212_s20 = sld [smem:[%s2878_s0 + %s2109_s15]]   ;;  %s2113_s15 = smov 19  }
  0x14   :  { %s2217_s27 = sld [smem:[%s2878_s0 + %s2110_s22]]   ;;  %s2114_s22 = smov 20  }
  0x15   :  { %s2222_s4 = sld [smem:[%s2878_s0 + %s2111_s28]]   ;;  %s2115_s28 = smov 21  }
  0x16   :  { %s2227_s13 = sld [smem:[%s2878_s0 + %s2112_s7]]   ;;  %s2116_s7 = smov 22  }
  0x17   :  { %s2232_s17 = sld [smem:[%s2878_s0 + %s2113_s15]]   ;;  %s2117_s15 = smov 23  }
  0x18   :  { %s2242_s14 = sld [smem:[%s2878_s0 + %s2115_s28]]   ;;  %s2119_s28 = smov 25  }
  0x19   :  { %2888 = sst [smem:[#allocation11_spill]] %s2212_s20 }
  0x1a   :  { %s2237_s20 = sld [smem:[%s2878_s0 + %s2114_s22]]   ;;  %s2118_s22 = smov 24  }
  0x1c   :  { %2889 = sst [smem:[#allocation12_spill]] %s2227_s13 }
  0x1d   :  { %2890 = sst [smem:[#allocation13_spill]] %s2232_s17 }
  0x1e   :  { %2892 = sst [smem:[#allocation15_spill]] %s2242_s14 }
  0x1f   :  { %s2247_s13 = sld [smem:[%s2878_s0 + %s2116_s7]]   ;;  %s2120_s7 = smov 26  }
  0x20   :  { %2891 = sst [smem:[#allocation14_spill]] %s2237_s20 }
  0x21   :  { %s2252_s17 = sld [smem:[%s2878_s0 + %s2117_s15]]   ;;  %s2121_s15 = smov 27  }
  0x22   :  { %s2257_s20 = sld [smem:[%s2878_s0 + %s2118_s22]]   ;;  %s2122_s22 = smov 28  }
  0x23   :  { %s2262_s14 = sld [smem:[%s2878_s0 + %s2119_s28]]   ;;  %s2123_s28 = smov 29  }
  0x25   :  { %2893 = sst [smem:[#allocation16_spill]] %s2247_s13 }
  0x26   :  { %s2267_s13 = sld [smem:[%s2878_s0 + %s2120_s7]]   ;;  %s2124_s7 = smov 30  }
  0x27   :  { %2894 = sst [smem:[#allocation17_spill]] %s2252_s17 }
  0x28   :  { %2895 = sst [smem:[#allocation18_spill]] %s2257_s20 }
  0x29   :  { %2896 = sst [smem:[#allocation19_spill]] %s2262_s14 }
  0x2a   :  { %s2272_s17 = sld [smem:[%s2878_s0 + %s2121_s15]]  }
  0x2b   :  { %s2277_s20 = sld [smem:[%s2878_s0 + %s2122_s22]]  }
  0x2c   :  { %2897 = sst [smem:[#allocation20_spill]] %s2267_s13 }
  0x2d   :  { %s2282_s14 = sld [smem:[%s2878_s0 + %s2123_s28]]  }
  0x2e   :  { %s1834_s13 = sld [smem:[%s2878_s0 + %s2124_s7]]  }
  0x30   :  { %2898 = sst [smem:[#allocation21_spill]] %s2272_s17 }
  0x31   :  { %s2290_s17 = sld [smem:[%s2878_s0 + %s2125_s16]]  }
  0x32   :  { %68 = vsyncpa [#allocation4], 0 }
  0x33   :  { %69 = vsyncpa [#allocation3], 0 }
  0x34   :  { %s135_s22 = sshll.u32 %s1834_s13, 4  ;;  %s2059_s28 = scalar_lea.vmem %s1834_s13, 1  ;;  %s136_s22 = int_to_ptr.vmem [resolvable:$true] %s135_s22 }
  0x35   :  { %s2055_s23 = sshra.s32 %s136_s22, 4  ;;  %s2056_s23 = int_to_ptr.vmem [resolvable:$true] %s2055_s23 }
  0x36   :  { %s2057_s26 = scalar_lea.vmem %s2056_s23, 1  ;;  %p2060_p1 = scmp.lt.s32.totalorder %s2056_s23, %s1834_s13 }
  0x37   :  { %p2058_p0 = scmp.ne.s32.totalorder %s2056_s23, %s2057_s26  ;;  %p2061_p2 = scmp.lt.s32.totalorder %s2059_s28, %s2057_s26 }
  0x39   :  { %p2062_p3 = por %p2061_p2, %p2060_p1 }
  0x3b   :  { %p2063_p4 = pnand %p2062_p3, %p2058_p0 }
  0x3d   :  { %2066 = shalt.err (!%p2063_p4)
}
  0x3e   :  { %s2126_s1 = smov [#allocation2]  }
  0x3f   :  { %138 = dma.vmem_to_smem %s136_s22, 16, %s2126_s1, [#allocation4]  }
  0x40   :  { %2091 = dma.done.wait [#allocation4], 16  }
  0x41   :  { %2092 = vsyncadd [#allocation4], 4294967280 }
  0x42   :  { %143 = sfence }
  0x43   :  { %v149_v0 = vld [vmem:[%s2157_s21 + $0x8] sm:$0xff]  ;;  %v148_v2 = vld [vmem:[%s2157_s21] sm:$0xff]  ;;  %vm164_vm0 = vcmask 130048   ;;  %v154_v6 = vld [vmem:[%s2167_s29 + $0x18] sm:$0xff]  ;;  %vm199_vm1 = vcmask 261120   ;;  %s2899_s0 = sld [smem:[#allocation17_spill]] }
  0x44   :  { %v264_v1 = vld [vmem:[%s2187_s19 + $0x8] sm:$0xff]  ;;  %185 = vmatpush.msra.mxu0 %v149_v0  ;;  %v263_v3 = vld [vmem:[%s2187_s19] sm:$0xff]  ;;  %218 = vmatpush.msra.mxu1 %v154_v6  ;;  %v153_v9 = vld [vmem:[%s2167_s29 + $0x10] sm:$0xff]  ;;  %s2902_s13 = sld [smem:[#allocation11_spill]]  ;;  %vm398_vm2 = vcmask 64512  }
  0x45   :  { %299 = vmatpush.msra.mxu3 %v264_v1  ;;  %v2297_v4 = vld [vmem:[%s2137_s5] sm:$0xff]  ;;  %v2308_v7 = vld [vmem:[%s2137_s5 + $0x8] sm:$0xff]  ;;  %v269_v12 = vld [vmem:[%s2197_s30 + $0x18] sm:$0xff]  ;;  %s2900_s5 = sld [smem:[#allocation18_spill]] }
  0x46   :  { %v2300_v5 = vld [vmem:[%s2142_s9] sm:$0xff]  ;;  %186 = vmatpush.msra.mxu0 %v148_v2  ;;  %v2311_v8 = vld [vmem:[%s2142_s9 + $0x8] sm:$0xff]  ;;  %219 = vmatpush.msra.mxu1 %v153_v9  ;;  %v268_v13 = vld [vmem:[%s2197_s30 + $0x10] sm:$0xff]  ;;  %s2901_s9 = sld [smem:[#allocation10_spill]] }
  0x47   :  { %300 = vmatpush.msra.mxu3 %v263_v3  ;;  %1836 = vmatmul.msk.f32.vlgmr.msra.gmra.mxu0 %vm164_vm0, %v2297_v4  ;;  %v152_v10 = vld [vmem:[%s2167_s29 + $0x8] sm:$0xff]  ;;  %v151_v11 = vld [vmem:[%s2167_s29] sm:$0xff]  ;;  %v159_v16 = vld [vmem:[%s2177_s8 + $0x18] sm:$0xff]  ;;  %s2903_s21 = sld [smem:[#allocation9_spill]] }
  0x48   :  { %1842 = vmatmul.msk.f32.vlgmr.msra.gmra.mxu3 %vm164_vm0, %v2300_v5  ;;  %220 = vmatpush.msra.mxu1 %v152_v10  ;;  %v267_v14 = vld [vmem:[%s2197_s30 + $0x8] sm:$0xff]  ;;  %v266_v15 = vld [vmem:[%s2197_s30] sm:$0xff]  ;;  %v158_v31 = vld [vmem:[%s2177_s8 + $0x10] sm:$0xff]  ;;  %s2905_s29 = sld [smem:[#allocation13_spill]] }
  0x49   :  { %331 = vmatpush.msrb.mxu0 %v269_v12  ;;  %252 = vmatpush.msra.mxu2 %v159_v16  ;;  %v1943_v17 = vld [vmem:[%s2162_s25] ss:$0 sm:$0xff]  ;;  %v157_v32 = vld [vmem:[%s2177_s8 + $0x8] sm:$0xff]  ;;  %v274_v34 = vld [vmem:[%s2207_s12 + $0x18] sm:$0xff]  ;;  %s2904_s25 = sld [smem:[#allocation8_spill]] }
  0x4a   :  { %221 = vmatpush.msra.mxu1 %v151_v11  ;;  %v1944_v21 = vld [vmem:[%s2192_s24] ss:$0 sm:$0xff]  ;;  %365 = vmatpush.msrb.mxu3 %v274_v34  ;;  %v273_v35 = vld [vmem:[%s2207_s12 + $0x10] sm:$0xff]  ;;  %v272_v36 = vld [vmem:[%s2207_s12 + $0x8] sm:$0xff]  ;;  %s2908_s19 = sld [smem:[#allocation19_spill]] }
  0x4b   :  { %332 = vmatpush.msrb.mxu0 %v268_v13  ;;  %253 = vmatpush.msra.mxu2 %v158_v31  ;;  %v156_v33 = vld [vmem:[%s2177_s8] sm:$0xff]  ;;  %v385_v38 = vld [vmem:[%s2217_s27 + $0x8] sm:$0xff]  ;;  %s2907_s8 = sld [smem:[#allocation12_spill]] }
  0x4c   :  { %366 = vmatpush.msrb.mxu3 %v273_v35  ;;  %v271_v37 = vld [vmem:[%s2207_s12] sm:$0xff]  ;;  %v525_v55 = vld [vmem:[%s2899_s0 + $0x8] sm:$0xff]  ;;  %s2909_s24 = sld [smem:[#allocation15_spill]] }
  0x4d   :  { %333 = vmatpush.msrb.mxu0 %v267_v14  ;;  %254 = vmatpush.msra.mxu2 %v157_v32  ;;  %v386_v39 = vld [vmem:[%s2222_s4] sm:$0xff]  ;;  %s2912_s30 = sld [smem:[#allocation14_spill]] }
  0x4e   :  { %367 = vmatpush.msrb.mxu3 %v272_v36  ;;  %v384_v40 = vld [vmem:[%s2217_s27] sm:$0xff]  ;;  %420 = vmatpush.msrb.mxu1 %v386_v39  ;;  %v391_v3 = vld [vmem:[%s2905_s29 + $0x18] sm:$0xff]  ;;  %s2914_s12 = sld [smem:[#allocation16_spill]] }
  0x4f   :  { %1837 = vmatmul.msk.f32.gmra.mxu0 %vm164_vm0, %v2308_v7  ;;  %255 = vmatpush.msra.mxu2 %v156_v33  ;;  %v1945_v41 = vld [vmem:[%s2172_s3] ss:$0 sm:$0xff]  ;;  %v377_v2 = vld [vmem:[%s2904_s25 + $0x8] sm:$0xff]  ;;  %s2906_s3 = sld [smem:[#allocation20_spill]] }
  0x50   :  { %1843 = vmatmul.msk.f32.gmra.mxu3 %vm164_vm0, %v2311_v8  ;;  %334 = vmatpush.msrb.mxu0 %v266_v15  ;;  %v1946_v45 = vld [vmem:[%s2202_s6] ss:$0 sm:$0xff]  ;;  %v381_v15 = vld [vmem:[%s2903_s21 + $0x8] sm:$0xff]  ;;  %s2913_s6 = sld [smem:[#allocation21_spill]] }
  0x51   :  { %368 = vmatpush.msrb.mxu3 %v271_v37  ;;  %442 = vmatpush.msrb.mxu2 %v385_v38  ;;  %v526_v56 = vld [vmem:[%s2900_s5] sm:$0xff]  ;;  %s2866_s5 = sld [smem:[#allocation2]] }
  0x52   :  { %v524_v57 = vld [vmem:[%s2899_s0] sm:$0xff]  ;;  %479 = vmatpush.msra.mxu0 %v391_v3 }
  0x53   :  { %443 = vmatpush.msrb.mxu2 %v384_v40  ;;  %v1947_v58 = vld [vmem:[%s2901_s9] ss:$0 sm:$0xff] }
  0x54   :  { %v1948_v61 = vld [vmem:[%s2902_s13] ss:$0 sm:$0xff]  ;;  %s2128_s13 = smov [#allocation5]  }
  0x55   :  { %v380_v63 = vld [vmem:[%s2903_s21] sm:$0xff]  ;;  %v530_v31 = vld [vmem:[%s2906_s3 + $0x10] sm:$0xff]  ;;  %v529_v32 = vld [vmem:[%s2906_s3 + $0x8] sm:$0xff]  ;;  %s1793_s21 = sshll.u32 %s2128_s13, 4  ;;  %s1794_s21 = int_to_ptr.vmem [resolvable:$true] %s1793_s21 }
  0x56   :  { %v376_v6 = vld [vmem:[%s2904_s25] sm:$0xff]  ;;  %s1795_s25 = sshll.u32 %s2290_s17, 4  ;;  %s1796_s25 = int_to_ptr.hbm [resolvable:$true] %s1795_s25 }
  0x57   :  { %v528_v34 = vld [vmem:[%s2906_s3] sm:$0xff] }
  0x58   :  { %v1949_v35 = vld [vmem:[%s2907_s8] ss:$0 sm:$0xff]  ;;  %s2083_s8 = scalar_lea.hbm %s2290_s17, 1 }
  0xc4   :  { %v188_v18 = vpop.f32.mrf.mxu0 }
  0xc5   :  { %v189_v19 = vadd.f32 %v1943_v17, %v188_v18 }
  0xc7   :  { %v194_v20 = vmax.f32 %v189_v19, 0.0 }
  0xc9   :  { %1838 = vmatmul.msk.f32.vlgmr.msra.gmra.mxu1 %vm199_vm1, %v194_v20 }
  0xca   :  { %559 = vmatpush.msra.mxu1 %v526_v56 }
  0xcb   :  { %v302_v22 = vpop.f32.mrf.mxu3 }
  0xcc   :  { %v303_v23 = vadd.f32 %v1944_v21, %v302_v22  ;;  %v191_v24 = vpop.f32.mrf.mxu0 }
  0xcd   :  { %v192_v26 = vadd.f32 %v1943_v17, %v191_v24 }
  0xce   :  { %v308_v25 = vmax.f32 %v303_v23, 0.0 }
  0xcf   :  { %v195_v27 = vmax.f32 %v192_v26, 0.0 }
  0xd0   :  { %1844 = vmatmul.msk.f32.vlgmr.msrb.gmra.mxu0 %vm199_vm1, %v308_v25 }
  0xd1   :  { %1839 = vmatmul.msk.f32.gmra.mxu1 %vm199_vm1, %v195_v27  ;;  %v390_v27 = vld [vmem:[%s2905_s29 + $0x10] sm:$0xff] }
  0xd2   :  { %480 = vmatpush.msra.mxu0 %v390_v27 }
  0xd3   :  { %v305_v28 = vpop.f32.mrf.mxu3 }
  0xd4   :  { %v306_v29 = vadd.f32 %v1944_v21, %v305_v28  ;;  %v389_v28 = vld [vmem:[%s2905_s29 + $0x8] sm:$0xff] }
  0xd5   :  { %481 = vmatpush.msra.mxu0 %v389_v28 }
  0xd6   :  { %v309_v30 = vmax.f32 %v306_v29, 0.0  ;;  %v388_v29 = vld [vmem:[%s2905_s29] sm:$0xff]  ;;  %s2079_s29 = sshra.s32 %s1796_s25, 4  ;;  %s2080_s29 = int_to_ptr.hbm [resolvable:$true] %s2079_s29 }
  0xd7   :  { %482 = vmatpush.msra.mxu0 %v388_v29  ;;  %p2084_p6 = scmp.lt.s32.totalorder %s2080_s29, %s2290_s17 }
  0xd8   :  { %1845 = vmatmul.msk.f32.gmra.mxu0 %vm199_vm1, %v309_v30  ;;  %v531_v30 = vld [vmem:[%s2906_s3 + $0x18] sm:$0xff]  ;;  %s2081_s3 = scalar_lea.hbm %s2080_s29, 1 }
  0xd9   :  { %618 = vmatpush.msrb.mxu0 %v531_v30  ;;  %p2082_p5 = scmp.ne.s32.totalorder %s2080_s29, %s2081_s3  ;;  %p2085_p7 = scmp.lt.s32.totalorder %s2083_s8, %s2081_s3 }
  0xdb   :  { %619 = vmatpush.msrb.mxu0 %v530_v31  ;;  %p2086_p8 = por %p2085_p7, %p2084_p6 }
  0xdd   :  { %620 = vmatpush.msrb.mxu0 %v529_v32  ;;  %p2087_p9 = pnand %p2086_p8, %p2082_p5 }
  0xdf   :  { %621 = vmatpush.msrb.mxu0 %v528_v34  ;;  %v396_v34 = vld [vmem:[%s2909_s24 + $0x18] sm:$0xff] }
  0xe0   :  { %513 = vmatpush.msra.mxu3 %v396_v34 }
 0x146   :  { %v223_v42 = vpop.f32.mrf.mxu1 }
 0x147   :  { %v224_v43 = vadd.f32 %v1945_v41, %v223_v42 }
 0x149   :  { %v229_v44 = vmax.f32 %v224_v43, 0.0 }
 0x14b   :  { %1840 = vmatmul.msk.f32.vlgmr.msra.gmra.mxu2 %vm199_vm1, %v229_v44 }
 0x14c   :  { %581 = vmatpush.msra.mxu2 %v525_v55 }
 0x14d   :  { %v336_v46 = vpop.f32.mrf.mxu0 }
 0x14e   :  { %v337_v47 = vadd.f32 %v1946_v45, %v336_v46  ;;  %v226_v48 = vpop.f32.mrf.mxu1  ;;  %582 = vmatpush.msra.mxu2 %v524_v57 }
 0x14f   :  { %v227_v50 = vadd.f32 %v1945_v41, %v226_v48 }
 0x150   :  { %v342_v49 = vmax.f32 %v337_v47, 0.0 }
 0x151   :  { %v230_v51 = vmax.f32 %v227_v50, 0.0 }
 0x152   :  { %1846 = vmatmul.msk.f32.vlgmr.msrb.gmra.mxu3 %vm199_vm1, %v342_v49 }
 0x153   :  { %1841 = vmatmul.msk.f32.gmra.mxu2 %vm199_vm1, %v230_v51 }
 0x155   :  { %v339_v52 = vpop.f32.mrf.mxu0 }
 0x156   :  { %v340_v53 = vadd.f32 %v1946_v45, %v339_v52 }
 0x158   :  { %v343_v54 = vmax.f32 %v340_v53, 0.0 }
 0x15a   :  { %1847 = vmatmul.msk.f32.gmra.mxu3 %vm199_vm1, %v343_v54 }
 0x15b   :  { %1850 = vmatmul.msk.f32.vlgmr.msrb.gmra.mxu2 %vm164_vm0, %v2297_v4 }
 0x163   :  { %1851 = vmatmul.msk.f32.gmra.mxu2 %vm164_vm0, %v2308_v7 }
 0x16b   :  { %1858 = vmatmul.msk.f32.vlgmr.msra.gmra.mxu2 %vm164_vm0, %v2300_v5 }
 0x173   :  { %1859 = vmatmul.msk.f32.gmra.mxu2 %vm164_vm0, %v2311_v8 }
 0x1ce   :  { %v257_v59 = vpop.f32.mrf.mxu2 }
 0x1cf   :  { %v2359_v60 = vadd.f32 %v1947_v58, %v257_v59 }
 0x1d1   :  { %1848 = vmatmul.msk.f32.vlgmr.msrb.gmra.mxu1 %vm398_vm2, %v2359_v60  ;;  %v2389_v13 = vadd.f32 %v376_v6, %v2359_v60  ;;  %v1018_v25 = vmul.f32 %v2359_v60, %v2359_v60 }
 0x1d3   :  { %v663_v18 = vmul.f32 %v2389_v13, %v2389_v13  ;;  %v1019_v26 = vsel %vm398_vm2, %v1018_v25, 0.0 }
 0x1d5   :  { %v370_v62 = vpop.f32.mrf.mxu3  ;;  %v664_v21 = vsel %vm398_vm2, %v663_v18, 0.0 }
 0x1d6   :  { %v2365_v0 = vadd.f32 %v1948_v61, %v370_v62  ;;  %v260_v1 = vpop.f32.mrf.mxu2  ;;  %v1950_v62 = vld [vmem:[%s2908_s19] ss:$0 sm:$0xff] }
 0x1d7   :  { %v2369_v4 = vadd.f32 %v1947_v58, %v260_v1 }
 0x1d8   :  { %v2372_v5 = vadd.f32 %v380_v63, %v2365_v0 }
 0x1d9   :  { %1849 = vmatmul.msk.f32.gmra.mxu1 %vm398_vm2, %v2369_v4  ;;  %v1055_v8 = vmul.f32 %v2369_v4, %v2369_v4  ;;  %v2382_v9 = vadd.f32 %v377_v2, %v2369_v4 }
 0x1da   :  { %v695_v7 = vmul.f32 %v2372_v5, %v2372_v5 }
 0x1db   :  { %v1056_v11 = vsel %vm398_vm2, %v1055_v8, 0.0  ;;  %v840_v12 = vmul.f32 %v2382_v9, %v2382_v9 }
 0x1dc   :  { %v696_v10 = vsel %vm398_vm2, %v695_v7, 0.0  ;;  %1057 = vadd.xlane.f32.xlu2 %v1056_v11 }
 0x1dd   :  { %697 = vadd.xlane.f32.xlu1 %v696_v10  ;;  %v373_v14 = vpop.f32.mrf.mxu3  ;;  %v841_v17 = vsel %vm398_vm2, %v840_v12, 0.0 }
 0x1de   :  { %v2392_v16 = vadd.f32 %v1948_v61, %v373_v14  ;;  %842 = vadd.xlane.f32.xlu0 %v841_v17  ;;  %v445_v33 = vpop.f32.mrf.mxu2 }
 0x1e0   :  { %v2398_v19 = vadd.f32 %v381_v15, %v2392_v16  ;;  %v1266_v23 = vmul.f32 %v2392_v16, %v2392_v16 }
 0x1e1   :  { %1856 = vmatmul.msk.f32.vlgmr.msra.gmra.mxu1 %vm398_vm2, %v2365_v0 }
 0x1e2   :  { %v872_v20 = vmul.f32 %v2398_v19, %v2398_v19  ;;  %v1267_v24 = vsel %vm398_vm2, %v1266_v23, 0.0 }
 0x1e4   :  { %v873_v22 = vsel %vm398_vm2, %v872_v20, 0.0 }
 0x1e5   :  { %665 = vadd.xlane.f32.xlu1 %v664_v21 }
 0x1e6   :  { %874 = vadd.xlane.f32.xlu0 %v873_v22  ;;  %v448_v41 = vpop.f32.mrf.mxu2 }
 0x1e9   :  { %1857 = vmatmul.msk.f32.gmra.mxu1 %vm398_vm2, %v2392_v16 }
 0x1ee   :  { %1268 = vadd.xlane.f32.xlu0 %v1267_v24  ;;  %v584_v56 = vpop.f32.mrf.mxu2 }
 0x1f6   :  { %1020 = vadd.xlane.f32.xlu0 %v1019_v26  ;;  %v587_v28 = vpop.f32.mrf.mxu2 }
 0x24e   :  { %v422_v36 = vpop.f32.mrf.mxu1 }
 0x24f   :  { %v446_v37 = vadd.f32 %v445_v33, %v422_v36 }
 0x250   :  { %v698_v38 = vpop.xlane.xlu1 %697 }
 0x251   :  { %1955 = vrsqrt.f32 %v698_v38  ;;  %v454_v39 = vadd.f32 %v1949_v35, %v446_v37  ;;  %v843_v40 = vpop.xlane.xlu0 %842  ;;  %vm706_vm3 = vcmp.eq.f32.partialorder %v698_v38, inf  ;;  %vm708_vm4 = vcmp.eq.f32.partialorder %v698_v38, 0.0 }
 0x252   :  { %1957 = vrsqrt.f32 %v843_v40  ;;  %v709_v12 = vand.u32 2147483648, %v698_v38  ;;  %vm851_vm5 = vcmp.eq.f32.partialorder %v843_v40, inf  ;;  %vm853_vm6 = vcmp.eq.f32.partialorder %v843_v40, 0.0 }
 0x253   :  { %v456_v42 = vmax.f32 %v454_v39, 0.0  ;;  %v854_v22 = vand.u32 2147483648, %v843_v40 }
 0x255   :  { %1852 = vmatmul.msk.f32.vlgmr.msra.gmra.mxu0 %vm199_vm1, %v456_v42 }
 0x256   :  { %v425_v44 = vpop.f32.mrf.mxu1 }
 0x257   :  { %v1956_v43 = vpop.eup %1955  ;;  %v449_v46 = vadd.f32 %v448_v41, %v425_v44 }
 0x258   :  { %v700_v45 = vmul.f32 %v1956_v43, %v698_v38  ;;  %v2423_v47 = vpop.xlane.xlu1 %665  ;;  %v1958_v48 = vpop.eup %1957 }
 0x259   :  { %1959 = vrsqrt.f32 %v2423_v47  ;;  %v845_v50 = vmul.f32 %v1958_v48, %v843_v40  ;;  %v455_v51 = vadd.f32 %v1949_v35, %v449_v46  ;;  %v2426_v52 = vpop.xlane.xlu0 %874  ;;  %vm674_vm7 = vcmp.eq.f32.partialorder %v2423_v47, inf }
 0x25a   :  { %v701_v49 = vmul.f32 %v1956_v43, %v700_v45  ;;  %1961 = vrsqrt.f32 %v2426_v52  ;;  %vm676_vm8 = vcmp.eq.f32.partialorder %v2423_v47, 0.0  ;;  %vm883_vm9 = vcmp.eq.f32.partialorder %v2426_v52, inf }
 0x25b   :  { %v846_v54 = vmul.f32 %v1958_v48, %v845_v50  ;;  %v457_v55 = vmax.f32 %v455_v51, 0.0  ;;  %vm885_vm10 = vcmp.eq.f32.partialorder %v2426_v52, 0.0 }
 0x25c   :  { %v702_v53 = vmul.f32 0.5, %v701_v49 }
 0x25d   :  { %v847_v58 = vmul.f32 0.5, %v846_v54  ;;  %1853 = vmatmul.msk.f32.gmra.mxu0 %vm199_vm1, %v457_v55 }
 0x25e   :  { %v703_v57 = vsub.f32 1.5, %v702_v53  ;;  %v561_v61 = vpop.f32.mrf.mxu1 }
 0x25f   :  { %v1960_v59 = vpop.eup %1959  ;;  %v848_v1 = vsub.f32 1.5, %v847_v58  ;;  %v585_v3 = vadd.f32 %v584_v56, %v561_v61 }
 0x260   :  { %v704_v63 = vmul.f32 %v1956_v43, %v703_v57  ;;  %v668_v2 = vmul.f32 %v1960_v59, %v2423_v47  ;;  %v1962_v6 = vpop.eup %1961  ;;  %v886_v43 = vand.u32 2147483648, %v2426_v52 }
 0x261   :  { %v849_v8 = vmul.f32 %v1958_v48, %v848_v1  ;;  %v877_v11 = vmul.f32 %v1962_v6, %v2426_v52  ;;  %v593_v14 = vadd.f32 %v1950_v62, %v585_v3 }
 0x262   :  { %v705_v7 = vmul.f32 %v704_v63, %v698_v38  ;;  %v669_v10 = vmul.f32 %v1960_v59, %v668_v2 }
 0x263   :  { %v850_v17 = vmul.f32 %v849_v8, %v843_v40  ;;  %v878_v20 = vmul.f32 %v1962_v6, %v877_v11  ;;  %v595_v23 = vmax.f32 %v593_v14, 0.0 }
 0x264   :  { %v707_v15 = vsel %vm706_vm3, %v698_v38, %v705_v7  ;;  %v670_v18 = vmul.f32 0.5, %v669_v10  ;;  %v677_v38 = vand.u32 2147483648, %v2423_v47 }
 0x265   :  { %v710_v21 = vsel %vm708_vm4, %v709_v12, %v707_v15  ;;  %v852_v25 = vsel %vm851_vm5, %v843_v40, %v850_v17  ;;  %v879_v27 = vmul.f32 0.5, %v878_v20  ;;  %1860 = vmatmul.msk.f32.vlgmr.msrb.gmra.mxu0 %vm199_vm1, %v595_v23 }
 0x266   :  { %v711_v24 = vmax.f32 %v710_v21, 1e-12  ;;  %v671_v26 = vsub.f32 1.5, %v670_v18  ;;  %v855_v29 = vsel %vm853_vm6, %v854_v22, %v852_v25  ;;  %v564_v30 = vpop.f32.mrf.mxu1 }
 0x267   :  { %v2434_v31 = vmax.f32 %v855_v29, 1e-12  ;;  %v880_v33 = vsub.f32 1.5, %v879_v27  ;;  %v588_v35 = vadd.f32 %v587_v28, %v564_v30 }
 0x268   :  { %1963 = vrcp.f32 %v711_v24  ;;  %v672_v32 = vmul.f32 %v1960_v59, %v671_v26  ;;  %v723_v55 = vand.u32 2147483648, %v711_v24  ;;  %v721_v57 = vand.u32 2147483647, %v711_v24 }
 0x269   :  { %1965 = vrcp.f32 %v2434_v31  ;;  %v881_v37 = vmul.f32 %v1962_v6, %v880_v33  ;;  %v594_v39 = vadd.f32 %v1950_v62, %v588_v35  ;;  %vm717_vm12 = vweird.f32 %v711_v24 }
 0x26a   :  { %v673_v36 = vmul.f32 %v672_v32, %v2423_v47  ;;  %vm722_vm14 = vcmp.eq.f32.partialorder %v721_v57, 8.507059e+37  ;;  %vm862_vm0 = vweird.f32 %v2434_v31  ;;  %v866_v12 = vand.u32 2147483647, %v2434_v31 }
 0x26b   :  { %v882_v41 = vmul.f32 %v881_v37, %v2426_v52  ;;  %v596_v44 = vmax.f32 %v594_v39, 0.0  ;;  %v868_v14 = vand.u32 2147483648, %v2434_v31  ;;  %v394_v39 = vld [vmem:[%s2909_s24 + $0x8] sm:$0xff] }
 0x26c   :  { %v675_v40 = vsel %vm674_vm7, %v2423_v47, %v673_v36 }
 0x26d   :  { %v678_v42 = vsel %vm676_vm8, %v677_v38, %v675_v40  ;;  %v884_v48 = vsel %vm883_vm9, %v2426_v52, %v882_v41  ;;  %1861 = vmatmul.msk.f32.gmra.mxu0 %vm199_vm1, %v596_v44  ;;  %v724_v52 = vor.u32 1.1754944e-38, %v723_v55  ;;  %v869_v26 = vor.u32 1.1754944e-38, %v868_v14  ;;  %v393_v40 = vld [vmem:[%s2909_s24] sm:$0xff]  ;;  %v536_v41 = vld [vmem:[%s2277_s20 + $0x18] sm:$0xff] }
 0x26e   :  { %v1964_v45 = vpop.eup %1963  ;;  %v679_v46 = vmax.f32 %v678_v42, 1e-12  ;;  %v887_v49 = vsel %vm885_vm10, %v886_v43, %v884_v48  ;;  %vm867_vm10 = vcmp.eq.f32.partialorder %v866_v12, 8.507059e+37  ;;  %v533_v42 = vld [vmem:[%s2277_s20] sm:$0xff] }
 0x26f   :  { %v713_v50 = vmul.f32 %v1964_v45, %v711_v24  ;;  %v1966_v51 = vpop.eup %1965  ;;  %v888_v47 = vmax.f32 %v887_v49, 1e-12  ;;  %vm718_vm11 = vweird.f32 %v1964_v45  ;;  %v1951_v43 = vld [vmem:[%s2912_s30] ss:$0 sm:$0xff] }
 0x270   :  { %1967 = vrcp.f32 %v679_v46  ;;  %v858_v54 = vmul.f32 %v1966_v51, %v2434_v31  ;;  %vm719_vm13 = vmor %vm717_vm12, %vm718_vm11  ;;  %vm863_vm15 = vweird.f32 %v1966_v51  ;;  %v691_v11 = vand.u32 2147483648, %v679_v46 }
 0x271   :  { %v714_v53 = vsub.f32 1.0, %v713_v50  ;;  %1969 = vrcp.f32 %v888_v47  ;;  %v689_v17 = vand.u32 2147483647, %v679_v46  ;;  %vm685_vm4 = vweird.f32 %v679_v46  ;;  %vm2456_vm5 = vmor %vm862_vm0, %vm863_vm15 }
 0x272   :  { %v859_v58 = vsub.f32 1.0, %v858_v54  ;;  %v898_v20 = vand.u32 2147483647, %v888_v47  ;;  %v900_v21 = vand.u32 2147483648, %v888_v47  ;;  %v692_v25 = vor.u32 1.1754944e-38, %v691_v11 }
 0x273   :  { %v715_v56 = vmul.f32 %v1964_v45, %v714_v53  ;;  %vm894_vm8 = vweird.f32 %v888_v47  ;;  %vm690_vm9 = vcmp.eq.f32.partialorder %v689_v17, 8.507059e+37  ;;  %v1954_v11 = vld [vmem:[%s2282_s14] ss:$0 sm:$0xff]  ;;  %s2836_s14 = sld [smem:[#allocation2 + $0x1]] }
 0x274   :  { %v860_v62 = vmul.f32 %v1966_v51, %v859_v58  ;;  %v901_v30 = vor.u32 1.1754944e-38, %v900_v21  ;;  %vm899_vm12 = vcmp.eq.f32.partialorder %v898_v20, 8.507059e+37 }
 0x275   :  { %v716_v59 = vadd.f32 %v1964_v45, %v715_v56 }
 0x276   :  { %v1968_v61 = vpop.eup %1967  ;;  %v861_v10 = vadd.f32 %v1966_v51, %v860_v62 }
 0x277   :  { %v720_v63 = vsel %vm719_vm13, %v1964_v45, %v716_v59  ;;  %v681_v1 = vmul.f32 %v1968_v61, %v679_v46  ;;  %v1970_v2 = vpop.eup %1969  ;;  %vm686_vm3 = vweird.f32 %v1968_v61 }
 0x278   :  { %v725_v3 = vsel %vm722_vm14, %v724_v52, %v720_v63  ;;  %v890_v8 = vmul.f32 %v1970_v2, %v888_v47  ;;  %vm895_vm6 = vweird.f32 %v1970_v2  ;;  %v865_v24 = vsel %vm2456_vm5, %v1966_v51, %v861_v10  ;;  %vm687_vm7 = vmor %vm685_vm4, %vm686_vm3  ;;  %v1952_v51 = vld [vmem:[%s2913_s6] ss:$0 sm:$0xff] }
 0x279   :  { %v728_v6 = vmul.f32 %v725_v3, %v2372_v5  ;;  %v682_v7 = vsub.f32 1.0, %v681_v1  ;;  %vm896_vm11 = vmor %vm894_vm8, %vm895_vm6  ;;  %v870_v31 = vsel %vm867_vm10, %v869_v26, %v865_v24  ;;  %v1953_v52 = vld [vmem:[%s2914_s12] ss:$0 sm:$0xff]  ;;  %s1745_s2 = sadd.f32 1.0, %s2836_s14 }
 0x27a   :  { %v891_v18 = vsub.f32 1.0, %v890_v8  ;;  %v904_v36 = vmul.f32 %v870_v31, %v2382_v9  ;;  %v535_v9 = vld [vmem:[%s2277_s20 + $0x10] sm:$0xff] }
 0x27b   :  { %1864 = vmatpush.xpose.msk.msrb.mxu1 %vm398_vm2, %v728_v6  ;;  %v683_v15 = vmul.f32 %v1968_v61, %v682_v7  ;;  %v2500_v7 = vpop.xlane.xlu0 %1268 }
 0x27c   :  { %v892_v23 = vmul.f32 %v1970_v2, %v891_v18 }
 0x27d   :  { %v684_v22 = vadd.f32 %v1968_v61, %v683_v15 }
 0x27e   :  { %v893_v28 = vadd.f32 %v1970_v2, %v892_v23 }
 0x27f   :  { %v688_v27 = vsel %vm687_vm7, %v1968_v61, %v684_v22 }
 0x280   :  { %v693_v29 = vsel %vm690_vm9, %v692_v25, %v688_v27  ;;  %v897_v33 = vsel %vm896_vm11, %v1970_v2, %v893_v28 }
 0x281   :  { %v727_v32 = vmul.f32 %v693_v29, %v2389_v13  ;;  %v902_v34 = vsel %vm899_vm12, %v901_v30, %v897_v33  ;;  %v395_v13 = vld [vmem:[%s2909_s24 + $0x10] sm:$0xff]  ;;  %v1229_v29 = vmul.f32 %v2365_v0, %v2365_v0  ;;  %v2533_v33 = vpop.xlane.xlu2 %1057 }
 0x282   :  { %v905_v35 = vmul.f32 %v902_v34, %v2398_v19  ;;  %514 = vmatpush.msra.mxu3 %v395_v13  ;;  %v534_v19 = vld [vmem:[%s2277_s20 + $0x8] sm:$0xff] }
 0x283   :  { %1865 = vmatmul.msk.f32.vlgmr.msrb.gmra.mxu1 %vm398_vm2, %v727_v32  ;;  %v2466_v37 = vmul.f32 %v728_v6, %v727_v32  ;;  %v2508_v15 = vpop.xlane.xlu0 %1020  ;;  %v1230_v30 = vsel %vm398_vm2, %v1229_v29, 0.0 }
 0x284   :  { %1866 = vmatpush.xpose.msk.msrb.mxu2 %vm398_vm2, %v905_v35  ;;  %v2469_v38 = vmul.f32 %v905_v35, %v904_v36  ;;  %515 = vmatpush.msra.mxu3 %v394_v39 }
 0x286   :  { %516 = vmatpush.msra.mxu3 %v393_v40 }
 0x287   :  { %1867 = vmatmul.msk.f32.vlgmr.msrb.gmra.mxu2 %vm398_vm2, %v904_v36 }
 0x288   :  { %652 = vmatpush.msrb.mxu3 %v536_v41 }
 0x28a   :  { %653 = vmatpush.msrb.mxu3 %v535_v9 }
 0x28c   :  { %654 = vmatpush.msrb.mxu3 %v534_v19 }
 0x28e   :  { %655 = vmatpush.msrb.mxu3 %v533_v42 }
 0x2d2   :  { %v484_v44 = vpop.f32.mrf.mxu0 }
 0x2d3   :  { %v485_v45 = vadd.f32 %v1951_v43, %v484_v44 }
 0x2d5   :  { %v490_v46 = vmax.f32 %v485_v45, 0.0 }
 0x2d7   :  { %1854 = vmatmul.msk.f32.vlgmr.msra.gmra.mxu3 %vm199_vm1, %v490_v46 }
 0x2da   :  { %v487_v48 = vpop.f32.mrf.mxu0 }
 0x2db   :  { %v488_v49 = vadd.f32 %v1951_v43, %v487_v48 }
 0x2dd   :  { %v491_v50 = vmax.f32 %v488_v49, 0.0 }
 0x2df   :  { %1855 = vmatmul.msk.f32.gmra.mxu3 %vm199_vm1, %v491_v50 }
 0x2e2   :  { %v623_v47 = vpop.f32.mrf.mxu0 }
 0x2e3   :  { %v624_v53 = vadd.f32 %v1952_v51, %v623_v47 }
 0x2e5   :  { %v629_v54 = vmax.f32 %v624_v53, 0.0 }
 0x2e7   :  { %1862 = vmatmul.msk.f32.vlgmr.msrb.gmra.mxu3 %vm199_vm1, %v629_v54 }
 0x2ea   :  { %v626_v55 = vpop.f32.mrf.mxu0 }
 0x2eb   :  { %v627_v56 = vadd.f32 %v1952_v51, %v626_v55 }
 0x2ed   :  { %v630_v57 = vmax.f32 %v627_v56, 0.0 }
 0x2ef   :  { %1863 = vmatmul.msk.f32.gmra.mxu3 %vm199_vm1, %v630_v57 }
 0x300   :  { %v752_v58 = vpop.f32.mrf.mxu1 }
 0x301   :  { %v2485_v59 = vmul.f32 14.285714, %v752_v58 }
 0x303   :  { %v2489_v61 = vsel %vm398_vm2, %v2485_v59, -inf }
 0x304   :  { %762 = vmax.xlane.f32.xlu0 %v2489_v61 }
 0x30a   :  { %v929_v20 = vpop.f32.mrf.mxu2 }
 0x30b   :  { %v2513_v5 = vmul.f32 14.285714, %v929_v20 }
 0x30d   :  { %v2526_v27 = vsel %vm398_vm2, %v2513_v5, -inf }
 0x35a   :  { %v518_v62 = vpop.f32.mrf.mxu3 }
 0x35b   :  { %v2493_v63 = vadd.f32 %v1953_v52, %v518_v62 }
 0x35d   :  { %v1014_v1 = vmul.f32 %v2493_v63, %v2493_v63 }
 0x35f   :  { %v1015_v2 = vsel %vm398_vm2, %v1014_v1, 0.0 }
 0x360   :  { %1016 = vadd.xlane.f32.xlu2 %v1015_v2 }
 0x362   :  { %v521_v3 = vpop.f32.mrf.mxu3 }
 0x363   :  { %v2498_v6 = vadd.f32 %v1953_v52, %v521_v3 }
 0x365   :  { %v1051_v8 = vmul.f32 %v2498_v6, %v2498_v6 }
 0x367   :  { %v1052_v10 = vsel %vm398_vm2, %v1051_v8, 0.0 }
 0x368   :  { %1053 = vadd.xlane.f32.xlu1 %v1052_v10 }
 0x36a   :  { %v657_v12 = vpop.f32.mrf.mxu3 }
 0x36b   :  { %v2506_v14 = vadd.f32 %v1954_v11, %v657_v12 }
 0x36d   :  { %v1225_v17 = vmul.f32 %v2506_v14, %v2506_v14 }
 0x36f   :  { %v1226_v18 = vsel %vm398_vm2, %v1225_v17, 0.0 }
 0x370   :  { %1227 = vadd.xlane.f32.xlu1 %v1226_v18 }
 0x372   :  { %v660_v21 = vpop.f32.mrf.mxu3 }
 0x373   :  { %v2515_v22 = vadd.f32 %v1954_v11, %v660_v21 }
 0x375   :  { %v1262_v24 = vmul.f32 %v2515_v22, %v2515_v22 }
 0x377   :  { %v2517_v23 = vpop.xlane.xlu0 %762  ;;  %v1263_v26 = vsel %vm398_vm2, %v1262_v24, 0.0 }
 0x378   :  { %v764_v25 = vsub.f32 %v2485_v59, %v2517_v23  ;;  %1264 = vadd.xlane.f32.xlu2 %v1263_v26  ;;  %939 = vmax.xlane.f32.xlu1 %v2526_v27 }
 0x37a   :  { %v765_v28 = vmul.f32 1.442695, %v764_v25 }
 0x37c   :  { %1971 = vpow2.f32 %v765_v28 }
 0x380   :  { %1231 = vadd.xlane.f32.xlu2 %v1230_v30 }
 0x382   :  { %v1972_v31 = vpop.eup %1971 }
 0x383   :  { %v767_v32 = vsel %vm398_vm2, %v1972_v31, 0.0 }
 0x384   :  { %768 = vadd.xlane.f32.xlu1 %v767_v32 }
 0x3d3   :  { %v2535_v34 = vpop.xlane.xlu2 %1016 }
 0x3d4   :  { %v1022_v35 = vadd.f32 %v2508_v15, %v2535_v34 }
 0x3d6   :  { %1973 = vrsqrt.f32 %v1022_v35  ;;  %vm1030_vm1 = vcmp.eq.f32.partialorder %v1022_v35, inf  ;;  %v1033_v48 = vand.u32 2147483648, %v1022_v35  ;;  %vm1032_vm13 = vcmp.eq.f32.partialorder %v1022_v35, 0.0 }
 0x3db   :  { %v2539_v36 = vpop.xlane.xlu1 %1053 }
 0x3dc   :  { %v1974_v13 = vpop.eup %1973  ;;  %v1059_v39 = vadd.f32 %v2533_v33, %v2539_v36 }
 0x3dd   :  { %v1024_v40 = vmul.f32 %v1974_v13, %v1022_v35 }
 0x3de   :  { %1975 = vrsqrt.f32 %v1059_v39  ;;  %vm1067_vm14 = vcmp.eq.f32.partialorder %v1059_v39, inf  ;;  %v1070_v58 = vand.u32 2147483648, %v1059_v39  ;;  %vm1069_vm15 = vcmp.eq.f32.partialorder %v1059_v39, 0.0 }
 0x3df   :  { %v1025_v41 = vmul.f32 %v1974_v13, %v1024_v40 }
 0x3e1   :  { %v1026_v9 = vmul.f32 0.5, %v1025_v41 }
 0x3e3   :  { %v1027_v19 = vsub.f32 1.5, %v1026_v9  ;;  %v2547_v62 = vpop.xlane.xlu1 %1227 }
 0x3e4   :  { %v1976_v42 = vpop.eup %1975 }
 0x3e5   :  { %v1061_v43 = vmul.f32 %v1976_v42, %v1059_v39  ;;  %v1028_v44 = vmul.f32 %v1974_v13, %v1027_v19 }
 0x3e7   :  { %v1062_v45 = vmul.f32 %v1976_v42, %v1061_v43  ;;  %v1029_v46 = vmul.f32 %v1028_v44, %v1022_v35 }
 0x3e9   :  { %v1063_v49 = vmul.f32 0.5, %v1062_v45  ;;  %v1031_v50 = vsel %vm1030_vm1, %v1022_v35, %v1029_v46 }
 0x3ea   :  { %v1034_v51 = vsel %vm1032_vm13, %v1033_v48, %v1031_v50 }
 0x3eb   :  { %v2543_v47 = vpop.xlane.xlu2 %1264  ;;  %v1064_v53 = vsub.f32 1.5, %v1063_v49  ;;  %v1035_v54 = vmax.f32 %v1034_v51, 1e-12 }
 0x3ec   :  { %v1270_v55 = vadd.f32 %v2500_v7, %v2543_v47 }
 0x3ed   :  { %v1065_v56 = vmul.f32 %v1976_v42, %v1064_v53  ;;  %v1047_v32 = vand.u32 2147483648, %v1035_v54  ;;  %vm1041_vm3 = vweird.f32 %v1035_v54  ;;  %v1045_v35 = vand.u32 2147483647, %v1035_v54 }
 0x3ee   :  { %1977 = vrsqrt.f32 %v1270_v55  ;;  %vm1278_vm5 = vcmp.eq.f32.partialorder %v1270_v55, inf  ;;  %v1281_v9 = vand.u32 2147483648, %v1270_v55  ;;  %vm1280_vm8 = vcmp.eq.f32.partialorder %v1270_v55, 0.0 }
 0x3ef   :  { %1979 = vrcp.f32 %v1035_v54  ;;  %v1066_v57 = vmul.f32 %v1065_v56, %v1059_v39  ;;  %v1048_v48 = vor.u32 1.1754944e-38, %v1047_v32  ;;  %vm1046_vm7 = vcmp.eq.f32.partialorder %v1045_v35, 8.507059e+37 }
 0x3f1   :  { %v1068_v52 = vsel %vm1067_vm14, %v1059_v39, %v1066_v57 }
 0x3f2   :  { %v1071_v2 = vsel %vm1069_vm15, %v1070_v58, %v1068_v52 }
 0x3f3   :  { %v2549_v1 = vpop.xlane.xlu2 %1231  ;;  %v1072_v11 = vmax.f32 %v1071_v2, 1e-12 }
 0x3f4   :  { %v1978_v3 = vpop.eup %1977  ;;  %v2553_v8 = vadd.f32 %v2549_v1, %v2547_v62 }
 0x3f5   :  { %v1980_v10 = vpop.eup %1979  ;;  %v1272_v17 = vmul.f32 %v1978_v3, %v1270_v55  ;;  %v1084_v19 = vand.u32 2147483648, %v1072_v11  ;;  %v1082_v46 = vand.u32 2147483647, %v1072_v11  ;;  %vm1078_vm9 = vweird.f32 %v1072_v11 }
 0x3f6   :  { %1981 = vrsqrt.f32 %v2553_v8  ;;  %v1037_v12 = vmul.f32 %v1980_v10, %v1035_v54  ;;  %vm1042_vm0 = vweird.f32 %v1980_v10  ;;  %vm1241_vm12 = vcmp.eq.f32.partialorder %v2553_v8, inf }
 0x3f7   :  { %1983 = vrcp.f32 %v1072_v11  ;;  %v1273_v20 = vmul.f32 %v1978_v3, %v1272_v17  ;;  %vm2557_vm4 = vmor %vm1041_vm3, %vm1042_vm0  ;;  %v1085_v56 = vor.u32 1.1754944e-38, %v1084_v19  ;;  %vm1083_vm11 = vcmp.eq.f32.partialorder %v1082_v46, 8.507059e+37 }
 0x3f8   :  { %v1038_v18 = vsub.f32 1.0, %v1037_v12  ;;  %v1244_v17 = vand.u32 2147483648, %v2553_v8  ;;  %vm1243_vm1 = vcmp.eq.f32.partialorder %v2553_v8, 0.0 }
 0x3f9   :  { %v1274_v24 = vmul.f32 0.5, %v1273_v20 }
 0x3fa   :  { %v1039_v21 = vmul.f32 %v1980_v10, %v1038_v18 }
 0x3fb   :  { %v1275_v26 = vsub.f32 1.5, %v1274_v24 }
 0x3fc   :  { %v1982_v25 = vpop.eup %1981  ;;  %v1040_v30 = vadd.f32 %v1980_v10, %v1039_v21 }
 0x3fd   :  { %v1235_v28 = vmul.f32 %v1982_v25, %v2553_v8  ;;  %v1984_v29 = vpop.eup %1983  ;;  %v1276_v13 = vmul.f32 %v1978_v3, %v1275_v26 }
 0x3fe   :  { %v1074_v31 = vmul.f32 %v1984_v29, %v1072_v11  ;;  %v1044_v42 = vsel %vm2557_vm4, %v1980_v10, %v1040_v30  ;;  %vm1079_vm6 = vweird.f32 %v1984_v29 }
 0x3ff   :  { %v1236_v39 = vmul.f32 %v1982_v25, %v1235_v28  ;;  %v1277_v43 = vmul.f32 %v1276_v13, %v1270_v55  ;;  %v1049_v53 = vsel %vm1046_vm7, %v1048_v48, %v1044_v42  ;;  %vm1080_vm10 = vmor %vm1078_vm9, %vm1079_vm6  ;;  %vm1444_vm7 = vcmp.eq.f32.partialorder %v2535_v34, inf }
 0x400   :  { %v1075_v40 = vsub.f32 1.0, %v1074_v31  ;;  %v1094_v3 = vmul.f32 %v1049_v53, %v2359_v60  ;;  %vm1446_vm9 = vcmp.eq.f32.partialorder %v2535_v34, 0.0 }
 0x401   :  { %v1237_v44 = vmul.f32 0.5, %v1236_v39  ;;  %v1279_v49 = vsel %vm1278_vm5, %v1270_v55, %v1277_v43  ;;  %v1088_v55 = vmul.f32 %v1049_v53, %v2493_v63 }
 0x402   :  { %v1076_v45 = vmul.f32 %v1984_v29, %v1075_v40  ;;  %v1282_v54 = vsel %vm1280_vm8, %v1281_v9, %v1279_v49  ;;  %vm1473_vm8 = vcmp.eq.f32.partialorder %v2508_v15, inf }
 0x403   :  { %v1238_v50 = vsub.f32 1.5, %v1237_v44  ;;  %v1283_v57 = vmax.f32 %v1282_v54, 1e-12 }
 0x404   :  { %v1077_v51 = vadd.f32 %v1984_v29, %v1076_v45 }
 0x405   :  { %v1239_v58 = vmul.f32 %v1982_v25, %v1238_v50  ;;  %1985 = vrcp.f32 %v1283_v57  ;;  %v1295_v31 = vand.u32 2147483648, %v1283_v57  ;;  %v1293_v35 = vand.u32 2147483647, %v1283_v57 }
 0x406   :  { %v1081_v52 = vsel %vm1080_vm10, %v1984_v29, %v1077_v51  ;;  %vm1289_vm14 = vweird.f32 %v1283_v57  ;;  %vm1475_vm10 = vcmp.eq.f32.partialorder %v2508_v15, 0.0 }
 0x407   :  { %v1086_v2 = vsel %vm1083_vm11, %v1085_v56, %v1081_v52  ;;  %v1240_v11 = vmul.f32 %v1239_v58, %v2553_v8  ;;  %v1296_v39 = vor.u32 1.1754944e-38, %v1295_v31  ;;  %vm1294_vm0 = vcmp.eq.f32.partialorder %v1293_v35, 8.507059e+37 }
 0x408   :  { %v1095_v10 = vmul.f32 %v1086_v2, %v2369_v4  ;;  %v1089_v12 = vmul.f32 %v1086_v2, %v2498_v6  ;;  %vm1700_vm11 = vcmp.eq.f32.partialorder %v2500_v7, inf }
 0x409   :  { %v1242_v20 = vsel %vm1241_vm12, %v2553_v8, %v1240_v11  ;;  %vm1702_vm12 = vcmp.eq.f32.partialorder %v2500_v7, 0.0 }
 0x40a   :  { %1868 = vmatpush.xpose.msk.msra.mxu1 %vm398_vm2, %v1095_v10  ;;  %1870 = vmatpush.xpose.msk.msra.mxu2 %vm398_vm2, %v1089_v12  ;;  %v1090_v18 = vmul.f32 %v1089_v12, %v1088_v55  ;;  %v2574_v21 = vmul.f32 %v1095_v10, %v1094_v3  ;;  %v1245_v24 = vsel %vm1243_vm1, %v1244_v17, %v1242_v20  ;;  %v773_v12 = vrot.slane %v2489_v61, 4 }
 0x40b   :  { %v1246_v26 = vmax.f32 %v1245_v24, 1e-12  ;;  %v1986_v28 = vpop.eup %1985  ;;  %vm1671_vm1 = vcmp.eq.f32.partialorder %v2543_v47, inf }
 0x40c   :  { %v1091_v25 = vsel %vm398_vm2, %v1090_v18, 0.0  ;;  %v1285_v29 = vmul.f32 %v1986_v28, %v1283_v57  ;;  %vm1290_vm13 = vweird.f32 %v1986_v28  ;;  %v774_v20 = vmax.f32 %v2489_v61, %v773_v12 }
 0x40d   :  { %1869 = vmatmul.msk.f32.vlgmr.msra.gmra.mxu1 %vm398_vm2, %v1094_v3  ;;  %1871 = vmatmul.msk.f32.vlgmr.msra.gmra.mxu2 %vm398_vm2, %v1088_v55  ;;  %1987 = vrcp.f32 %v1246_v26  ;;  %vm1291_vm15 = vmor %vm1289_vm14, %vm1290_vm13  ;;  %v1258_v44 = vand.u32 2147483648, %v1246_v26  ;;  %v1256_v46 = vand.u32 2147483647, %v1246_v26  ;;  %vm1252_vm4 = vweird.f32 %v1246_v26 }
 0x40e   :  { %1092 = vadd.xlane.f32.xlu1 %v1091_v25  ;;  %v1286_v30 = vsub.f32 1.0, %v1285_v29  ;;  %1989 = vrsqrt.f32 %v2535_v34  ;;  %v775_v29 = vrot.slane %v774_v20, 2  ;;  %vm1673_vm13 = vcmp.eq.f32.partialorder %v2543_v47, 0.0 }
 0x40f   :  { %v1259_v49 = vor.u32 1.1754944e-38, %v1258_v44  ;;  %vm1257_vm6 = vcmp.eq.f32.partialorder %v1256_v46, 8.507059e+37  ;;  %1991 = vrsqrt.f32 %v2508_v15 }
 0x410   :  { %v1287_v32 = vmul.f32 %v1986_v28, %v1286_v30  ;;  %1993 = vrsqrt.f32 %v2500_v7 }
 0x411   :  { %1995 = vrsqrt.f32 %v2543_v47 }
 0x412   :  { %v1288_v13 = vadd.f32 %v1986_v28, %v1287_v32  ;;  %v950_v32 = vrot.slane %v2526_v27, 4 }
 0x413   :  { %v1988_v8 = vpop.eup %1987 }
 0x414   :  { %v1248_v40 = vmul.f32 %v1988_v8, %v1246_v26  ;;  %v1292_v41 = vsel %vm1291_vm15, %v1986_v28, %v1288_v13  ;;  %vm1253_vm3 = vweird.f32 %v1988_v8  ;;  %v1990_v58 = vpop.eup %1989  ;;  %v776_v13 = vmax.f32 %v774_v20, %v775_v29 }
 0x415   :  { %v1297_v9 = vsel %vm1294_vm0, %v1296_v39, %v1292_v41  ;;  %vm1254_vm5 = vmor %vm1252_vm4, %vm1253_vm3  ;;  %v1992_v52 = vpop.eup %1991  ;;  %v1438_v2 = vmul.f32 %v1990_v58, %v2535_v34  ;;  %v951_v41 = vmax.f32 %v2526_v27, %v950_v32 }
 0x416   :  { %v1249_v19 = vsub.f32 1.0, %v1248_v40  ;;  %v1306_v42 = vmul.f32 %v1297_v9, %v2392_v16  ;;  %v1300_v43 = vmul.f32 %v1297_v9, %v2515_v22  ;;  %v1467_v3 = vmul.f32 %v1992_v52, %v2508_v15  ;;  %v1994_v10 = vpop.eup %1993 }
 0x417   :  { %v1439_v55 = vmul.f32 %v1990_v58, %v1438_v2  ;;  %v1996_v17 = vpop.eup %1995  ;;  %v1694_v18 = vmul.f32 %v1994_v10, %v2500_v7  ;;  %v952_v44 = vrot.slane %v951_v41, 2 }
 0x418   :  { %v1250_v45 = vmul.f32 %v1988_v8, %v1249_v19  ;;  %1872 = vmatpush.xpose.msk.msra.mxu0 %vm398_vm2, %v1306_v42  ;;  %1874 = vmatpush.xpose.msk.msra.mxu3 %vm398_vm2, %v1300_v43  ;;  %v1468_v11 = vmul.f32 %v1992_v52, %v1467_v3  ;;  %v1665_v26 = vmul.f32 %v1996_v17, %v2543_v47 }
 0x419   :  { %v1440_v24 = vmul.f32 0.5, %v1439_v55  ;;  %v1695_v28 = vmul.f32 %v1994_v10, %v1694_v18 }
 0x41a   :  { %v1251_v48 = vadd.f32 %v1988_v8, %v1250_v45  ;;  %v1469_v25 = vmul.f32 0.5, %v1468_v11  ;;  %v1666_v35 = vmul.f32 %v1996_v17, %v1665_v26  ;;  %v2621_v11 = vpop.xlane.xlu1 %939  ;;  %v1674_v26 = vand.u32 2147483648, %v2543_v47 }
 0x41b   :  { %v1441_v30 = vsub.f32 1.5, %v1440_v24  ;;  %v941_v20 = vsub.f32 %v2513_v5, %v2621_v11 }
 0x41c   :  { %v1255_v50 = vsel %vm1254_vm5, %v1988_v8, %v1251_v48  ;;  %v1470_v31 = vsub.f32 1.5, %v1469_v25  ;;  %v1696_v8 = vmul.f32 0.5, %v1695_v28  ;;  %v1667_v9 = vmul.f32 0.5, %v1666_v35 }
 0x41d   :  { %v1260_v51 = vsel %vm1257_vm6, %v1259_v49, %v1255_v50  ;;  %v1442_v39 = vmul.f32 %v1990_v58, %v1441_v30  ;;  %v953_v50 = vmax.f32 %v951_v41, %v952_v44  ;;  %v1476_v58 = vand.u32 2147483648, %v2508_v15 }
 0x41e   :  { %v1305_v53 = vmul.f32 %v1260_v51, %v2365_v0  ;;  %v1299_v54 = vmul.f32 %v1260_v51, %v2506_v14  ;;  %v1471_v40 = vmul.f32 %v1992_v52, %v1470_v31  ;;  %v1697_v19 = vsub.f32 1.5, %v1696_v8 }
 0x41f   :  { %v1443_v61 = vmul.f32 %v1442_v39, %v2535_v34  ;;  %v1668_v45 = vsub.f32 1.5, %v1667_v9  ;;  %v1447_v51 = vand.u32 2147483648, %v2535_v34  ;;  %v954_v12 = vrot.slane %v953_v50, 1 }
 0x420   :  { %1873 = vmatmul.msk.f32.vlgmr.msra.gmra.mxu0 %vm398_vm2, %v1305_v53  ;;  %1875 = vmatmul.msk.f32.vlgmr.msra.gmra.mxu3 %vm398_vm2, %v1299_v54  ;;  %v2587_v56 = vmul.f32 %v1300_v43, %v1299_v54  ;;  %v2589_v57 = vmul.f32 %v1306_v42, %v1305_v53  ;;  %v777_v42 = vrot.slane %v776_v13, 1  ;;  %v1472_v43 = vmul.f32 %v1471_v40, %v2508_v15 }
 0x421   :  { %v1698_v46 = vmul.f32 %v1994_v10, %v1697_v19  ;;  %v1445_v48 = vsel %vm1444_vm7, %v2535_v34, %v1443_v61  ;;  %v1669_v53 = vmul.f32 %v1996_v17, %v1668_v45  ;;  %v1703_v34 = vand.u32 2147483648, %v2500_v7 }
 0x422   :  { %v2608_v49 = vmax.f32 %v776_v13, %v777_v42  ;;  %v1474_v27 = vsel %vm1473_vm8, %v2508_v15, %v1472_v43  ;;  %v1448_v52 = vsel %vm1446_vm9, %v1447_v51, %v1445_v48  ;;  %v2633_v25 = vmax.f32 %v953_v50, %v954_v12 }
 0x423   :  { %v1699_v54 = vmul.f32 %v1698_v46, %v2500_v7  ;;  %v1477_v2 = vsel %vm1475_vm10, %v1476_v58, %v1474_v27  ;;  %v1670_v10 = vmul.f32 %v1669_v53, %v2543_v47  ;;  %v2623_v17 = vmax.f32 %v1448_v52, 1e-12 }
 0x424   :  { %v779_v3 = vsub.f32 %v2485_v59, %v2608_v49  ;;  %v2626_v18 = vmax.f32 %v1477_v2, 1e-12  ;;  %v942_v29 = vmul.f32 1.442695, %v941_v20  ;;  %v956_v32 = vsub.f32 %v2513_v5, %v2633_v25 }
 0x425   :  { %v1701_v55 = vsel %vm1700_vm11, %v2500_v7, %v1699_v54  ;;  %v1672_v15 = vsel %vm1671_vm1, %v2543_v47, %v1670_v10  ;;  %1997 = vrcp.f32 %v2623_v17  ;;  %vm1455_vm0 = vweird.f32 %v2623_v17 }
 0x426   :  { %v780_v59 = vmul.f32 1.442695, %v779_v3  ;;  %v1704_v24 = vsel %vm1702_vm12, %v1703_v34, %v1701_v55  ;;  %1999 = vrcp.f32 %v2626_v18  ;;  %v1675_v7 = vsel %vm1673_vm13, %v1674_v26, %v1672_v15 }
 0x427   :  { %v2639_v28 = vmax.f32 %v1704_v24, 1e-12  ;;  %v2643_v8 = vmax.f32 %v1675_v7, 1e-12  ;;  %v957_v40 = vmul.f32 1.442695, %v956_v32  ;;  %vm1484_vm4 = vweird.f32 %v2626_v18 }
 0x428   :  { %2001 = vpow2.f32 %v780_v59  ;;  %v1461_v26 = vand.u32 2147483648, %v2623_v17 }
 0x429   :  { %2003 = vrcp.f32 %v2639_v28  ;;  %vm1711_vm7 = vweird.f32 %v2639_v28  ;;  %vm1682_vm11 = vweird.f32 %v2643_v8 }
 0x42a   :  { %2005 = vpow2.f32 %v942_v29 }
 0x42b   :  { %v2645_v13 = vpop.eup %1997  ;;  %2007 = vrcp.f32 %v2643_v8 }
 0x42c   :  { %v2650_v47 = vpop.eup %1999  ;;  %v1451_v5 = vmul.f32 %v2645_v13, %v2623_v17  ;;  %2009 = vpow2.f32 %v957_v40  ;;  %vm1456_vm14 = vweird.f32 %v2645_v13 }
 0x42d   :  { %v1480_v61 = vmul.f32 %v2650_v47, %v2626_v18  ;;  %vm1485_vm15 = vweird.f32 %v2650_v47  ;;  %vm2687_vm3 = vmor %vm1455_vm0, %vm1456_vm14  ;;  %vm1548_vm0 = vcmp.eq.f32.partialorder %v2549_v1, inf }
 0x42e   :  { %v2002_v41 = vpop.eup %2001  ;;  %v1452_v48 = vsub.f32 1.0, %v1451_v5  ;;  %vm2702_vm5 = vmor %vm1484_vm4, %vm1485_vm15  ;;  %vm824_vm15 = vcmask 57344   ;;  %vm1550_vm4 = vcmp.eq.f32.partialorder %v2549_v1, 0.0 }
 0x42f   :  { %v782_v43 = vsel %vm398_vm2, %v2002_v41, 0.0  ;;  %v2660_v44 = vpop.eup %2003  ;;  %v1481_v27 = vsub.f32 1.0, %v1480_v61  ;;  %v1490_v61 = vand.u32 2147483648, %v2626_v18 }
 0x430   :  { %v2006_v45 = vpop.eup %2005  ;;  %v783_v50 = vrot.slane %v782_v43, 4  ;;  %v1707_v58 = vmul.f32 %v2660_v44, %v2639_v28  ;;  %v1453_v2 = vmul.f32 %v2645_v13, %v1452_v48  ;;  %vm1712_vm9 = vweird.f32 %v2660_v44 }
 0x431   :  { %v2662_v51 = vpop.eup %2007  ;;  %v944_v54 = vsel %vm398_vm2, %v2006_v45, 0.0  ;;  %v1482_v10 = vmul.f32 %v2650_v47, %v1481_v27  ;;  %v1462_v45 = vor.u32 1.1754944e-38, %v1461_v26  ;;  %v1686_v26 = vand.u32 2147483647, %v2643_v8  ;;  %vm2726_vm12 = vmor %vm1711_vm7, %vm1712_vm9 }
 0x432   :  { %v2010_v52 = vpop.eup %2009  ;;  %v1678_v12 = vmul.f32 %v2662_v51, %v2643_v8  ;;  %v784_v55 = vadd.f32 %v783_v50, %v782_v43  ;;  %v1708_v59 = vsub.f32 1.0, %v1707_v58  ;;  %v1454_v20 = vadd.f32 %v2645_v13, %v1453_v2 }
 0x433   :  { %v959_v15 = vsel %vm398_vm2, %v2010_v52, 0.0  ;;  %v1483_v7 = vadd.f32 %v2650_v47, %v1482_v10  ;;  %v1717_v58 = vand.u32 2147483648, %v2639_v28  ;;  %vm1683_vm10 = vweird.f32 %v2662_v51 }
 0x434   :  { %v1679_v29 = vsub.f32 1.0, %v1678_v12  ;;  %v960_v40 = vrot.slane %v959_v15, 4  ;;  %v1709_v43 = vmul.f32 %v2660_v44, %v1708_v59  ;;  %vm2731_vm1 = vmor %vm1682_vm11, %vm1683_vm10  ;;  %vm1687_vm13 = vcmp.eq.f32.partialorder %v1686_v26, 8.507059e+37 }
 0x435   :  { %vm1625_vm7 = vcmp.eq.f32.partialorder %v2533_v33, inf  ;;  %vm1627_vm9 = vcmp.eq.f32.partialorder %v2533_v33, 0.0 }
 0x436   :  { %v1680_v48 = vmul.f32 %v2662_v51, %v1679_v29  ;;  %v1710_v2 = vadd.f32 %v2660_v44, %v1709_v43 }
 0x48a   :  { %v1119_v30 = vpop.f32.mrf.mxu1 }
 0x490   :  { %v1149_v31 = vpop.f32.mrf.mxu2 }
 0x491   :  { %v1150_v35 = vadd.f32 %v1149_v31, %v1119_v30  ;;  %v785_v30 = vrot.slane %v784_v55, 2 }
 0x493   :  { %v2647_v39 = vmul.f32 14.285714, %v1150_v35  ;;  %v1459_v35 = vand.u32 2147483647, %v2623_v17  ;;  %v1458_v17 = vsel %vm2687_vm3, %v2645_v13, %v1454_v20  ;;  %v786_v27 = vadd.f32 %v785_v30, %v784_v55 }
 0x494   :  { %v961_v13 = vadd.f32 %v960_v40, %v959_v15  ;;  %v1688_v15 = vand.u32 2147483648, %v2643_v8  ;;  %vm1519_vm3 = vcmp.eq.f32.partialorder %v2547_v62, inf }
 0x495   :  { %v1155_v9 = vsel %vm398_vm2, %v2647_v39, -inf  ;;  %vm1460_vm6 = vcmp.eq.f32.partialorder %v1459_v35, 8.507059e+37  ;;  %v787_v10 = vrot.slane %v786_v27, 1  ;;  %v1714_v35 = vsel %vm2726_vm12, %v2660_v44, %v1710_v2 }
 0x496   :  { %1156 = vmax.xlane.f32.xlu2 %v1155_v9  ;;  %v1167_v19 = vrot.slane %v1155_v9, 4  ;;  %v962_v20 = vrot.slane %v961_v13, 2 }
 0x497   :  { %v788_v40 = vadd.f32 %v787_v10, %v786_v27 }
 0x498   :  { %v1168_v42 = vmax.f32 %v1155_v9, %v1167_v19  ;;  %v756_v19 = vsel %vm398_vm2, %v2466_v37, 0.0 }
 0x49a   :  { %v1169_v46 = vrot.slane %v1168_v42, 2 }
 0x49c   :  { %v1170_v53 = vmax.f32 %v1168_v42, %v1169_v46  ;;  %v1488_v42 = vand.u32 2147483647, %v2626_v18  ;;  %v1487_v18 = vsel %vm2702_vm5, %v2650_v47, %v1483_v7  ;;  %v1681_v47 = vadd.f32 %v2662_v51, %v1680_v48 }
 0x49d   :  { %v1330_v31 = vpop.f32.mrf.mxu0  ;;  %vm1521_vm5 = vcmp.eq.f32.partialorder %v2547_v62, 0.0 }
 0x49e   :  { %945 = vadd.xlane.f32.xlu2 %v944_v54  ;;  %v1171_v3 = vrot.slane %v1170_v53, 1  ;;  %v1491_v54 = vor.u32 1.1754944e-38, %v1490_v61  ;;  %vm1489_vm8 = vcmp.eq.f32.partialorder %v1488_v42, 8.507059e+37  ;;  %v1685_v8 = vsel %vm2731_vm1, %v2662_v51, %v1681_v47 }
 0x49f   :  { %v933_v61 = vsel %vm398_vm2, %v2469_v38, 0.0 }
 0x4a0   :  { %v2671_v34 = vmax.f32 %v1170_v53, %v1171_v3  ;;  %v1463_v53 = vsel %vm1460_vm6, %v1462_v45, %v1458_v17  ;;  %v1492_v3 = vsel %vm1489_vm8, %v1491_v54, %v1487_v18  ;;  %v1718_v17 = vor.u32 1.1754944e-38, %v1717_v58 }
 0x4a1   :  { %v1465_v59 = vmul.f32 %v1463_v53, %v2493_v63  ;;  %vm1596_vm6 = vcmp.eq.f32.partialorder %v2539_v36, inf  ;;  %vm1598_vm8 = vcmp.eq.f32.partialorder %v2539_v36, 0.0 }
 0x4a2   :  { %v1173_v24 = vsub.f32 %v2647_v39, %v2671_v34 }
 0x4a3   :  { %v1360_v32 = vpop.f32.mrf.mxu3 }
 0x4a4   :  { %v1174_v41 = vmul.f32 1.442695, %v1173_v24  ;;  %v1361_v9 = vadd.f32 %v1360_v32, %v1330_v31  ;;  %v1123_v24 = vsel %vm398_vm2, %v2574_v21, 0.0  ;;  %v1715_v21 = vand.u32 2147483647, %v2639_v28 }
 0x4a5   :  { %v1494_v32 = vmul.f32 %v1492_v3, %v2359_v60 }
 0x4a6   :  { %757 = vadd.xlane.f32.xlu2 %v756_v19  ;;  %2011 = vpow2.f32 %v1174_v41  ;;  %v2698_v37 = vmul.f32 14.285714, %v1361_v9  ;;  %v1689_v9 = vor.u32 1.1754944e-38, %v1688_v15  ;;  %v963_v19 = vadd.f32 %v962_v20, %v961_v13 }
 0x4a7   :  { %v1495_v28 = vmul.f32 %v1494_v32, %v1465_v59  ;;  %vm1716_vm14 = vcmp.eq.f32.partialorder %v1715_v21, 8.507059e+37  ;;  %2013 = vlog2.f32 %v788_v40 }
 0x4a8   :  { %v1366_v50 = vsel %vm398_vm2, %v2698_v37, -inf  ;;  %v1690_v60 = vsel %vm1687_vm13, %v1689_v9, %v1685_v8  ;;  %v1719_v51 = vsel %vm1716_vm14, %v1718_v17, %v1714_v35  ;;  %v964_v43 = vrot.slane %v963_v19, 1 }
 0x4a9   :  { %1367 = vmax.xlane.f32.xlu0 %v1366_v50  ;;  %v1378_v52 = vrot.slane %v1366_v50, 4  ;;  %v1496_v46 = vsel %vm398_vm2, %v1495_v28, 0.0  ;;  %v1692_v48 = vmul.f32 %v1690_v60, %v2515_v22  ;;  %v1721_v38 = vmul.f32 %v1719_v51, %v2392_v16 }
 0x4aa   :  { %v965_v18 = vadd.f32 %v964_v43, %v963_v19 }
 0x4ab   :  { %v1379_v55 = vmax.f32 %v1366_v50, %v1378_v52  ;;  %v1722_v53 = vmul.f32 %v1721_v38, %v1692_v48 }
 0x4ac   :  { %v2012_v12 = vpop.eup %2011 }
 0x4ad   :  { %v1176_v29 = vsel %vm398_vm2, %v2012_v12, 0.0  ;;  %v1380_v30 = vrot.slane %v1379_v55, 2  ;;  %v2014_v54 = vpop.eup %2013  ;;  %v1723_v52 = vsel %vm398_vm2, %v1722_v53, 0.0 }
 0x4ae   :  { %1124 = vadd.xlane.f32.xlu2 %v1123_v24  ;;  %v1177_v31 = vrot.slane %v1176_v29, 4  ;;  %v790_v2 = vmul.f32 0.6931472, %v2014_v54  ;;  %v1522_v54 = vand.u32 2147483648, %v2547_v62 }
 0x4af   :  { %v1381_v41 = vmax.f32 %v1379_v55, %v1380_v30 }
 0x4b0   :  { %v1178_v5 = vadd.f32 %v1177_v31, %v1176_v29  ;;  %v791_v22 = vadd.f32 %v790_v2, %v2608_v49 }
 0x4b1   :  { %934 = vadd.xlane.f32.xlu0 %v933_v61  ;;  %v1382_v42 = vrot.slane %v1381_v41, 1 }
 0x4b2   :  { %v1179_v45 = vrot.slane %v1178_v5, 2  ;;  %v825_v55 = vsel %vm824_vm15, %v791_v22, 0.0 }
 0x4b3   :  { %v1383_v44 = vmax.f32 %v1381_v41, %v1382_v42 }
 0x4b4   :  { %v1180_v13 = vadd.f32 %v1179_v45, %v1178_v5 }
 0x4b5   :  { %v1384_v27 = vsub.f32 %v2698_v37, %v1383_v44 }
 0x4b6   :  { %1497 = vadd.xlane.f32.xlu2 %v1496_v46  ;;  %v1181_v58 = vrot.slane %v1180_v13, 1 }
 0x4b7   :  { %v1385_v50 = vmul.f32 1.442695, %v1384_v27 }
 0x4b8   :  { %v1182_v3 = vadd.f32 %v1181_v58, %v1180_v13 }
 0x4b9   :  { %2015 = vpow2.f32 %v1385_v50  ;;  %v1551_v50 = vand.u32 2147483648, %v2549_v1 }
 0x4ba   :  { %2017 = vlog2.f32 %v965_v18 }
 0x4bb   :  { %2019 = vlog2.f32 %v1182_v3 }
 0x4be   :  { %1724 = vadd.xlane.f32.xlu2 %v1723_v52 }
 0x4bf   :  { %v2016_v47 = vpop.eup %2015 }
 0x4c0   :  { %v2018_v10 = vpop.eup %2017  ;;  %v1387_v16 = vsel %vm398_vm2, %v2016_v47, 0.0 }
 0x4c1   :  { %v1388_v12 = vrot.slane %v1387_v16, 4  ;;  %v967_v59 = vmul.f32 0.6931472, %v2018_v10  ;;  %v2020_v7 = vpop.eup %2019 }
 0x4c2   :  { %v1184_v49 = vmul.f32 0.6931472, %v2020_v7  ;;  %v1599_v7 = vand.u32 2147483648, %v2539_v36 }
 0x4c3   :  { %v1389_v15 = vadd.f32 %v1388_v12, %v1387_v16  ;;  %v968_v24 = vadd.f32 %v967_v59, %v2633_v25 }
 0x4c4   :  { %v1185_v21 = vadd.f32 %v1184_v49, %v2671_v34  ;;  %v1628_v49 = vand.u32 2147483648, %v2533_v33 }
 0x4c5   :  { %v1390_v20 = vrot.slane %v1389_v15, 2  ;;  %v993_v30 = vsel %vm824_vm15, %v968_v24, 0.0 }
 0x4c6   :  { %826 = vadd.xlane.f32.xlu2 %v825_v55  ;;  %v1210_v32 = vsel %vm824_vm15, %v1185_v21, 0.0 }
 0x4c7   :  { %v1391_v26 = vadd.f32 %v1390_v20, %v1389_v15 }
 0x4c9   :  { %v1392_v29 = vrot.slane %v1391_v26, 1 }
 0x4cb   :  { %v1393_v63 = vadd.f32 %v1392_v29, %v1391_v26 }
 0x4cd   :  { %2021 = vlog2.f32 %v1393_v63 }
 0x4ce   :  { %994 = vadd.xlane.f32.xlu2 %v993_v30  ;;  %2023 = vrsqrt.f32 %v2549_v1 }
 0x4cf   :  { %2025 = vrsqrt.f32 %v2547_v62 }
 0x4d0   :  { %2027 = vrsqrt.f32 %v2539_v36 }
 0x4d1   :  { %2029 = vrsqrt.f32 %v2533_v33 }
 0x4d3   :  { %v2022_v31 = vpop.eup %2021 }
 0x4d4   :  { %v1395_v25 = vmul.f32 0.6931472, %v2022_v31  ;;  %v2024_v8 = vpop.eup %2023 }
 0x4d5   :  { %v2026_v40 = vpop.eup %2025  ;;  %v1542_v41 = vmul.f32 %v2024_v8, %v2549_v1 }
 0x4d6   :  { %1211 = vadd.xlane.f32.xlu2 %v1210_v32  ;;  %v1396_v35 = vadd.f32 %v1395_v25, %v1383_v44  ;;  %v1513_v19 = vmul.f32 %v2026_v40, %v2547_v62  ;;  %v2028_v51 = vpop.eup %2027 }
 0x4d7   :  { %v1543_v34 = vmul.f32 %v2024_v8, %v1542_v41  ;;  %v2030_v43 = vpop.eup %2029  ;;  %v1590_v44 = vmul.f32 %v2028_v51, %v2539_v36 }
 0x4d8   :  { %v1421_v9 = vsel %vm824_vm15, %v1396_v35, 0.0  ;;  %v1514_v5 = vmul.f32 %v2026_v40, %v1513_v19  ;;  %v1619_v48 = vmul.f32 %v2030_v43, %v2533_v33 }
 0x4d9   :  { %v1544_v61 = vmul.f32 0.5, %v1543_v34  ;;  %v1591_v38 = vmul.f32 %v2028_v51, %v1590_v44 }
 0x4da   :  { %v1515_v28 = vmul.f32 0.5, %v1514_v5  ;;  %v1620_v13 = vmul.f32 %v2030_v43, %v1619_v48 }
 0x4db   :  { %v1545_v17 = vsub.f32 1.5, %v1544_v61  ;;  %v1592_v52 = vmul.f32 0.5, %v1591_v38 }
 0x4dc   :  { %v1516_v60 = vsub.f32 1.5, %v1515_v28  ;;  %v1621_v2 = vmul.f32 0.5, %v1620_v13  ;;  %v1302_v13 = vsel %vm398_vm2, %v2587_v56, 0.0 }
 0x4dd   :  { %v1546_v42 = vmul.f32 %v2024_v8, %v1545_v17  ;;  %v1593_v22 = vsub.f32 1.5, %v1592_v52 }
 0x4de   :  { %1422 = vadd.xlane.f32.xlu2 %v1421_v9  ;;  %v1517_v45 = vmul.f32 %v2026_v40, %v1516_v60  ;;  %v1622_v16 = vsub.f32 1.5, %v1621_v2 }
 0x4df   :  { %v1547_v46 = vmul.f32 %v1546_v42, %v2549_v1  ;;  %v1594_v12 = vmul.f32 %v2028_v51, %v1593_v22 }
 0x4e0   :  { %v1518_v27 = vmul.f32 %v1517_v45, %v2547_v62  ;;  %v1623_v55 = vmul.f32 %v2030_v43, %v1622_v16 }
 0x4e1   :  { %v1549_v18 = vsel %vm1548_vm0, %v2549_v1, %v1547_v46  ;;  %v1595_v15 = vmul.f32 %v1594_v12, %v2539_v36 }
 0x4e2   :  { %v1520_v53 = vsel %vm1519_vm3, %v2547_v62, %v1518_v27  ;;  %v1552_v58 = vsel %vm1550_vm4, %v1551_v50, %v1549_v18  ;;  %v1624_v1 = vmul.f32 %v1623_v55, %v2533_v33 }
 0x4e3   :  { %v1523_v3 = vsel %vm1521_vm5, %v1522_v54, %v1520_v53  ;;  %v1553_v47 = vmax.f32 %v1552_v58, 1e-12  ;;  %v1597_v62 = vsel %vm1596_vm6, %v2539_v36, %v1595_v15 }
 0x4e4   :  { %v1524_v10 = vmax.f32 %v1523_v3, 1e-12  ;;  %v1626_v26 = vsel %vm1625_vm7, %v2533_v33, %v1624_v1  ;;  %v1600_v31 = vsel %vm1598_vm8, %v1599_v7, %v1597_v62  ;;  %vm792_vm8 = vcmask 7168  }
 0x4e5   :  { %2031 = vrcp.f32 %v1553_v47  ;;  %v1629_v25 = vsel %vm1627_vm9, %v1628_v49, %v1626_v26  ;;  %v2790_v35 = vmax.f32 %v1600_v31, 1e-12  ;;  %v1565_v33 = vand.u32 2147483648, %v1553_v47 }
 0x4e6   :  { %2033 = vrcp.f32 %v1524_v10  ;;  %v2792_v41 = vmax.f32 %v1629_v25, 1e-12  ;;  %vm1559_vm12 = vweird.f32 %v1553_v47  ;;  %v1563_v5 = vand.u32 2147483647, %v1553_v47 }
 0x4e7   :  { %v1536_v61 = vand.u32 2147483648, %v1524_v10  ;;  %vm1530_vm13 = vweird.f32 %v1524_v10  ;;  %v1534_v28 = vand.u32 2147483647, %v1524_v10  ;;  %v1566_v42 = vor.u32 1.1754944e-38, %v1565_v33 }
 0x4e8   :  { %vm1564_vm15 = vcmp.eq.f32.partialorder %v1563_v5, 8.507059e+37  ;;  %v1613_v12 = vand.u32 2147483648, %v2790_v35  ;;  %vm1607_vm5 = vweird.f32 %v2790_v35  ;;  %v1642_v15 = vand.u32 2147483648, %v2792_v41 }
 0x4e9   :  { %v1537_v45 = vor.u32 1.1754944e-38, %v1536_v61  ;;  %vm1535_vm0 = vcmp.eq.f32.partialorder %v1534_v28, 8.507059e+37  ;;  %vm1636_vm7 = vweird.f32 %v2792_v41 }
 0x4ea   :  { %v1614_v62 = vor.u32 1.1754944e-38, %v1613_v12 }
 0x4eb   :  { %v2032_v59 = vpop.eup %2031 }
 0x4ec   :  { %v2034_v20 = vpop.eup %2033  ;;  %v1555_v24 = vmul.f32 %v2032_v59, %v1553_v47  ;;  %vm1560_vm10 = vweird.f32 %v2032_v59 }
 0x4ed   :  { %v1526_v30 = vmul.f32 %v2034_v20, %v1524_v10  ;;  %vm1531_vm11 = vweird.f32 %v2034_v20  ;;  %vm1561_vm1 = vmor %vm1559_vm12, %vm1560_vm10 }
 0x4ee   :  { %v1556_v21 = vsub.f32 1.0, %v1555_v24  ;;  %vm1532_vm14 = vmor %vm1530_vm13, %vm1531_vm11  ;;  %v769_v24 = vpop.xlane.xlu1 %768 }
 0x4ef   :  { %v1527_v8 = vsub.f32 1.0, %v1526_v30 }
 0x4f0   :  { %v1557_v40 = vmul.f32 %v2032_v59, %v1556_v21 }
 0x4f1   :  { %v1528_v9 = vmul.f32 %v2034_v20, %v1527_v8 }
 0x4f2   :  { %v1558_v36 = vadd.f32 %v2032_v59, %v1557_v40 }
 0x4f3   :  { %v1529_v34 = vadd.f32 %v2034_v20, %v1528_v9 }
 0x4f4   :  { %v1562_v17 = vsel %vm1561_vm1, %v2032_v59, %v1558_v36  ;;  %v1611_v59 = vand.u32 2147483647, %v2790_v35 }
 0x4f5   :  { %v1533_v43 = vsel %vm1532_vm14, %v2034_v20, %v1529_v34  ;;  %v1567_v44 = vsel %vm1564_vm15, %v1566_v42, %v1562_v17  ;;  %v1640_v20 = vand.u32 2147483647, %v2792_v41 }
 0x4f6   :  { %v1538_v27 = vsel %vm1535_vm0, %v1537_v45, %v1533_v43  ;;  %v1569_v50 = vmul.f32 %v1567_v44, %v2365_v0  ;;  %vm1612_vm10 = vcmp.eq.f32.partialorder %v1611_v59, 8.507059e+37  ;;  %v1093_v40 = vpop.xlane.xlu1 %1092 }
 0x4f7   :  { %v1540_v54 = vmul.f32 %v1538_v27, %v2506_v14  ;;  %vm1641_vm11 = vcmp.eq.f32.partialorder %v1640_v20, 8.507059e+37 }
 0x4f9   :  { %v1570_v3 = vmul.f32 %v1569_v50, %v1540_v54 }
 0x4fb   :  { %v1571_v10 = vsel %vm398_vm2, %v1570_v3, 0.0 }
 0x509   :  { %v2783_v29 = vpop.xlane.xlu2 %1156 }
 0x50a   :  { %v1158_v63 = vsub.f32 %v2647_v39, %v2783_v29 }
 0x50c   :  { %v1159_v32 = vmul.f32 1.442695, %v1158_v63  ;;  %v1643_v63 = vor.u32 1.1754944e-38, %v1642_v15 }
 0x50e   :  { %2035 = vpow2.f32 %v1159_v32  ;;  %v1334_v32 = vsel %vm398_vm2, %v2589_v57, 0.0 }
 0x50f   :  { %2037 = vrcp.f32 %v2790_v35 }
 0x510   :  { %2039 = vrcp.f32 %v2792_v41 }
 0x511   :  { %v946_v48 = vpop.xlane.xlu2 %945 }
 0x514   :  { %v2036_v39 = vpop.eup %2035 }
 0x515   :  { %v1161_v19 = vsel %vm398_vm2, %v2036_v39, 0.0  ;;  %v2038_v60 = vpop.eup %2037 }
 0x516   :  { %1162 = vadd.xlane.f32.xlu0 %v1161_v19  ;;  %v2040_v51 = vpop.eup %2039  ;;  %v1603_v46 = vmul.f32 %v2038_v60, %v2790_v35  ;;  %vm1608_vm3 = vweird.f32 %v2038_v60 }
 0x517   :  { %v1632_v38 = vmul.f32 %v2040_v51, %v2792_v41  ;;  %vm1637_vm4 = vweird.f32 %v2040_v51  ;;  %vm1609_vm6 = vmor %vm1607_vm5, %vm1608_vm3 }
 0x518   :  { %v1604_v58 = vsub.f32 1.0, %v1603_v46  ;;  %vm1638_vm9 = vmor %vm1636_vm7, %vm1637_vm4 }
 0x519   :  { %v1633_v2 = vsub.f32 1.0, %v1632_v38  ;;  %v758_v16 = vpop.xlane.xlu2 %757 }
 0x51a   :  { %v1605_v47 = vmul.f32 %v2038_v60, %v1604_v58  ;;  %v760_v55 = vmul.f32 14.285714, %v758_v16 }
 0x51b   :  { %v1634_v22 = vmul.f32 %v2040_v51, %v1633_v2 }
 0x51c   :  { %v2799_v18 = vpop.xlane.xlu0 %1367  ;;  %v1606_v56 = vadd.f32 %v2038_v60, %v1605_v47  ;;  %v793_v26 = vsel %vm792_vm8, %v760_v55, 0.0 }
 0x51d   :  { %v1369_v53 = vsub.f32 %v2698_v37, %v2799_v18  ;;  %v1635_v37 = vadd.f32 %v2040_v51, %v1634_v22 }
 0x51e   :  { %1303 = vadd.xlane.f32.xlu0 %v1302_v13  ;;  %v1610_v1 = vsel %vm1609_vm6, %v2038_v60, %v1606_v56 }
 0x51f   :  { %v1370_v52 = vmul.f32 1.442695, %v1369_v53  ;;  %v1639_v7 = vsel %vm1638_vm9, %v2040_v51, %v1635_v37  ;;  %v1615_v49 = vsel %vm1612_vm10, %v1614_v62, %v1610_v1 }
 0x520   :  { %v1644_v21 = vsel %vm1641_vm11, %v1643_v63, %v1639_v7  ;;  %v1617_v25 = vmul.f32 %v1615_v49, %v2498_v6 }
 0x521   :  { %2041 = vpow2.f32 %v1370_v52  ;;  %v1125_v8 = vpop.xlane.xlu2 %1124  ;;  %v1646_v35 = vmul.f32 %v1644_v21, %v2369_v4 }
 0x522   :  { %2043 = vlog2.f32 %v769_v24  ;;  %v1152_v41 = vadd.f32 %v1125_v8, %v1093_v40 }
 0x523   :  { %v1647_v36 = vmul.f32 %v1646_v35, %v1617_v25  ;;  %2045 = vlog2.f32 %v946_v48 }
 0x524   :  { %v935_v30 = vpop.xlane.xlu0 %934  ;;  %v1154_v19 = vmul.f32 14.285714, %v1152_v41 }
 0x525   :  { %v937_v31 = vmul.f32 14.285714, %v935_v30  ;;  %v1648_v34 = vsel %vm398_vm2, %v1647_v36, 0.0 }
 0x526   :  { %1572 = vadd.xlane.f32.xlu0 %v1571_v10  ;;  %v1186_v57 = vsel %vm792_vm8, %v1154_v19, 0.0 }
 0x527   :  { %v2042_v0 = vpop.eup %2041  ;;  %v969_v9 = vsel %vm792_vm8, %v937_v31, 0.0 }
 0x528   :  { %v1372_v14 = vsel %vm398_vm2, %v2042_v0, 0.0  ;;  %v2044_v39 = vpop.eup %2043 }
 0x529   :  { %1373 = vadd.xlane.f32.xlu1 %v1372_v14  ;;  %v771_v33 = vmul.f32 0.6931472, %v2044_v39  ;;  %v2046_v5 = vpop.eup %2045  ;;  %v1498_v44 = vpop.xlane.xlu2 %1497 }
 0x52a   :  { %v948_v4 = vmul.f32 0.6931472, %v2046_v5  ;;  %v1499_v14 = vmul.f32 %v1498_v44, %v1498_v44 }
 0x52b   :  { %v772_v6 = vadd.f32 %v771_v33, %v2517_v23 }
 0x52c   :  { %v949_v28 = vadd.f32 %v948_v4, %v2621_v11 }
 0x52d   :  { %v804_v61 = vsel %vm792_vm8, %v772_v6, 0.0 }
 0x52e   :  { %794 = vadd.xlane.f32.xlu0 %v793_v26  ;;  %v980_v17 = vsel %vm792_vm8, %v949_v28, 0.0  ;;  %v1500_v26 = vsel %vm792_vm8, %v1499_v14, 0.0 }
 0x531   :  { %1335 = vadd.xlane.f32.xlu1 %v1334_v32  ;;  %v1725_v27 = vpop.xlane.xlu2 %1724 }
 0x532   :  { %v1726_v21 = vmul.f32 %v1725_v27, %v1725_v27 }
 0x534   :  { %v1727_v36 = vsel %vm792_vm8, %v1726_v21, 0.0 }
 0x536   :  { %970 = vadd.xlane.f32.xlu0 %v969_v9 }
 0x539   :  { %1649 = vadd.xlane.f32.xlu1 %v1648_v34  ;;  %v827_v3 = vpop.xlane.xlu2 %826 }
 0x53a   :  { %v828_v12 = vrot.slane %v827_v3, 4 }
 0x53c   :  { %v829_v1 = vadd.f32 %v828_v12, %v827_v3 }
 0x53e   :  { %1187 = vadd.xlane.f32.xlu0 %v1186_v57  ;;  %v830_v30 = vrot.slane %v829_v1, 2 }
 0x540   :  { %v831_v40 = vadd.f32 %v830_v30, %v829_v1 }
 0x541   :  { %805 = vadd.xlane.f32.xlu1 %v804_v61  ;;  %v995_v24 = vpop.xlane.xlu2 %994 }
 0x542   :  { %v996_v49 = vrot.slane %v995_v24, 4  ;;  %v832_v57 = vrot.slane %v831_v40, 1 }
 0x544   :  { %v997_v35 = vadd.f32 %v996_v49, %v995_v24 }
 0x546   :  { %v998_v19 = vrot.slane %v997_v35, 2 }
 0x549   :  { %981 = vadd.xlane.f32.xlu1 %v980_v17 }
 0x589   :  { %v1163_v60 = vpop.xlane.xlu0 %1162 }
 0x58a   :  { %2047 = vlog2.f32 %v1163_v60  ;;  %v833_v60 = vadd.f32 %v832_v57, %v831_v40 }
 0x590   :  { %v2048_v42 = vpop.eup %2047 }
 0x591   :  { %v1165_v51 = vmul.f32 0.6931472, %v2048_v42  ;;  %v1304_v43 = vpop.xlane.xlu0 %1303  ;;  %v999_v42 = vadd.f32 %v998_v19, %v997_v35 }
 0x593   :  { %v1166_v45 = vadd.f32 %v1165_v51, %v2783_v29 }
 0x595   :  { %v1197_v23 = vsel %vm792_vm8, %v1166_v45, 0.0 }
 0x596   :  { %1198 = vadd.xlane.f32.xlu1 %v1197_v23  ;;  %v1000_v23 = vrot.slane %v999_v42, 1 }
 0x599   :  { %v1573_v46 = vpop.xlane.xlu0 %1572 }
 0x59a   :  { %v1574_v37 = vmul.f32 %v1573_v46, %v1573_v46 }
 0x59c   :  { %v1374_v48 = vpop.xlane.xlu1 %1373  ;;  %v1575_v20 = vsel %vm792_vm8, %v1574_v37, 0.0 }
 0x59d   :  { %2049 = vlog2.f32 %v1374_v48 }
 0x5a1   :  { %v795_v38 = vpop.xlane.xlu0 %794 }
 0x5a2   :  { %v796_v11 = vrot.slane %v795_v38, 4 }
 0x5a3   :  { %v2050_v13 = vpop.eup %2049 }
 0x5a4   :  { %v797_v50 = vadd.f32 %v796_v11, %v795_v38  ;;  %v1376_v53 = vmul.f32 0.6931472, %v2050_v13  ;;  %v1336_v54 = vpop.xlane.xlu1 %1335  ;;  %v1001_v38 = vadd.f32 %v1000_v23, %v999_v42  ;;  %v1212_v13 = vpop.xlane.xlu2 %1211 }
 0x5a5   :  { %v1363_v52 = vadd.f32 %v1336_v54, %v1304_v43 }
 0x5a6   :  { %v798_v58 = vrot.slane %v797_v50, 2  ;;  %v1377_v2 = vadd.f32 %v1376_v53, %v2799_v18 }
 0x5a7   :  { %v1365_v29 = vmul.f32 14.285714, %v1363_v52 }
 0x5a8   :  { %v799_v47 = vadd.f32 %v798_v58, %v797_v50  ;;  %v1408_v10 = vsel %vm792_vm8, %v1377_v2, 0.0  ;;  %v1213_v50 = vrot.slane %v1212_v13, 4 }
 0x5a9   :  { %v971_v22 = vpop.xlane.xlu0 %970  ;;  %1409 = vadd.xlane.f32.xlu1 %v1408_v10  ;;  %v1397_v16 = vsel %vm792_vm8, %v1365_v29, 0.0 }
 0x5aa   :  { %v800_v56 = vrot.slane %v799_v47, 1  ;;  %1398 = vadd.xlane.f32.xlu0 %v1397_v16  ;;  %v972_v59 = vrot.slane %v971_v22, 4  ;;  %v1214_v53 = vadd.f32 %v1213_v50, %v1212_v13 }
 0x5ac   :  { %v801_v0 = vadd.f32 %v800_v56, %v799_v47  ;;  %v1650_v55 = vpop.xlane.xlu1 %1649  ;;  %v973_v62 = vadd.f32 %v972_v59, %v971_v22  ;;  %v1215_v54 = vrot.slane %v1214_v53, 2  ;;  %v1423_v16 = vpop.xlane.xlu2 %1422 }
 0x5ad   :  { %v1651_v15 = vmul.f32 %v1650_v55, %v1650_v55  ;;  %v1424_v12 = vrot.slane %v1423_v16, 4 }
 0x5ae   :  { %1877 = vpush %v801_v0  ;;  %v974_v31 = vrot.slane %v973_v62, 2  ;;  %v1216_v3 = vadd.f32 %v1215_v54, %v1214_v53  ;;  %v2839_v54 = vstv %s1745_s2 }
 0x5af   :  { %v1652_v18 = vsel %vm792_vm8, %v1651_v15, 0.0  ;;  %v1425_v37 = vadd.f32 %v1424_v12, %v1423_v16  ;;  %vm1752_vm12 = vweird.f32 %v2839_v54 }
 0x5b0   :  { %1653 = vadd.xlane.f32.xlu2 %v1652_v18  ;;  %v975_v39 = vadd.f32 %v974_v31, %v973_v62  ;;  %v1217_v22 = vrot.slane %v1216_v3, 1 }
 0x5b1   :  { %1576 = vadd.xlane.f32.xlu1 %v1575_v20  ;;  %v1188_v7 = vpop.xlane.xlu0 %1187  ;;  %v1426_v15 = vrot.slane %v1425_v37, 2 }
 0x5b2   :  { %1501 = vadd.xlane.f32.xlu0 %v1500_v26  ;;  %v1189_v32 = vrot.slane %v1188_v7, 4  ;;  %v976_v61 = vrot.slane %v975_v39, 1  ;;  %v1218_v0 = vadd.f32 %v1217_v22, %v1216_v3 }
 0x5b3   :  { %v1427_v26 = vadd.f32 %v1426_v15, %v1425_v37 }
 0x5b4   :  { %v806_v63 = vpop.xlane.xlu1 %805  ;;  %v1190_v41 = vadd.f32 %v1189_v32, %v1188_v7  ;;  %v977_v43 = vadd.f32 %v976_v61, %v975_v39 }
 0x5b5   :  { %v807_v25 = vrot.slane %v806_v63, 4 }
 0x5b6   :  { %v1191_v6 = vrot.slane %v1190_v41, 2 }
 0x5b7   :  { %v808_v8 = vadd.f32 %v807_v25, %v806_v63 }
 0x5b8   :  { %v1192_v45 = vadd.f32 %v1191_v6, %v1190_v41  ;;  %v1428_v41 = vrot.slane %v1427_v26, 1 }
 0x5b9   :  { %v809_v9 = vrot.slane %v808_v8, 2 }
 0x5ba   :  { %1728 = vadd.xlane.f32.xlu0 %v1727_v36  ;;  %v1193_v48 = vrot.slane %v1192_v45, 1 }
 0x5bb   :  { %v810_v33 = vadd.f32 %v809_v9, %v808_v8 }
 0x5bc   :  { %v982_v34 = vpop.xlane.xlu1 %981  ;;  %v1194_v11 = vadd.f32 %v1193_v48, %v1192_v45 }
 0x5bd   :  { %v983_v5 = vrot.slane %v982_v34, 4  ;;  %v811_v4 = vrot.slane %v810_v33, 1 }
 0x5bf   :  { %v984_v28 = vadd.f32 %v983_v5, %v982_v34  ;;  %v812_v17 = vadd.f32 %v811_v4, %v810_v33  ;;  %v1429_v5 = vadd.f32 %v1428_v41, %v1427_v26 }
 0x5c1   :  { %v985_v51 = vrot.slane %v984_v28, 2  ;;  %1879 = vpush %v812_v17 }
 0x5c2   :  { %1881 = vpush %v833_v60 }
 0x5c3   :  { %1883 = vpush %v977_v43  ;;  %v986_v44 = vadd.f32 %v985_v51, %v984_v28 }
 0x5c5   :  { %v987_v46 = vrot.slane %v986_v44, 1 }
 0x5c7   :  { %v988_v27 = vadd.f32 %v987_v46, %v986_v44 }
 0x5c9   :  { %1885 = vpush %v988_v27 }
 0x5ca   :  { %1887 = vpush %v1001_v38 }
 0x5cb   :  { %1889 = vpush %v1194_v11  ;;  %v2127_v11 = vmov 8.0  }
 0x5cc   :  { %2051 = vrcp.f32 %v2127_v11 }
 0x5cd   :  { %2053 = vrcp.f32 %v2839_v54 }
 0x5d2   :  { %v2052_v13 = vpop.eup %2051 }
 0x5d3   :  { %v817_v50 = vmul.f32 8.0, %v2052_v13  ;;  %vm821_vm2 = vweird.f32 %v2052_v13  ;;  %v2842_v37 = vpop.eup %2053 }
 0x5d4   :  { %v1748_v26 = vmul.f32 %v2842_v37, %v2839_v54  ;;  %vm1753_vm1 = vweird.f32 %v2842_v37 }
 0x5d5   :  { %v818_v53 = vsub.f32 1.0, %v817_v50  ;;  %vm2861_vm13 = vmor %vm1752_vm12, %vm1753_vm1 }
 0x5df   :  { %s1878_s20 = spop %1877 }
 0x5f2   :  { %s1880_s27 = spop %1879 }
 0x5f3   :  { %s1882_s4 = spop %1881  ;;  %v814_v3 = vstv %s1880_s27 }
 0x5f4   :  { %s1884_s7 = spop %1883 }
 0x5f5   :  { %v979_v22 = vstv %s1884_s7 }
 0x5fa   :  { %s1886_s10 = spop %1885 }
 0x5fb   :  { %s1888_s11 = spop %1887 }
 0x5fc   :  { %s1890_s16 = spop %1889 }
 0x5fd   :  { %v1196_v15 = vstv %s1890_s16 }
 0x609   :  { %v1199_v58 = vpop.xlane.xlu1 %1198 }
 0x60a   :  { %v1200_v52 = vrot.slane %v1199_v58, 4 }
 0x60c   :  { %v1201_v2 = vadd.f32 %v1200_v52, %v1199_v58  ;;  %v819_v58 = vmul.f32 %v2052_v13, %v818_v53  ;;  %v990_v52 = vstv %s1886_s10 }
 0x60e   :  { %v1202_v29 = vrot.slane %v1201_v2, 2 }
 0x610   :  { %v1203_v47 = vadd.f32 %v1202_v29, %v1201_v2  ;;  %v1003_v2 = vstv %s1888_s11  ;;  %v820_v29 = vadd.f32 %v2052_v13, %v819_v58 }
 0x611   :  { %v1004_v16 = vsub.f32 %v1003_v2, %v979_v22 }
 0x612   :  { %v1204_v10 = vrot.slane %v1203_v47, 1 }
 0x614   :  { %v1205_v56 = vadd.f32 %v1204_v10, %v1203_v47  ;;  %v835_v47 = vstv %s1882_s4  ;;  %v991_v10 = vsub.f32 %v990_v52, %v979_v22  ;;  %v1766_v22 = vstv %s2866_s5 }
 0x616   :  { %1891 = vpush %v1205_v56  ;;  %v803_v56 = vstv %s1878_s20 }
 0x617   :  { %1893 = vpush %v1218_v0 }
 0x61c   :  { %v1410_v55 = vpop.xlane.xlu1 %1409 }
 0x61d   :  { %v1411_v14 = vrot.slane %v1410_v55, 4  ;;  %v1399_v59 = vpop.xlane.xlu0 %1398 }
 0x61e   :  { %v1400_v18 = vrot.slane %v1399_v59, 4 }
 0x61f   :  { %v1412_v1 = vadd.f32 %v1411_v14, %v1410_v55  ;;  %v815_v55 = vsub.f32 %v814_v3, %v803_v56  ;;  %v836_v14 = vsub.f32 %v835_v47, %v803_v56 }
 0x620   :  { %v1401_v20 = vadd.f32 %v1400_v18, %v1399_v59  ;;  %v822_v59 = vsel %vm821_vm2, %v2052_v13, %v820_v29 }
 0x621   :  { %v1413_v24 = vrot.slane %v1412_v1, 2  ;;  %v2844_v18 = vmul.f32 %v991_v10, %v822_v59 }
 0x622   :  { %v1402_v62 = vrot.slane %v1401_v20, 2 }
 0x623   :  { %v1654_v7 = vpop.xlane.xlu2 %1653  ;;  %v1414_v30 = vadd.f32 %v1413_v24, %v1412_v1  ;;  %v2846_v1 = vmul.f32 %v1004_v16, %v822_v59 }
 0x624   :  { %v1655_v49 = vrot.slane %v1654_v7, 4  ;;  %v1577_v63 = vpop.xlane.xlu1 %1576  ;;  %v1403_v21 = vadd.f32 %v1402_v62, %v1401_v20 }
 0x625   :  { %v1578_v31 = vrot.slane %v1577_v63, 4  ;;  %v1502_v32 = vpop.xlane.xlu0 %1501  ;;  %v1415_v25 = vrot.slane %v1414_v30, 1 }
 0x626   :  { %v1656_v8 = vadd.f32 %v1655_v49, %v1654_v7  ;;  %v1503_v35 = vrot.slane %v1502_v32, 4  ;;  %v1404_v40 = vrot.slane %v1403_v21, 1  ;;  %v823_v7 = vmul.f32 %v822_v59, %v815_v55 }
 0x627   :  { %v1579_v9 = vadd.f32 %v1578_v31, %v1577_v63  ;;  %v1416_v36 = vadd.f32 %v1415_v25, %v1414_v30  ;;  %v2850_v30 = vmul.f32 %v836_v14, %v822_v59  ;;  %v1006_v31 = vadd.f32 %v2846_v1, %v2844_v18 }
 0x628   :  { %v1657_v39 = vrot.slane %v1656_v8, 2  ;;  %v1504_v33 = vadd.f32 %v1503_v35, %v1502_v32  ;;  %v1405_v19 = vadd.f32 %v1404_v40, %v1403_v21  ;;  %v1749_v40 = vsub.f32 1.0, %v1748_v26 }
 0x629   :  { %v1580_v34 = vrot.slane %v1579_v9, 2  ;;  %v838_v41 = vadd.f32 %v2850_v30, %v823_v7  ;;  %v1012_v55 = vadd.f32 %v2846_v1, %v2850_v30 }
 0x62a   :  { %v1658_v57 = vadd.f32 %v1657_v39, %v1656_v8  ;;  %v1505_v6 = vrot.slane %v1504_v33, 2  ;;  %1895 = vpush %v1405_v19  ;;  %v1750_v19 = vmul.f32 %v2842_v37, %v1749_v40 }
 0x62b   :  { %v1581_v4 = vadd.f32 %v1580_v34, %v1579_v9  ;;  %1897 = vpush %v1416_v36  ;;  %v1007_v36 = vmul.f32 0.5, %v1006_v31  ;;  %v839_v34 = vmul.f32 0.5, %v838_v41 }
 0x62c   :  { %1899 = vpush %v1429_v5  ;;  %v1506_v61 = vadd.f32 %v1505_v6, %v1504_v33  ;;  %v1659_v51 = vrot.slane %v1658_v57, 1 }
 0x62d   :  { %v1729_v28 = vpop.xlane.xlu0 %1728  ;;  %v1582_v17 = vrot.slane %v1581_v4, 1 }
 0x62e   :  { %v1730_v60 = vrot.slane %v1729_v28, 4  ;;  %v1507_v42 = vrot.slane %v1506_v61, 1  ;;  %v1660_v46 = vadd.f32 %v1659_v51, %v1658_v57 }
 0x62f   :  { %v1583_v43 = vadd.f32 %v1582_v17, %v1581_v4  ;;  %v1008_v4 = vadd.f32 %v1007_v36, %v839_v34  ;;  %v1756_v17 = vand.u32 2147483647, %v2839_v54 }
 0x630   :  { %v1731_v45 = vadd.f32 %v1730_v60, %v1729_v28  ;;  %v1508_v44 = vadd.f32 %v1507_v42, %v1506_v61  ;;  %v1751_v28 = vadd.f32 %v2842_v37, %v1750_v19  ;;  %v1758_v60 = vand.u32 2147483648, %v2839_v54 }
 0x631   :  { %vm1757_vm14 = vcmp.eq.f32.partialorder %v1756_v17, 8.507059e+37  ;;  %v1769_v54 = vlaneseq }
 0x632   :  { %v1732_v23 = vrot.slane %v1731_v45, 2  ;;  %1901 = vpush %v1508_v44  ;;  %v1762_v44 = vstv %s2836_s14 }
 0x633   :  { %1903 = vpush %v1583_v43  ;;  %v1770_v10 = vand.u32 127, %v1769_v54 }
 0x634   :  { %v1733_v48 = vadd.f32 %v1732_v23, %v1731_v45  ;;  %1905 = vpush %v1660_v46  ;;  %v1009_v46 = vmul.f32 0.5, %v1008_v4 }
 0x635   :  { %vm1771_vm15 = vcmp.eq.s32.totalorder %v1770_v10, 0  ;;  %vm1773_vm0 = vcmp.eq.s32.totalorder %v1770_v10, 1  ;;  %vm1775_vm3 = vcmp.eq.s32.totalorder %v1770_v10, 2  ;;  %vm1777_vm4 = vcmp.eq.s32.totalorder %v1770_v10, 3 }
 0x636   :  { %v1734_v27 = vrot.slane %v1733_v48, 1  ;;  %v1744_v58 = vmul.f32 2.0, %v1009_v46  ;;  %vm1779_vm5 = vcmp.eq.s32.totalorder %v1770_v10, 4  ;;  %vm1781_vm6 = vcmp.eq.s32.totalorder %v1770_v10, 5 }
 0x637   :  { %vm1783_vm7 = vcmp.eq.s32.totalorder %v1770_v10, 6  ;;  %vm1785_vm8 = vcmp.eq.s32.totalorder %v1770_v10, 7 }
 0x638   :  { %v1735_v38 = vadd.f32 %v1734_v27, %v1733_v48  ;;  %v1755_v27 = vsel %vm2861_vm13, %v2842_v37, %v1751_v28  ;;  %v1010_v37 = vadd.f32 %v2844_v18, %v823_v7 }
 0x63a   :  { %1907 = vpush %v1735_v38  ;;  %v1759_v38 = vor.u32 1.1754944e-38, %v1758_v60 }
 0x63c   :  { %v1760_v2 = vsel %vm1757_vm14, %v1759_v38, %v1755_v27 }
 0x63d   :  { %v1761_v56 = vmul.f32 %v1760_v2, %v1744_v58 }
 0x647   :  { %s1892_s15 = spop %1891 }
 0x648   :  { %s1894_s18 = spop %1893  ;;  %v1207_v0 = vstv %s1892_s15 }
 0x649   :  { %v1220_v12 = vstv %s1894_s18  ;;  %v1208_v20 = vsub.f32 %v1207_v0, %v1196_v15 }
 0x64a   :  { %v1221_v24 = vsub.f32 %v1220_v12, %v1196_v15  ;;  %v1011_v15 = vmul.f32 0.5, %v1010_v37 }
 0x64b   :  { %v1209_v32 = vmul.f32 %v1208_v20, %v822_v59 }
 0x64c   :  { %v1222_v25 = vmul.f32 %v1221_v24, %v822_v59  ;;  %v1013_v24 = vmul.f32 0.5, %v1012_v55 }
 0x64e   :  { %v1223_v39 = vadd.f32 %v1222_v25, %v1209_v32 }
 0x650   :  { %v1224_v61 = vmul.f32 0.5, %v1223_v39 }
 0x65b   :  { %s1896_s22 = spop %1895 }
 0x65c   :  { %v1407_v62 = vstv %s1896_s22  ;;  %s1898_s23 = spop %1897 }
 0x65d   :  { %v1418_v49 = vstv %s1898_s23  ;;  %s1900_s26 = spop %1899 }
 0x65e   :  { %v1419_v63 = vsub.f32 %v1418_v49, %v1407_v62  ;;  %v1431_v21 = vstv %s1900_s26 }
 0x65f   :  { %v1432_v8 = vsub.f32 %v1431_v21, %v1407_v62 }
 0x660   :  { %v1420_v35 = vmul.f32 %v1419_v63, %v822_v59 }
 0x661   :  { %v1433_v9 = vmul.f32 %v1432_v8, %v822_v59 }
 0x663   :  { %v1434_v33 = vadd.f32 %v1433_v9, %v1420_v35  ;;  %s1902_s28 = spop %1901 }
 0x664   :  { %s1904_s1 = spop %1903  ;;  %v1510_v6 = vstv %s1902_s28 }
 0x665   :  { %v1435_v57 = vmul.f32 0.5, %v1434_v33  ;;  %v1585_v5 = vstv %s1904_s1  ;;  %s1906_s0 = spop %1905  ;;  %v1511_v51 = vmul.f32 %v1510_v6, %v822_v59 }
 0x666   :  { %v1586_v43 = vmul.f32 %v1585_v5, %v822_v59  ;;  %v1662_v23 = vstv %s1906_s0 }
 0x667   :  { %v1436_v42 = vadd.f32 %v1435_v57, %v1224_v61  ;;  %v1663_v50 = vmul.f32 %v1662_v23, %v822_v59 }
 0x668   :  { %v1587_v13 = vadd.f32 %v1586_v43, %v1511_v51 }
 0x669   :  { %v1763_v11 = vmul.f32 %v1762_v44, %v1436_v42 }
 0x66a   :  { %v1588_v3 = vmul.f32 0.5, %v1587_v13 }
 0x66b   :  { %s1908_s9 = spop %1907  ;;  %v1764_v47 = vmul.f32 %v1763_v11, %v1760_v2 }
 0x66c   :  { %v1737_v48 = vstv %s1908_s9 }
 0x66d   :  { %v1738_v53 = vmul.f32 %v1737_v48, %v822_v59  ;;  %v1765_v0 = vadd.f32 %v1764_v47, %v1761_v56 }
 0x66f   :  { %v1739_v52 = vadd.f32 %v1738_v53, %v1663_v50 }
 0x671   :  { %v1740_v29 = vmul.f32 0.5, %v1739_v52 }
 0x673   :  { %v1741_v16 = vadd.f32 %v1740_v29, %v1588_v3 }
 0x675   :  { %v1767_v12 = vmul.f32 %v1766_v22, %v1741_v16 }
 0x677   :  { %v1768_v14 = vadd.f32 %v1767_v12, %v1765_v0 }
 0x679   :  { %v1772_v59 = vsel %vm1771_vm15, %v1768_v14, 0.0 }
 0x67a   :  { %v1774_v20 = vsel %vm1773_vm0, %v1009_v46, %v1772_v59 }
 0x67b   :  { %v1776_v62 = vsel %vm1775_vm3, %v1009_v46, %v1774_v20 }
 0x67c   :  { %v1778_v26 = vsel %vm1777_vm4, %v1011_v15, %v1776_v62 }
 0x67d   :  { %v1780_v18 = vsel %vm1779_vm5, %v1013_v24, %v1778_v26 }
 0x67e   :  { %v1782_v1 = vsel %vm1781_vm6, %v1436_v42, %v1780_v18 }
 0x67f   :  { %v1784_v7 = vsel %vm1783_vm7, %v1741_v16, %v1782_v1 }
 0x680   :  { %v1786_v30 = vsel %vm1785_vm8, %v1766_v22, %v1784_v7 }
 0x681   :  { %1787 = vst [vmem:[#allocation5] sm:$0x1] %v1786_v30 }
 0x682   :  { %2090 = shalt.err (!%p2087_p9)
}
 0x683   :  { %1798 = dma.vmem_to_hbm [thread:$0]  %s1794_s21, 16, %s1796_s25, [#allocation3]  }
 0x684   :  { %2093 = dma.done.wait [#allocation3], 16  }
 0x685   :  { %2094 = vsyncadd [#allocation3], 4294967280 }
 0x686   :  { %1803 = vsyncpa [#allocation3], 1 }
 0x687   :  { %1804 = vsyncpa [#allocation4], 1 }

</bundles_post_ra>
